<compile_context>
chip_gen: v5e
topology: v5e:2x2
jax: 0.10.0
libtpu: 0.0.40
codegen_flags: <defaults>
</compile_context>

<pallas_src>
import functools

import jax
import jax.numpy as jnp
from jax.experimental import pallas as pl
from jax.experimental.pallas import tpu as pltpu

_MIB = 1024 * 1024


# --------------------------------------------------------------------------- #
# Kernels                                                                      #
# --------------------------------------------------------------------------- #
def _bert_mlp_resident_kernel(x_ref, wi_up_ref, wi_gate_ref, wo_ref, o_ref,
                              *, swiglu_dtype):
    """Weights fully VMEM-resident; 1-D grid over token tiles."""
    x = x_ref[...]
    up = jnp.dot(x, wi_up_ref[...], preferred_element_type=swiglu_dtype)
    gate = jnp.dot(x, wi_gate_ref[...], preferred_element_type=swiglu_dtype)
    s = gate * jax.nn.sigmoid(gate) * up                      # silu(gate) * up
    o_ref[...] = jnp.dot(s.astype(wo_ref.dtype), wo_ref[...],
                         preferred_element_type=jnp.float32).astype(o_ref.dtype)


def _bert_mlp_stream_kernel(x_ref, wi_up_ref, wi_gate_ref, wo_ref, o_ref,
                            acc_ref, *, swiglu_dtype):
    """Hidden dimension streamed in chunks (grid axis 1), f32 accumulation."""
    k = pl.program_id(1)

    @pl.when(k == 0)
    def _init():
        acc_ref[...] = jnp.zeros_like(acc_ref)

    x = x_ref[...]
    up = jnp.dot(x, wi_up_ref[...], preferred_element_type=swiglu_dtype)
    gate = jnp.dot(x, wi_gate_ref[...], preferred_element_type=swiglu_dtype)
    s = gate * jax.nn.sigmoid(gate) * up
    acc_ref[...] += jnp.dot(s.astype(wo_ref.dtype), wo_ref[...],
                            preferred_element_type=jnp.float32)

    @pl.when(k == pl.num_programs(1) - 1)
    def _finalize():
        # TODO(synk): dropout_p fixed at 0.0 (inference semantics); no RNG mask.
        o_ref[...] = acc_ref[...].astype(o_ref.dtype)


# --------------------------------------------------------------------------- #
# Helpers                                                                      #
# --------------------------------------------------------------------------- #
def _round_up(x, m):
    return ((x + m - 1) // m) * m


def _tpu_kind():
    try:
        return jax.devices()[0].device_kind.lower()
    except Exception:
        return ""


def _pick_hidden_chunk(hidden, target, quantum=128):
    """Largest multiple of `quantum` <= target that divides hidden, else hidden."""
    if hidden <= target:
        return hidden
    best = hidden
    c = quantum
    while c <= target:
        if hidden % c == 0:
            best = c
        c += quantum
    return best


def _token_tile(M, tm_target, min_tiles=2):
    """Token tile: multiple of 8, <= padded M, and (if possible) >= min_tiles tiles."""
    tm = min(tm_target, _round_up(M, 8))
    if M > 8 * min_tiles:
        while _round_up(M, tm) // tm < min_tiles and tm > 8:
            tm = max(8, _round_up(tm // 2, 8))
    return tm


def _resident_vmem_bytes(tm, d_model, hidden, c_sz, o_sz, sw_sz):
    weights = 2 * 3 * d_model * hidden * c_sz            # double-buffer allocation
    io = 2 * tm * d_model * (c_sz + o_sz)                 # x + out tiles (2 buffers)
    inter = 3 * tm * hidden * sw_sz + tm * d_model * 4    # up/gate/s + f32 dot result
    return weights + io + inter


def _stream_vmem_bytes(tm, th, d_model, c_sz, o_sz, sw_sz):
    weights = 2 * 3 * d_model * th * c_sz
    io = 2 * tm * d_model * (c_sz + o_sz)
    acc = tm * d_model * 4
    inter = 3 * tm * th * sw_sz + tm * d_model * 4
    return weights + io + acc + inter


# --------------------------------------------------------------------------- #
# Weight preparation (hoisted out of the forward hot path)                     #
# --------------------------------------------------------------------------- #
def prepare_bert_mlp_weights(w_in, w_out, compute_dtype=jnp.bfloat16):
    """One-time weight prep.

    w_in : (2*hidden, d_model) -- rows [:hidden] -> up, rows [hidden:] -> gate.
    w_out: (d_model, hidden)
    Returns (wi_up, wi_gate, wo): (d_model, hidden), (d_model, hidden), (hidden, d_model).
    """
    two_hidden, d_model = w_in.shape
    hidden = two_hidden // 2
    assert w_out.shape == (d_model, hidden)
    wi_up = jnp.asarray(w_in[:hidden].T, dtype=compute_dtype)
    wi_gate = jnp.asarray(w_in[hidden:].T, dtype=compute_dtype)
    wo = jnp.asarray(w_out.T, dtype=compute_dtype)
    return wi_up, wi_gate, wo


# --------------------------------------------------------------------------- #
# Forward                                                                      #
# --------------------------------------------------------------------------- #
def bert_mlp(x, wi_up, wi_gate, wo, *, tm=None, th=None, swiglu_dtype=None,
             vmem_limit_bytes=None):
    """x: (batch, seq, d_model). Weights from prepare_bert_mlp_weights()."""
    batch, seq, d_model = x.shape
    d_model_w, hidden = wi_up.shape
    assert d_model_w == d_model
    assert wi_gate.shape == (d_model, hidden) and wo.shape == (hidden, d_model)

    compute_dtype = wi_up.dtype
    out_dtype = x.dtype
    c_sz = jnp.dtype(compute_dtype).itemsize
    o_sz = jnp.dtype(out_dtype).itemsize

    kind = _tpu_kind()
    is_v7 = ("v7" in kind) or ("7x" in kind)
    old_gen = any(g in kind for g in ("v2", "v3", "v4", "v5"))

    # SwiGLU intermediate dtype: bf16 on v6e/v7x (bf16 VPU/EUP), f32 on <= v5e
    # (no bf16 vector path there) or when the compute dtype is already f32.
    if swiglu_dtype is None:
        swiglu_dtype = (jnp.float32
                        if (old_gen or compute_dtype == jnp.float32)
                        else compute_dtype)
    sw_sz = jnp.dtype(swiglu_dtype).itemsize

    # Per-generation VMEM budget (v7x has 64 MiB/TC; v5e/v6e have 128 MiB).
    budget = (60 if is_v7 else 100) * _MIB

    M = batch * seq
    tm_target = tm if tm is not None else (512 if old_gen else 1024)
    th_target = th if th is not None else (1024 if is_v7 else 2048)
    force_stream = (th is not None) and (th < hidden)

    # ----- variant + tile selection (validated against the VMEM budget) -----
    tm_candidates = []
    t = max(tm_target, 128)
    while t >= 128:
        tm_candidates.append(t)
        t //= 2
    if tm_candidates[-1] != 128:
        tm_candidates.append(128)

    variant, tm_eff, th_eff = None, None, None
    if not force_stream:
        for tm_c in tm_candidates:
            cand = _token_tile(M, tm_c)
            if _resident_vmem_bytes(cand, d_model, hidden, c_sz, o_sz, sw_sz) <= budget:
                variant, tm_eff, th_eff = "resident", cand, hidden
                break
    if variant is None:
        th_eff = _pick_hidden_chunk(hidden, th_target)
        while variant is None:
            for tm_c in tm_candidates:
                cand = _token_tile(M, tm_c)
                if _stream_vmem_bytes(cand, th_eff, d_model, c_sz, o_sz, sw_sz) <= budget:
                    variant, tm_eff = "stream", cand
                    break
            if variant is None:
                new_th = _pick_hidden_chunk(hidden, max(128, th_eff // 2))
                if new_th >= th_eff:  # cannot shrink further -> smallest config
                    variant, tm_eff, th_eff = "stream", _token_tile(M, 128), new_th
                else:
                    th_eff = new_th

    if variant == "resident":
        need = _resident_vmem_bytes(tm_eff, d_model, hidden, c_sz, o_sz, sw_sz)
    else:
        need = _stream_vmem_bytes(tm_eff, th_eff, d_model, c_sz, o_sz, sw_sz)
    if vmem_limit_bytes is None:
        vmem_limit_bytes = int(min(budget, max(2 * need + 16 * _MIB, 32 * _MIB)))

    M_pad = _round_up(M, tm_eff)

    # ----- flatten + pad tokens ---------------------------------------------
    x2d = x.reshape(M, d_model).astype(compute_dtype)
    if M_pad != M:
        x2d = jnp.pad(x2d, ((0, M_pad - M), (0, 0)))

    n_token_tiles = M_pad // tm_eff
    weight_bytes = 3 * d_model * hidden * c_sz
    n_weight_reads = 1 if variant == "resident" else n_token_tiles
    cost = pl.CostEstimate(
        flops=6 * M * d_model * hidden,             # up + gate + down projections
        transcendentals=M * hidden,                 # sigmoid
        bytes_accessed=(M_pad * d_model * (c_sz + o_sz)
                        + n_weight_reads * weight_bytes),
    )

    if variant == "resident":
        kernel = functools.partial(_bert_mlp_resident_kernel,
                                   swiglu_dtype=swiglu_dtype)
        grid = (n_token_tiles,)
        in_specs = [
            pl.BlockSpec((tm_eff, d_model), lambda i: (i, 0)),     # x tile
            pl.BlockSpec((d_model, hidden), lambda i: (0, 0)),     # Wi up (resident)
            pl.BlockSpec((d_model, hidden), lambda i: (0, 0)),     # Wi gate (resident)
            pl.BlockSpec((hidden, d_model), lambda i: (0, 0)),     # Wo (resident)
        ]
        out_spec = pl.BlockSpec((tm_eff, d_model), lambda i: (i, 0))
        scratch = []
        dims = ("parallel",)
    else:
        kernel = functools.partial(_bert_mlp_stream_kernel,
                                   swiglu_dtype=swiglu_dtype)
        grid = (n_token_tiles, hidden // th_eff)
        in_specs = [
            pl.BlockSpec((tm_eff, d_model), lambda i, k: (i, 0)),  # x tile
            pl.BlockSpec((d_model, th_eff), lambda i, k: (0, k)),  # Wi up chunk
            pl.BlockSpec((d_model, th_eff), lambda i, k: (0, k)),  # Wi gate chunk
            pl.BlockSpec((th_eff, d_model), lambda i, k: (k, 0)),  # Wo chunk
        ]
        out_spec = pl.BlockSpec((tm_eff, d_model), lambda i, k: (i, 0))
        scratch = [pltpu.VMEM((tm_eff, d_model), jnp.float32)]
        dims = ("parallel", "arbitrary")

    out2d = pl.pallas_call(
        kernel,
        out_shape=jax.ShapeDtypeStruct((M_pad, d_model), out_dtype),
        grid_spec=pltpu.PrefetchScalarGridSpec(
            num_scalar_prefetch=0,
            grid=grid,
            in_specs=in_specs,
            out_specs=out_spec,
            scratch_shapes=scratch,
        ),
        compiler_params=pltpu.CompilerParams(
            dimension_semantics=dims,
            vmem_limit_bytes=int(vmem_limit_bytes),
        ),
        cost_estimate=cost,
    )(x2d, wi_up, wi_gate, wo)

    return out2d[:M].reshape(batch, seq, d_model)


# --------------------------------------------------------------------------- #
# Reference + self-test                                                        #
# --------------------------------------------------------------------------- #
def _reference(x, w_in, w_out):
    hidden = w_in.shape[0] // 2
    h = jnp.einsum("bsd,hd->bsh", x, w_in)
    up, gate = h[..., :hidden], h[..., hidden:]
    s = jax.nn.silu(gate) * up
    return jnp.einsum("bsh,dh->bsd", s, w_out)


if __name__ == "__main__":
    # d_model >= 128 so the output BlockSpec is lane-dense; M = 300 exercises
    # token padding and multiple token tiles; hidden = 512 with th = 128
    # exercises the k-looped accumulator path in the forced-streaming test.
    batch, seq = 2, 150
    d_model, hidden_dim = 128, 512

    key = jax.random.PRNGKey(0)
    kx, kwi, kwo = jax.random.split(key, 3)

    x = jax.random.normal(kx, (batch, seq, d_model), dtype=jnp.float32)
    # trunc_normal_(std=0.002): the +/-2.0 absolute cutoff is ~1000 std away, so
    # a plain normal * 0.002 matches the init distribution for practical purposes.
    w_in = 0.002 * jax.random.normal(kwi, (2 * hidden_dim, d_model), dtype=jnp.float32)
    w_out = 0.002 * jax.random.normal(kwo, (d_model, hidden_dim), dtype=jnp.float32)

    ref = _reference(x, w_in, w_out)

    # --- f32 compute, resident-weights variant (auto-selected): tight check ---
    wf32 = prepare_bert_mlp_weights(w_in, w_out, compute_dtype=jnp.float32)
    out_res = jax.block_until_ready(bert_mlp(x, *wf32))
    assert out_res.shape == (batch, seq, d_model)
    assert jnp.allclose(out_res, ref, atol=2e-6, rtol=1e-3), "f32 resident mismatch"

    # --- f32 compute, forced streaming variant (k-loop accumulator path) ------
    out_stream = jax.block_until_ready(bert_mlp(x, *wf32, tm=128, th=128))
    assert out_stream.shape == (batch, seq, d_model)
    assert jnp.allclose(out_stream, ref, atol=2e-6, rtol=1e-3), "f32 stream mismatch"

    # --- default bf16 compute path (f32 final accumulation): looser tolerance --
    wbf16 = prepare_bert_mlp_weights(w_in, w_out, compute_dtype=jnp.bfloat16)
    out_bf16 = jax.block_until_ready(bert_mlp(x, *wbf16))
    assert out_bf16.shape == (batch, seq, d_model)
    assert jnp.allclose(out_bf16, ref, atol=5e-6, rtol=1e-1), "bf16 mismatch"

    print("KERNEL_OK")
</pallas_src>

<mosaic_0001>
module attributes {stable_mosaic.version = 11 : i64} {
  func.func @_bert_mlp_resident_kernel(%arg0: i32, %arg1: memref<152x128xf32, #tpu.memory_space<vmem>>, %arg2: memref<128x512xf32, #tpu.memory_space<vmem>>, %arg3: memref<128x512xf32, #tpu.memory_space<vmem>>, %arg4: memref<512x128xf32, #tpu.memory_space<vmem>>, %arg5: memref<152x128xf32, #tpu.memory_space<vmem>>) attributes {dimension_semantics = [#tpu.dimension_semantics<parallel>], iteration_bounds = array<i64: 2>, scalar_prefetch = 0 : i64, scratch_operands = 0 : i64, tpu.core_type = #tpu.core_type<tc>, window_params = [{transform_indices = @transform_0, window_bounds = array<i64: 152, 128>}, {pipeline_mode = #tpu.pipeline_mode<synchronous>, transform_indices = @transform_1, window_bounds = array<i64: 128, 512>}, {pipeline_mode = #tpu.pipeline_mode<synchronous>, transform_indices = @transform_2, window_bounds = array<i64: 128, 512>}, {pipeline_mode = #tpu.pipeline_mode<synchronous>, transform_indices = @transform_3, window_bounds = array<i64: 512, 128>}, {transform_indices = @transform_4, window_bounds = array<i64: 152, 128>}]} {
    %c0 = arith.constant 0 : index
    %c0_0 = arith.constant 0 : index
    %0 = vector.load %arg1[%c0, %c0_0] : memref<152x128xf32, #tpu.memory_space<vmem>>, vector<152x128xf32>
    %c0_1 = arith.constant 0 : index
    %c0_2 = arith.constant 0 : index
    %1 = vector.load %arg2[%c0_1, %c0_2] : memref<128x512xf32, #tpu.memory_space<vmem>>, vector<128x512xf32>
    %cst = arith.constant dense<0.000000e+00> : vector<152x512xf32>
    %2 = tpu.matmul %0, %1, %cst {dimension_numbers = #tpu.dot_dimension_numbers<[1], [0], [0], [1], [0, 0, 1, 1], [], []>} : vector<152x128xf32>, vector<128x512xf32>, vector<152x512xf32> -> vector<152x512xf32>
    %c0_3 = arith.constant 0 : index
    %c0_4 = arith.constant 0 : index
    %3 = vector.load %arg3[%c0_3, %c0_4] : memref<128x512xf32, #tpu.memory_space<vmem>>, vector<128x512xf32>
    %cst_5 = arith.constant dense<0.000000e+00> : vector<152x512xf32>
    %4 = tpu.matmul %0, %3, %cst_5 {dimension_numbers = #tpu.dot_dimension_numbers<[1], [0], [0], [1], [0, 0, 1, 1], [], []>} : vector<152x128xf32>, vector<128x512xf32>, vector<152x512xf32> -> vector<152x512xf32>
    %5 = arith.negf %4 : vector<152x512xf32>
    %6 = math.exp %5 : vector<152x512xf32>
    %cst_6 = arith.constant 1.000000e+00 : f32
    %7 = vector.broadcast %cst_6 : f32 to vector<152x512xf32>
    %8 = arith.addf %7, %6 : vector<152x512xf32>
    %9 = arith.divf %7, %8 : vector<152x512xf32>
    %10 = arith.mulf %4, %9 : vector<152x512xf32>
    %11 = arith.mulf %10, %2 : vector<152x512xf32>
    %c0_7 = arith.constant 0 : index
    %c0_8 = arith.constant 0 : index
    %12 = vector.load %arg4[%c0_7, %c0_8] : memref<512x128xf32, #tpu.memory_space<vmem>>, vector<512x128xf32>
    %cst_9 = arith.constant dense<0.000000e+00> : vector<152x128xf32>
    %13 = tpu.matmul %11, %12, %cst_9 {dimension_numbers = #tpu.dot_dimension_numbers<[1], [0], [0], [1], [0, 0, 1, 1], [], []>} : vector<152x512xf32>, vector<512x128xf32>, vector<152x128xf32> -> vector<152x128xf32>
    %c0_10 = arith.constant 0 : index
    %c0_11 = arith.constant 0 : index
    %14 = vector.load %arg5[%c0_10, %c0_11] : memref<152x128xf32, #tpu.memory_space<vmem>>, vector<152x128xf32>
    tpu.vector_store %arg5[%c0_10, %c0_11], %13 {strides = array<i32>} : memref<152x128xf32, #tpu.memory_space<vmem>>, vector<152x128xf32>,
    return
  }
  func.func @transform_0(%arg0: i32) -> (i32, i32) {
    %c0_i32 = arith.constant 0 : i32
    %c0_i32_0 = arith.constant 0 : i32
    return %arg0, %c0_i32 : i32, i32
  }
  func.func @transform_1(%arg0: i32) -> (i32, i32) {
    %c0_i32 = arith.constant 0 : i32
    %c0_i32_0 = arith.constant 0 : i32
    %c0_i32_1 = arith.constant 0 : i32
    return %c0_i32, %c0_i32_0 : i32, i32
  }
  func.func @transform_2(%arg0: i32) -> (i32, i32) {
    %c0_i32 = arith.constant 0 : i32
    %c0_i32_0 = arith.constant 0 : i32
    %c0_i32_1 = arith.constant 0 : i32
    return %c0_i32, %c0_i32_0 : i32, i32
  }
  func.func @transform_3(%arg0: i32) -> (i32, i32) {
    %c0_i32 = arith.constant 0 : i32
    %c0_i32_0 = arith.constant 0 : i32
    %c0_i32_1 = arith.constant 0 : i32
    return %c0_i32, %c0_i32_0 : i32, i32
  }
  func.func @transform_4(%arg0: i32) -> (i32, i32) {
    %c0_i32 = arith.constant 0 : i32
    %c0_i32_0 = arith.constant 0 : i32
    return %arg0, %c0_i32 : i32, i32
  }
}

</mosaic_0001>

<bundles_post_ra>
// kernel: tpu_custom_call.1
= control target key start
LH: loop header
LB: loop body
LE: loop exit
PB: predicated region body
PF: predicated region fallthrough
CT: control target
= control target key end

     0   :  { %9 = vsyncpa [#allocation3], 0  ;;  %s6961_s0 = inlined_call_operand.hbm [shape: f32[304,128], index: 0, kind: input, shape index: {}]   ;;  %s6962_s1 = inlined_call_operand.hbm [shape: f32[128,512], index: 1, kind: input, shape index: {}]   ;;  %s6963_s2 = inlined_call_operand.hbm [shape: f32[128,512], index: 2, kind: input, shape index: {}]   ;;  %s6964_s3 = inlined_call_operand.hbm [shape: f32[512,128], index: 3, kind: input, shape index: {}]   ;;  %s6965_s4 = inlined_call_operand.hbm [shape: f32[304,128], index: 4, kind: output, shape index: {}]  }
   0x1   :  { %11 = vsyncpa [#allocation3 + $0x1], 0 }
   0x2   :  { %12 = vsyncpa [#allocation6], 0 }
   0x3   :  { %13 = vsyncpa [#allocation9], 0 }
   0x4   :  { %14 = vsyncpa [#allocation4], 0 }
   0x5   :  { %16 = vsyncpa [#allocation4 + $0x1], 0  ;;  %s3813_s15 = smov 0   ;;  %s3815_s16 = smov 0  }
   0x6   :  { %s3817_s17 = smov 0   ;;  %s3819_s18 = smov 0  }
   0x7 LB: > { %s3834_s19 = sadd.s32 4294967295, %s3777_s18   ;;  %s3102_s20 = sadd.s32 4294967294, %s3777_s18   ;;  %s3777_s18 = sphi %s3819_s18, %s7352_s18   ;;  %s3773_s17 = sphi %s3817_s17, %s7351_s17   ;;  %s3769_s16 = sphi %s3815_s16, %s7350_s16   ;;  %s3765_s15 = sphi %s3813_s15, %s7349_s15  }
   0x8   : > { %p42_p0 = scmp.ne.s32.totalorder %s3769_s16, %s3765_s15  ;;  %p43_p1 = scmp.eq.s32.totalorder %s3834_s19, 0 }
   0x9   : > { %p129_p2 = scmp.eq.s32.totalorder %s3834_s19, 1  ;;  %p135_p3 = scmp.eq.s32.totalorder %s3102_s20, 1 }
   0xa   : > { %p3843_p4 = por %p43_p1, %p42_p0  ;;  %p3103_p5 = scmp.ge.s32.totalorder %s3777_s18, 1 }
   0xb   : > { %p3848_p6 = por %p135_p3, %p42_p0  ;;  %p142_p7 = scmp.lt.s32.totalorder %s3777_s18, 3 }
   0xc   : > { %s153_s25 = sshll.u32 %s6962_s1, 4  ;;  %s3779_s27 = smov [#allocation5]   ;;  %s154_s25 = int_to_ptr.hbm [resolvable:$true] %s153_s25 }
   0xd   : > { %p3856_p8 = pnand %p3103_p5, %p142_p7  ;;  %s155_s28 = sshll.u32 %s3779_s27, 4  ;;  %s156_s28 = int_to_ptr.vmem [resolvable:$true] %s155_s28 }
   0xe   : > { %s167_s6 = sshll.u32 %s6963_s2, 4  ;;  %s3780_s7 = smov 512   ;;  %s168_s6 = int_to_ptr.hbm [resolvable:$true] %s167_s6 }
   0xf   : > { %p3212_p9 = pneg %p3856_p8  ;;  %s3781_s8 = smov 32  }
  0x10   : > { %s3782_s9 = smov [#allocation7]   ;;  %s181_s13 = sshll.u32 %s6964_s3, 4  ;;  %s182_s13 = int_to_ptr.hbm [resolvable:$true] %s181_s13 }
  0x11   : > { %p3864_p10 = pnand %p3212_p9, %p43_p1  ;;  %s169_s10 = sshll.u32 %s3782_s9, 4  ;;  %s170_s10 = int_to_ptr.vmem [resolvable:$true] %s169_s10 }
  0x12   : > { %s3783_s14 = smov [#allocation8]   ;;  %s6966_s23 = smov 128  }
  0x13   : > { %3215 = dma.hbm_to_vmem [thread:$0]  (!%p3864_p10), %s154_s25, 8192, %s156_s28, [#allocation6], %s3780_s7, %s3780_s7, %s3781_s8  }
  0x14   : > { %3218 = dma.hbm_to_vmem [thread:$0]  (!%p3864_p10), %s168_s6, 8192, %s170_s10, [#allocation6], %s3780_s7, %s3780_s7, %s3781_s8  }
  0x15   : > { %s183_s20 = sshll.u32 %s3783_s14, 4  ;;  %s6967_s24 = smov 8   ;;  %s184_s20 = int_to_ptr.vmem [resolvable:$true] %s183_s20 }
  0x16   : > { %3221 = dma.hbm_to_vmem [thread:$0]  (!%p3864_p10), %s182_s13, 8192, %s184_s20, [#allocation9], %s6966_s23, %s6966_s23, %s6967_s24  }
  0x17   : > { %s3885_s25 = sadd.s32 1, %s3777_s18   ;;  %s29_s28 = sadd.s32 1, %s3773_s17 }
  0x18   : > { %s26_s27 = ssub.s32 %s3777_s18, %s3885_s25  ;;  %p36_p13 = scmp.ne.s32.totalorder %s3773_s17, %s3769_s16 }
  0x19   : > { %p27_p12 = scmp.eq.s32.totalorder %s26_s27, 0  ;;  %p37_p0 = scmp.eq.s32.totalorder %s3777_s18, 0 }
  0x1a   : > { %p3233_p3 = scmp.lt.s32.totalorder %s3777_s18, 2  ;;  %p3899_p7 = por %p129_p2, %p36_p13 }
  0x1b   : > { %s3895_s30 = scalar_select %p27_p12, %s3773_s17, %s29_s28  }
  0x1c   : > { %p38_p5 = por %p37_p0, %p36_p13  ;;  %s197_s29 = sand.u32 1, %s3773_s17  }
  0x1d   : > { %s3192_s6 = smul.u32 152, %s3777_s18  ;;  %s198_s20 = scalar_lea.sflag [#allocation3], %s197_s29 }
  0x1e   : > { %s3194_s7 = smul.u32 152, %s197_s29  ;;  %p3908_p9 = pnand %p3233_p3, %p38_p5 }
  0x1f   : > { %s206_s10 = scalar_lea.hbm %s6961_s0, %s3192_s6  ;;  %s3680_s9 = scalar_lea.hbm %s6961_s0, 304 }
  0x20   : > { %s207_s12 = sshll.u32 %s206_s10, 4  ;;  %s201_s13 = scalar_lea.vmem [#allocation2], %s3194_s7  ;;  %s208_s12 = int_to_ptr.hbm [resolvable:$true] %s207_s12 }
  0x21   : > { %s209_s14 = sshll.u32 %s201_s13, 4  ;;  %s3673_s27 = sshra.s32 %s208_s12, 4  ;;  %s210_s14 = int_to_ptr.vmem [resolvable:$true] %s209_s14  ;;  %s3674_s27 = int_to_ptr.hbm [resolvable:$true] %s3673_s27 }
  0x22   : > { %s3675_s28 = scalar_lea.hbm %s3674_s27, 152  ;;  %p3677_p10 = pneg %p3908_p9 }
  0x23   : > { %p3676_p2 = scmp.ne.s32.totalorder %s3674_s27, %s3675_s28  ;;  %p3681_p0 = scmp.lt.s32.totalorder %s3674_s27, %s6961_s0 }
  0x24   : > { %p3682_p3 = scmp.lt.s32.totalorder %s3680_s9, %s3675_s28 }
  0x25   : > { %p3678_p12 = pnand %p3677_p10, %p3676_p2 }
  0x26   : > { %p3683_p5 = por %p3682_p3, %p3681_p0 }
  0x27   : > { %p3679_p13 = pneg %p3678_p12 }
  0x29   : > { %p3684_p11 = pnand %p3683_p5, %p3679_p13 }
  0x2b   : > { %3687 = shalt.err (!%p3684_p11)
}
  0x2c   : > { %s6975_s29 = smov 8   ;;  %s6976_s7 = smov 128  }
  0x2d   : > { %3225 = dma.hbm_to_vmem [thread:$0]  (!%p3908_p9), %s208_s12, 2432, %s210_s14, %s198_s20, %s6976_s7, %s6976_s7, %s6975_s29  }
  0x2e   : > { %221 = sbr.rel (%p3856_p8) target bundleno = 880 (0x370), region = 36 }
  0x33   : > { %s3928_s10 = sand.u32 1, %s3769_s16  }
  0x34   : > { %s3195_s23 = smul.u32 152, %s3928_s10  ;;  %s224_s24 = scalar_lea.sflag [#allocation3], %s3928_s10 }
  0x36   : > { %s3934_s13 = scalar_lea.vmem [#allocation2], %s3195_s23 }
  0x37   : > { %3748 = dma.done.wait (%p3843_p4), %s224_s24, 2432  }
  0x38   : > { %3750 = vsyncadd (%p3843_p4), %s224_s24, 4294964864 }
  0x39   : > { %3752 = dma.done.wait (%p43_p1), [#allocation6], 16384  }
  0x3a   : > { %3754 = vsyncadd (%p43_p1), [#allocation6], 4294950912 }
  0x3b   : > { %3756 = dma.done.wait (%p43_p1), [#allocation9], 8192  }
  0x3c   : > { %3758 = vsyncadd (%p43_p1), [#allocation9], 4294959104  ;;  %v349_v0 = vld [vmem:[#allocation5 + $0x1e0] sm:$0xff]  ;;  %v350_v1 = vld [vmem:[#allocation5 + $0x1e8] sm:$0xff]  ;;  %s6895_s21 = scalar_lea.vmem [#allocation10], %s3195_s23  ;;  %s3193_s26 = smul.u32 152, %s3834_s19 }
  0x3d   : > { %v351_v2 = vld [vmem:[#allocation5 + $0x1f0] sm:$0xff]  ;;  %353 = vmatpush.msra.mxu0 %v349_v0  ;;  %427 = vmatpush.msra.mxu1 %v350_v1  ;;  %v352_v3 = vld [vmem:[#allocation5 + $0x1f8] sm:$0xff]  ;;  %v345_v4 = vld [vmem:[#allocation5 + $0x1c0] sm:$0xff]  ;;  %s2997_s20 = sshll.u32 %s6895_s21, 4  ;;  %s2985_s28 = scalar_lea.sflag [#allocation4], %s3928_s10  ;;  %s2998_s20 = int_to_ptr.vmem [resolvable:$true] %s2997_s20 }
  0x3e   : > { %v346_v5 = vld [vmem:[#allocation5 + $0x1c8] sm:$0xff]  ;;  %501 = vmatpush.msra.mxu2 %v351_v2  ;;  %575 = vmatpush.msra.mxu3 %v352_v3  ;;  %v347_v6 = vld [vmem:[#allocation5 + $0x1d0] sm:$0xff]  ;;  %v348_v7 = vld [vmem:[#allocation5 + $0x1d8] sm:$0xff]  ;;  %s2996_s14 = scalar_lea.hbm %s6965_s4, %s3193_s26  ;;  %s3723_s29 = scalar_lea.hbm %s6965_s4, 304 }
  0x3f   : > { %v341_v8 = vld [vmem:[#allocation5 + $0x1a0] sm:$0xff]  ;;  %354 = vmatpush.msra.mxu0 %v345_v4  ;;  %428 = vmatpush.msra.mxu1 %v346_v5  ;;  %v342_v9 = vld [vmem:[#allocation5 + $0x1a8] sm:$0xff]  ;;  %v343_v10 = vld [vmem:[#allocation5 + $0x1b0] sm:$0xff]  ;;  %s2999_s27 = sshll.u32 %s2996_s14, 4  ;;  %s3000_s27 = int_to_ptr.hbm [resolvable:$true] %s2999_s27 }
  0x40   : > { %v344_v11 = vld [vmem:[#allocation5 + $0x1b8] sm:$0xff]  ;;  %502 = vmatpush.msra.mxu2 %v347_v6  ;;  %576 = vmatpush.msra.mxu3 %v348_v7  ;;  %v337_v12 = vld [vmem:[#allocation5 + $0x180] sm:$0xff]  ;;  %v338_v13 = vld [vmem:[#allocation5 + $0x188] sm:$0xff]  ;;  %s3717_s6 = sshra.s32 %s3000_s27, 4  ;;  %s3718_s6 = int_to_ptr.hbm [resolvable:$true] %s3717_s6 }
  0x41   : > { %355 = vmatpush.msra.mxu0 %v341_v8  ;;  %429 = vmatpush.msra.mxu1 %v342_v9  ;;  %v339_v14 = vld [vmem:[#allocation5 + $0x190] sm:$0xff]  ;;  %v340_v15 = vld [vmem:[#allocation5 + $0x198] sm:$0xff]  ;;  %v333_v16 = vld [vmem:[#allocation5 + $0x160] sm:$0xff]  ;;  %s3719_s19 = scalar_lea.hbm %s3718_s6, 152  ;;  %p3724_p11 = scmp.lt.s32.totalorder %s3718_s6, %s6965_s4 }
  0x42   : > { %503 = vmatpush.msra.mxu2 %v343_v10  ;;  %577 = vmatpush.msra.mxu3 %v344_v11  ;;  %v334_v17 = vld [vmem:[#allocation5 + $0x168] sm:$0xff]  ;;  %v335_v18 = vld [vmem:[#allocation5 + $0x170] sm:$0xff]  ;;  %v336_v19 = vld [vmem:[#allocation5 + $0x178] sm:$0xff]  ;;  %p3720_p1 = scmp.ne.s32.totalorder %s3718_s6, %s3719_s19  ;;  %p3725_p9 = scmp.lt.s32.totalorder %s3723_s29, %s3719_s19 }
  0x43   : > { %356 = vmatpush.msra.mxu0 %v337_v12  ;;  %430 = vmatpush.msra.mxu1 %v338_v13  ;;  %v329_v20 = vld [vmem:[#allocation5 + $0x140] sm:$0xff]  ;;  %v330_v21 = vld [vmem:[#allocation5 + $0x148] sm:$0xff]  ;;  %v331_v22 = vld [vmem:[#allocation5 + $0x150] sm:$0xff] }
  0x44   : > { %504 = vmatpush.msra.mxu2 %v339_v14  ;;  %578 = vmatpush.msra.mxu3 %v340_v15  ;;  %v332_v23 = vld [vmem:[#allocation5 + $0x158] sm:$0xff]  ;;  %v325_v24 = vld [vmem:[#allocation5 + $0x120] sm:$0xff]  ;;  %v326_v25 = vld [vmem:[#allocation5 + $0x128] sm:$0xff]  ;;  %p3721_p4 = pnand %p3720_p1, %p3899_p7  ;;  %p3726_p2 = por %p3725_p9, %p3724_p11 }
  0x45   : > { %357 = vmatpush.msra.mxu0 %v333_v16  ;;  %431 = vmatpush.msra.mxu1 %v334_v17  ;;  %v327_v26 = vld [vmem:[#allocation5 + $0x130] sm:$0xff]  ;;  %v328_v27 = vld [vmem:[#allocation5 + $0x138] sm:$0xff]  ;;  %v321_v28 = vld [vmem:[#allocation5 + $0x100] sm:$0xff] }
  0x46   : > { %505 = vmatpush.msra.mxu2 %v335_v18  ;;  %579 = vmatpush.msra.mxu3 %v336_v19  ;;  %v322_v29 = vld [vmem:[#allocation5 + $0x108] sm:$0xff]  ;;  %v323_v30 = vld [vmem:[#allocation5 + $0x110] sm:$0xff]  ;;  %v324_v31 = vld [vmem:[#allocation5 + $0x118] sm:$0xff]  ;;  %p3722_p8 = pneg %p3721_p4 }
  0x47   : > { %358 = vmatpush.msra.mxu0 %v329_v20  ;;  %432 = vmatpush.msra.mxu1 %v330_v21  ;;  %v317_v32 = vld [vmem:[#allocation5 + $0xe0] sm:$0xff]  ;;  %v318_v33 = vld [vmem:[#allocation5 + $0xe8] sm:$0xff]  ;;  %v319_v34 = vld [vmem:[#allocation5 + $0xf0] sm:$0xff] }
  0x48   : > { %506 = vmatpush.msra.mxu2 %v331_v22  ;;  %580 = vmatpush.msra.mxu3 %v332_v23  ;;  %v320_v35 = vld [vmem:[#allocation5 + $0xf8] sm:$0xff]  ;;  %v313_v36 = vld [vmem:[#allocation5 + $0xc0] sm:$0xff]  ;;  %v314_v37 = vld [vmem:[#allocation5 + $0xc8] sm:$0xff]  ;;  %p3727_p10 = pnand %p3726_p2, %p3722_p8 }
  0x49   : > { %359 = vmatpush.msra.mxu0 %v325_v24  ;;  %433 = vmatpush.msra.mxu1 %v326_v25  ;;  %v315_v38 = vld [vmem:[#allocation5 + $0xd0] sm:$0xff]  ;;  %v316_v39 = vld [vmem:[#allocation5 + $0xd8] sm:$0xff]  ;;  %v309_v40 = vld [vmem:[#allocation5 + $0xa0] sm:$0xff] }
  0x4a   : > { %507 = vmatpush.msra.mxu2 %v327_v26  ;;  %581 = vmatpush.msra.mxu3 %v328_v27  ;;  %v310_v41 = vld [vmem:[#allocation5 + $0xa8] sm:$0xff]  ;;  %v311_v42 = vld [vmem:[#allocation5 + $0xb0] sm:$0xff]  ;;  %v312_v43 = vld [vmem:[#allocation5 + $0xb8] sm:$0xff] }
  0x4b   : > { %360 = vmatpush.msra.mxu0 %v321_v28  ;;  %434 = vmatpush.msra.mxu1 %v322_v29  ;;  %v305_v44 = vld [vmem:[#allocation5 + $0x80] sm:$0xff]  ;;  %v306_v45 = vld [vmem:[#allocation5 + $0x88] sm:$0xff]  ;;  %v307_v46 = vld [vmem:[#allocation5 + $0x90] sm:$0xff] }
  0x4c   : > { %508 = vmatpush.msra.mxu2 %v323_v30  ;;  %582 = vmatpush.msra.mxu3 %v324_v31  ;;  %v308_v47 = vld [vmem:[#allocation5 + $0x98] sm:$0xff]  ;;  %v301_v48 = vld [vmem:[#allocation5 + $0x60] sm:$0xff]  ;;  %v302_v49 = vld [vmem:[#allocation5 + $0x68] sm:$0xff] }
  0x4d   : > { %361 = vmatpush.msra.mxu0 %v317_v32  ;;  %435 = vmatpush.msra.mxu1 %v318_v33  ;;  %v303_v50 = vld [vmem:[#allocation5 + $0x70] sm:$0xff]  ;;  %v304_v51 = vld [vmem:[#allocation5 + $0x78] sm:$0xff]  ;;  %v297_v52 = vld [vmem:[#allocation5 + $0x40] sm:$0xff] }
  0x4e   : > { %509 = vmatpush.msra.mxu2 %v319_v34  ;;  %583 = vmatpush.msra.mxu3 %v320_v35  ;;  %v298_v53 = vld [vmem:[#allocation5 + $0x48] sm:$0xff]  ;;  %v299_v54 = vld [vmem:[#allocation5 + $0x50] sm:$0xff]  ;;  %v300_v55 = vld [vmem:[#allocation5 + $0x58] sm:$0xff] }
  0x4f   : > { %362 = vmatpush.msra.mxu0 %v313_v36  ;;  %436 = vmatpush.msra.mxu1 %v314_v37  ;;  %v293_v56 = vld [vmem:[#allocation5 + $0x20] sm:$0xff]  ;;  %v294_v57 = vld [vmem:[#allocation5 + $0x28] sm:$0xff]  ;;  %v295_v58 = vld [vmem:[#allocation5 + $0x30] sm:$0xff] }
  0x50   : > { %510 = vmatpush.msra.mxu2 %v315_v38  ;;  %584 = vmatpush.msra.mxu3 %v316_v39  ;;  %v296_v59 = vld [vmem:[#allocation5 + $0x38] sm:$0xff]  ;;  %v289_v60 = vld [vmem:[#allocation5] sm:$0xff]  ;;  %v290_v61 = vld [vmem:[#allocation5 + $0x8] sm:$0xff] }
  0x51   : > { %363 = vmatpush.msra.mxu0 %v309_v40  ;;  %437 = vmatpush.msra.mxu1 %v310_v41  ;;  %v291_v62 = vld [vmem:[#allocation5 + $0x10] sm:$0xff]  ;;  %v292_v63 = vld [vmem:[#allocation5 + $0x18] sm:$0xff]  ;;  %v709_v3 = vld [vmem:[#allocation7 + $0x1e0] sm:$0xff] }
  0x52   : > { %511 = vmatpush.msra.mxu2 %v311_v42  ;;  %585 = vmatpush.msra.mxu3 %v312_v43  ;;  %v3949_v0 = vld [vmem:[%s3934_s13] sm:$0xff]  ;;  %v712_v2 = vld [vmem:[#allocation7 + $0x1f8] sm:$0xff]  ;;  %v705_v7 = vld [vmem:[#allocation7 + $0x1c0] sm:$0xff] }
  0x53   : > { %364 = vmatpush.msra.mxu0 %v305_v44  ;;  %438 = vmatpush.msra.mxu1 %v306_v45  ;;  %v711_v1 = vld [vmem:[#allocation7 + $0x1f0] sm:$0xff]  ;;  %v710_v4 = vld [vmem:[#allocation7 + $0x1e8] sm:$0xff]  ;;  %v708_v6 = vld [vmem:[#allocation7 + $0x1d8] sm:$0xff] }
  0x54   : > { %512 = vmatpush.msra.mxu2 %v307_v46  ;;  %586 = vmatpush.msra.mxu3 %v308_v47  ;;  %v707_v5 = vld [vmem:[#allocation7 + $0x1d0] sm:$0xff]  ;;  %v706_v8 = vld [vmem:[#allocation7 + $0x1c8] sm:$0xff]  ;;  %v704_v10 = vld [vmem:[#allocation7 + $0x1b8] sm:$0xff] }
  0x55   : > { %365 = vmatpush.msra.mxu0 %v301_v48  ;;  %439 = vmatpush.msra.mxu1 %v302_v49  ;;  %v703_v9 = vld [vmem:[#allocation7 + $0x1b0] sm:$0xff]  ;;  %v701_v11 = vld [vmem:[#allocation7 + $0x1a0] sm:$0xff]  ;;  %v702_v12 = vld [vmem:[#allocation7 + $0x1a8] sm:$0xff] }
  0x56   : > { %513 = vmatpush.msra.mxu2 %v303_v50  ;;  %587 = vmatpush.msra.mxu3 %v304_v51  ;;  %v3956_v13 = vld [vmem:[%s3934_s13 + $0x8] sm:$0xff]  ;;  %v697_v16 = vld [vmem:[#allocation7 + $0x180] sm:$0xff]  ;;  %v698_v17 = vld [vmem:[#allocation7 + $0x188] sm:$0xff] }
  0x57   : > { %366 = vmatpush.msra.mxu0 %v297_v52  ;;  %440 = vmatpush.msra.mxu1 %v298_v53  ;;  %v699_v14 = vld [vmem:[#allocation7 + $0x190] sm:$0xff]  ;;  %v700_v15 = vld [vmem:[#allocation7 + $0x198] sm:$0xff]  ;;  %v693_v21 = vld [vmem:[#allocation7 + $0x160] sm:$0xff] }
  0x58   : > { %514 = vmatpush.msra.mxu2 %v299_v54  ;;  %588 = vmatpush.msra.mxu3 %v300_v55  ;;  %v695_v18 = vld [vmem:[#allocation7 + $0x170] sm:$0xff]  ;;  %v696_v19 = vld [vmem:[#allocation7 + $0x178] sm:$0xff]  ;;  %v694_v22 = vld [vmem:[#allocation7 + $0x168] sm:$0xff] }
  0x59   : > { %367 = vmatpush.msra.mxu0 %v293_v56  ;;  %441 = vmatpush.msra.mxu1 %v294_v57  ;;  %v3963_v20 = vld [vmem:[%s3934_s13 + $0x10] sm:$0xff]  ;;  %v691_v23 = vld [vmem:[#allocation7 + $0x150] sm:$0xff]  ;;  %v3970_v25 = vld [vmem:[%s3934_s13 + $0x18] sm:$0xff] }
  0x5a   : > { %515 = vmatpush.msra.mxu2 %v295_v58  ;;  %589 = vmatpush.msra.mxu3 %v296_v59  ;;  %v692_v24 = vld [vmem:[#allocation7 + $0x158] sm:$0xff]  ;;  %v687_v26 = vld [vmem:[#allocation7 + $0x130] sm:$0xff]  ;;  %v689_v27 = vld [vmem:[#allocation7 + $0x140] sm:$0xff] }
  0x5b   : > { %368 = vmatpush.msra.mxu0 %v289_v60  ;;  %442 = vmatpush.msra.mxu1 %v290_v61  ;;  %v690_v28 = vld [vmem:[#allocation7 + $0x148] sm:$0xff]  ;;  %v688_v29 = vld [vmem:[#allocation7 + $0x138] sm:$0xff]  ;;  %v685_v31 = vld [vmem:[#allocation7 + $0x120] sm:$0xff] }
  0x5c   : > { %516 = vmatpush.msra.mxu2 %v291_v62  ;;  %590 = vmatpush.msra.mxu3 %v292_v63  ;;  %v3977_v30 = vld [vmem:[%s3934_s13 + $0x20] sm:$0xff]  ;;  %v684_v34 = vld [vmem:[#allocation7 + $0x118] sm:$0xff]  ;;  %v681_v37 = vld [vmem:[#allocation7 + $0x100] sm:$0xff] }
  0x5d   : > { %369 = vmatmul.f32.vlgmr.msra.gmra.mxu0 %v3949_v0  ;;  %443 = vmatmul.f32.vlgmr.msra.gmra.mxu1 %v3949_v0  ;;  %v686_v32 = vld [vmem:[#allocation7 + $0x128] sm:$0xff]  ;;  %v683_v33 = vld [vmem:[#allocation7 + $0x110] sm:$0xff]  ;;  %v680_v39 = vld [vmem:[#allocation7 + $0xf8] sm:$0xff] }
  0x5e   : > { %517 = vmatmul.f32.vlgmr.msra.gmra.mxu2 %v3949_v0  ;;  %591 = vmatmul.f32.vlgmr.msra.gmra.mxu3 %v3949_v0  ;;  %v3984_v35 = vld [vmem:[%s3934_s13 + $0x28] sm:$0xff]  ;;  %v682_v38 = vld [vmem:[#allocation7 + $0x108] sm:$0xff]  ;;  %v3991_v40 = vld [vmem:[%s3934_s13 + $0x30] sm:$0xff] }
  0x5f   : > { %861 = vmatpush.msrb.mxu2 %v711_v1  ;;  %935 = vmatpush.msrb.mxu3 %v712_v2  ;;  %v679_v36 = vld [vmem:[#allocation7 + $0xf0] sm:$0xff]  ;;  %v677_v41 = vld [vmem:[#allocation7 + $0xe0] sm:$0xff]  ;;  %v678_v42 = vld [vmem:[#allocation7 + $0xe8] sm:$0xff] }
  0x60   : > { %713 = vmatpush.msrb.mxu0 %v709_v3  ;;  %787 = vmatpush.msrb.mxu1 %v710_v4  ;;  %v675_v43 = vld [vmem:[#allocation7 + $0xd0] sm:$0xff]  ;;  %v3998_v44 = vld [vmem:[%s3934_s13 + $0x38] sm:$0xff]  ;;  %v676_v45 = vld [vmem:[#allocation7 + $0xd8] sm:$0xff] }
  0x61   : > { %862 = vmatpush.msrb.mxu2 %v707_v5  ;;  %936 = vmatpush.msrb.mxu3 %v708_v6  ;;  %v671_v46 = vld [vmem:[#allocation7 + $0xb0] sm:$0xff]  ;;  %v673_v48 = vld [vmem:[#allocation7 + $0xc0] sm:$0xff]  ;;  %v674_v49 = vld [vmem:[#allocation7 + $0xc8] sm:$0xff] }
  0x62   : > { %714 = vmatpush.msrb.mxu0 %v705_v7  ;;  %788 = vmatpush.msrb.mxu1 %v706_v8  ;;  %v4005_v47 = vld [vmem:[%s3934_s13 + $0x40] sm:$0xff]  ;;  %v672_v50 = vld [vmem:[#allocation7 + $0xb8] sm:$0xff]  ;;  %v669_v52 = vld [vmem:[#allocation7 + $0xa0] sm:$0xff] }
  0x63   : > { %863 = vmatpush.msrb.mxu2 %v703_v9  ;;  %937 = vmatpush.msrb.mxu3 %v704_v10  ;;  %v4012_v51 = vld [vmem:[%s3934_s13 + $0x48] sm:$0xff]  ;;  %v670_v53 = vld [vmem:[#allocation7 + $0xa8] sm:$0xff]  ;;  %v4019_v56 = vld [vmem:[%s3934_s13 + $0x50] sm:$0xff] }
  0x64   : > { %715 = vmatpush.msrb.mxu0 %v701_v11  ;;  %789 = vmatpush.msrb.mxu1 %v702_v12  ;;  %v667_v54 = vld [vmem:[#allocation7 + $0x90] sm:$0xff]  ;;  %v668_v55 = vld [vmem:[#allocation7 + $0x98] sm:$0xff]  ;;  %v665_v58 = vld [vmem:[#allocation7 + $0x80] sm:$0xff] }
  0x65   : > { %372 = vmatmul.f32.gmra.mxu0 %v3956_v13  ;;  %446 = vmatmul.f32.gmra.mxu1 %v3956_v13  ;;  %v663_v57 = vld [vmem:[#allocation7 + $0x70] sm:$0xff]  ;;  %v666_v59 = vld [vmem:[#allocation7 + $0x88] sm:$0xff]  ;;  %v664_v60 = vld [vmem:[#allocation7 + $0x78] sm:$0xff] }
  0x66   : > { %520 = vmatmul.f32.gmra.mxu2 %v3956_v13  ;;  %594 = vmatmul.f32.gmra.mxu3 %v3956_v13  ;;  %v4026_v61 = vld [vmem:[%s3934_s13 + $0x58] sm:$0xff]  ;;  %v659_v1 = vld [vmem:[#allocation7 + $0x50] sm:$0xff]  ;;  %v660_v3 = vld [vmem:[#allocation7 + $0x58] sm:$0xff] }
  0x67   : > { %864 = vmatpush.msrb.mxu2 %v699_v14  ;;  %938 = vmatpush.msrb.mxu3 %v700_v15  ;;  %v661_v62 = vld [vmem:[#allocation7 + $0x60] sm:$0xff]  ;;  %v662_v63 = vld [vmem:[#allocation7 + $0x68] sm:$0xff]  ;;  %v4040_v4 = vld [vmem:[%s3934_s13 + $0x68] sm:$0xff] }
  0x68   : > { %716 = vmatpush.msrb.mxu0 %v697_v16  ;;  %790 = vmatpush.msrb.mxu1 %v698_v17  ;;  %v4033_v2 = vld [vmem:[%s3934_s13 + $0x60] sm:$0xff]  ;;  %v657_v6 = vld [vmem:[#allocation7 + $0x40] sm:$0xff]  ;;  %v656_v8 = vld [vmem:[#allocation7 + $0x38] sm:$0xff] }
  0x69   : > { %865 = vmatpush.msrb.mxu2 %v695_v18  ;;  %939 = vmatpush.msrb.mxu3 %v696_v19  ;;  %v655_v5 = vld [vmem:[#allocation7 + $0x30] sm:$0xff]  ;;  %v658_v7 = vld [vmem:[#allocation7 + $0x48] sm:$0xff]  ;;  %v4047_v9 = vld [vmem:[%s3934_s13 + $0x70] sm:$0xff] }
  0x6a   : > { %717 = vmatpush.msrb.mxu0 %v693_v21  ;;  %791 = vmatpush.msrb.mxu1 %v694_v22  ;;  %v653_v10 = vld [vmem:[#allocation7 + $0x20] sm:$0xff]  ;;  %v654_v11 = vld [vmem:[#allocation7 + $0x28] sm:$0xff]  ;;  %v651_v12 = vld [vmem:[#allocation7 + $0x10] sm:$0xff] }
  0x6b   : > { %866 = vmatpush.msrb.mxu2 %v691_v23  ;;  %940 = vmatpush.msrb.mxu3 %v692_v24  ;;  %v652_v14 = vld [vmem:[#allocation7 + $0x18] sm:$0xff]  ;;  %v4054_v15 = vld [vmem:[%s3934_s13 + $0x78] sm:$0xff]  ;;  %v4065_v21 = vld [vmem:[%s3934_s13 + $0x80] sm:$0xff] }
  0x6c   : > { %718 = vmatpush.msrb.mxu0 %v689_v27  ;;  %792 = vmatpush.msrb.mxu1 %v690_v28  ;;  %v649_v16 = vld [vmem:[#allocation7] sm:$0xff]  ;;  %v650_v17 = vld [vmem:[#allocation7 + $0x8] sm:$0xff]  ;;  %v2652_v24 = vld [vmem:[#allocation8 + $0x178] sm:$0xff] }
  0x6d   : > { %375 = vmatmul.f32.gmra.mxu0 %v3963_v20  ;;  %449 = vmatmul.f32.gmra.mxu1 %v3963_v20  ;;  %v4080_v28 = vld [vmem:[%s3934_s13 + $0x88] sm:$0xff] }
  0x6e   : > { %523 = vmatmul.f32.gmra.mxu2 %v3963_v20  ;;  %597 = vmatmul.f32.gmra.mxu3 %v3963_v20 }
  0x6f   : > { %867 = vmatpush.msrb.mxu2 %v687_v26  ;;  %941 = vmatpush.msrb.mxu3 %v688_v29  ;;  %v2668_v29 = vld [vmem:[#allocation8 + $0x1f8] sm:$0xff] }
  0x70   : > { %719 = vmatpush.msrb.mxu0 %v685_v31  ;;  %793 = vmatpush.msrb.mxu1 %v686_v32  ;;  %v2620_v31 = vld [vmem:[#allocation8 + $0x78] sm:$0xff] }
  0x71   : > { %868 = vmatpush.msrb.mxu2 %v683_v33  ;;  %942 = vmatpush.msrb.mxu3 %v684_v34  ;;  %v2636_v32 = vld [vmem:[#allocation8 + $0xf8] sm:$0xff] }
  0x72   : > { %720 = vmatpush.msrb.mxu0 %v681_v37  ;;  %794 = vmatpush.msrb.mxu1 %v682_v38  ;;  %v4095_v38 = vld [vmem:[%s3934_s13 + $0x90] sm:$0xff] }
  0x73   : > { %869 = vmatpush.msrb.mxu2 %v679_v36  ;;  %943 = vmatpush.msrb.mxu3 %v680_v39  ;;  %v2651_v39 = vld [vmem:[#allocation8 + $0x170] sm:$0xff] }
  0x74   : > { %721 = vmatpush.msrb.mxu0 %v677_v41  ;;  %795 = vmatpush.msrb.mxu1 %v678_v42  ;;  %v2667_v41 = vld [vmem:[#allocation8 + $0x1f0] sm:$0xff] }
  0x75   : > { %378 = vmatmul.f32.gmra.mxu0 %v3970_v25  ;;  %452 = vmatmul.f32.gmra.mxu1 %v3970_v25  ;;  %v2619_v42 = vld [vmem:[#allocation8 + $0x70] sm:$0xff] }
  0x76   : > { %526 = vmatmul.f32.gmra.mxu2 %v3970_v25  ;;  %600 = vmatmul.f32.gmra.mxu3 %v3970_v25 }
  0x77   : > { %870 = vmatpush.msrb.mxu2 %v675_v43  ;;  %944 = vmatpush.msrb.mxu3 %v676_v45  ;;  %v2635_v43 = vld [vmem:[#allocation8 + $0xf0] sm:$0xff] }
  0x78   : > { %722 = vmatpush.msrb.mxu0 %v673_v48  ;;  %796 = vmatpush.msrb.mxu1 %v674_v49 }
  0x79   : > { %871 = vmatpush.msrb.mxu2 %v671_v46  ;;  %945 = vmatpush.msrb.mxu3 %v672_v50  ;;  %v2650_v50 = vld [vmem:[#allocation8 + $0x168] sm:$0xff] }
  0x7a   : > { %723 = vmatpush.msrb.mxu0 %v669_v52  ;;  %797 = vmatpush.msrb.mxu1 %v670_v53  ;;  %v2666_v52 = vld [vmem:[#allocation8 + $0x1e8] sm:$0xff] }
  0x7b   : > { %872 = vmatpush.msrb.mxu2 %v667_v54  ;;  %946 = vmatpush.msrb.mxu3 %v668_v55  ;;  %v2618_v55 = vld [vmem:[#allocation8 + $0x68] sm:$0xff] }
  0x7c   : > { %724 = vmatpush.msrb.mxu0 %v665_v58  ;;  %798 = vmatpush.msrb.mxu1 %v666_v59 }
  0x7d   : > { %381 = vmatmul.f32.gmra.mxu0 %v3977_v30  ;;  %455 = vmatmul.f32.gmra.mxu1 %v3977_v30 }
  0x7e   : > { %529 = vmatmul.f32.gmra.mxu2 %v3977_v30  ;;  %603 = vmatmul.f32.gmra.mxu3 %v3977_v30 }
  0x7f   : > { %873 = vmatpush.msrb.mxu2 %v663_v57  ;;  %947 = vmatpush.msrb.mxu3 %v664_v60  ;;  %v2634_v57 = vld [vmem:[#allocation8 + $0xe8] sm:$0xff] }
  0x80   : > { %725 = vmatpush.msrb.mxu0 %v661_v62  ;;  %799 = vmatpush.msrb.mxu1 %v662_v63  ;;  %v2665_v63 = vld [vmem:[#allocation8 + $0x1e0] sm:$0xff] }
  0x81   : > { %874 = vmatpush.msrb.mxu2 %v659_v1  ;;  %948 = vmatpush.msrb.mxu3 %v660_v3 }
  0x82   : > { %726 = vmatpush.msrb.mxu0 %v657_v6  ;;  %800 = vmatpush.msrb.mxu1 %v658_v7  ;;  %v2633_v6 = vld [vmem:[#allocation8 + $0xe0] sm:$0xff] }
  0x83   : > { %875 = vmatpush.msrb.mxu2 %v655_v5  ;;  %949 = vmatpush.msrb.mxu3 %v656_v8  ;;  %v2617_v5 = vld [vmem:[#allocation8 + $0x60] sm:$0xff] }
  0x84   : > { %727 = vmatpush.msrb.mxu0 %v653_v10  ;;  %801 = vmatpush.msrb.mxu1 %v654_v11  ;;  %v2664_v10 = vld [vmem:[#allocation8 + $0x1d8] sm:$0xff] }
  0x85   : > { %384 = vmatmul.f32.gmra.mxu0 %v3984_v35  ;;  %458 = vmatmul.f32.gmra.mxu1 %v3984_v35 }
  0x86   : > { %532 = vmatmul.f32.gmra.mxu2 %v3984_v35  ;;  %606 = vmatmul.f32.gmra.mxu3 %v3984_v35 }
  0x87   : > { %876 = vmatpush.msrb.mxu2 %v651_v12  ;;  %950 = vmatpush.msrb.mxu3 %v652_v14  ;;  %v2616_v14 = vld [vmem:[#allocation8 + $0x58] sm:$0xff] }
  0x88   : > { %728 = vmatpush.msrb.mxu0 %v649_v16  ;;  %802 = vmatpush.msrb.mxu1 %v650_v17  ;;  %v2632_v16 = vld [vmem:[#allocation8 + $0xd8] sm:$0xff] }
  0x89   : > { %2817 = vmatpush.msra.mxu2 %v2652_v24  ;;  %2891 = vmatpush.msra.mxu3 %v2668_v29  ;;  %v2647_v24 = vld [vmem:[#allocation8 + $0x150] sm:$0xff] }
  0x8a   : > { %2669 = vmatpush.msra.mxu0 %v2620_v31  ;;  %2743 = vmatpush.msra.mxu1 %v2636_v32  ;;  %v2663_v32 = vld [vmem:[#allocation8 + $0x1d0] sm:$0xff] }
  0x8b   : > { %2818 = vmatpush.msra.mxu2 %v2651_v39  ;;  %2892 = vmatpush.msra.mxu3 %v2667_v41  ;;  %v2631_v39 = vld [vmem:[#allocation8 + $0xd0] sm:$0xff] }
  0x8c   : > { %2670 = vmatpush.msra.mxu0 %v2619_v42  ;;  %2744 = vmatpush.msra.mxu1 %v2635_v43 }
  0x8d   : > { %387 = vmatmul.f32.gmra.mxu0 %v3991_v40  ;;  %461 = vmatmul.f32.gmra.mxu1 %v3991_v40 }
  0x8e   : > { %535 = vmatmul.f32.gmra.mxu2 %v3991_v40  ;;  %609 = vmatmul.f32.gmra.mxu3 %v3991_v40 }
  0x8f   : > { %2819 = vmatpush.msra.mxu2 %v2650_v50  ;;  %2893 = vmatpush.msra.mxu3 %v2666_v52  ;;  %v2646_v52 = vld [vmem:[#allocation8 + $0x148] sm:$0xff] }
  0x90   : > { %2671 = vmatpush.msra.mxu0 %v2618_v55  ;;  %2745 = vmatpush.msra.mxu1 %v2634_v57  ;;  %v2662_v55 = vld [vmem:[#allocation8 + $0x1c8] sm:$0xff] }
  0x91   : > { %2894 = vmatpush.msra.mxu3 %v2665_v63  ;;  %v2630_v57 = vld [vmem:[#allocation8 + $0xc8] sm:$0xff] }
  0x92   : > { %2672 = vmatpush.msra.mxu0 %v2617_v5  ;;  %2746 = vmatpush.msra.mxu1 %v2633_v6 }
  0x93   : > { %2895 = vmatpush.msra.mxu3 %v2664_v10 }
  0x94   : > { %2673 = vmatpush.msra.mxu0 %v2616_v14  ;;  %2747 = vmatpush.msra.mxu1 %v2632_v16  ;;  %v2613_v16 = vld [vmem:[#allocation8 + $0x40] sm:$0xff] }
  0x95   : > { %390 = vmatmul.f32.gmra.mxu0 %v3998_v44  ;;  %464 = vmatmul.f32.gmra.mxu1 %v3998_v44 }
  0x96   : > { %538 = vmatmul.f32.gmra.mxu2 %v3998_v44  ;;  %612 = vmatmul.f32.gmra.mxu3 %v3998_v44 }
  0x97   : > { %2896 = vmatpush.msra.mxu3 %v2663_v32  ;;  %2748 = vmatpush.msra.mxu1 %v2631_v39  ;;  %v2660_v39 = vld [vmem:[#allocation8 + $0x1b8] sm:$0xff] }
  0x99   : > { %2897 = vmatpush.msra.mxu3 %v2662_v55  ;;  %2749 = vmatpush.msra.mxu1 %v2630_v57  ;;  %v2628_v57 = vld [vmem:[#allocation8 + $0xb8] sm:$0xff] }
  0x9d   : > { %393 = vmatmul.f32.gmra.mxu0 %v4005_v47  ;;  %467 = vmatmul.f32.gmra.mxu1 %v4005_v47 }
  0x9e   : > { %541 = vmatmul.f32.gmra.mxu2 %v4005_v47  ;;  %615 = vmatmul.f32.gmra.mxu3 %v4005_v47 }
  0xa5   : > { %396 = vmatmul.f32.gmra.mxu0 %v4012_v51  ;;  %470 = vmatmul.f32.gmra.mxu1 %v4012_v51 }
  0xa6   : > { %544 = vmatmul.f32.gmra.mxu2 %v4012_v51  ;;  %618 = vmatmul.f32.gmra.mxu3 %v4012_v51 }
  0xad   : > { %399 = vmatmul.f32.gmra.mxu0 %v4019_v56  ;;  %473 = vmatmul.f32.gmra.mxu1 %v4019_v56 }
  0xae   : > { %547 = vmatmul.f32.gmra.mxu2 %v4019_v56  ;;  %621 = vmatmul.f32.gmra.mxu3 %v4019_v56 }
  0xb5   : > { %402 = vmatmul.f32.gmra.mxu0 %v4026_v61  ;;  %476 = vmatmul.f32.gmra.mxu1 %v4026_v61 }
  0xb6   : > { %550 = vmatmul.f32.gmra.mxu2 %v4026_v61  ;;  %624 = vmatmul.f32.gmra.mxu3 %v4026_v61 }
  0xbd   : > { %405 = vmatmul.f32.gmra.mxu0 %v4033_v2  ;;  %479 = vmatmul.f32.gmra.mxu1 %v4033_v2 }
  0xbe   : > { %553 = vmatmul.f32.gmra.mxu2 %v4033_v2  ;;  %627 = vmatmul.f32.gmra.mxu3 %v4033_v2 }
  0xc5   : > { %408 = vmatmul.f32.gmra.mxu0 %v4040_v4  ;;  %482 = vmatmul.f32.gmra.mxu1 %v4040_v4 }
  0xc6   : > { %556 = vmatmul.f32.gmra.mxu2 %v4040_v4  ;;  %630 = vmatmul.f32.gmra.mxu3 %v4040_v4 }
  0xcd   : > { %411 = vmatmul.f32.gmra.mxu0 %v4047_v9  ;;  %485 = vmatmul.f32.gmra.mxu1 %v4047_v9 }
  0xce   : > { %559 = vmatmul.f32.gmra.mxu2 %v4047_v9  ;;  %633 = vmatmul.f32.gmra.mxu3 %v4047_v9 }
  0xd5   : > { %414 = vmatmul.f32.gmra.mxu0 %v4054_v15  ;;  %488 = vmatmul.f32.gmra.mxu1 %v4054_v15 }
  0xd6   : > { %562 = vmatmul.f32.gmra.mxu2 %v4054_v15  ;;  %636 = vmatmul.f32.gmra.mxu3 %v4054_v15 }
  0xda   : > { %v4060_v18 = vpop.f32.mrf.mxu0  ;;  %v4062_v19 = vpop.f32.mrf.mxu1 }
  0xdd   : > { %417 = vmatmul.f32.gmra.mxu0 %v4065_v21  ;;  %491 = vmatmul.f32.gmra.mxu1 %v4065_v21 }
  0xde   : > { %565 = vmatmul.f32.gmra.mxu2 %v4065_v21  ;;  %639 = vmatmul.f32.gmra.mxu3 %v4065_v21 }
  0xe1   : > { %v4071_v22 = vpop.f32.mrf.mxu2  ;;  %v4073_v23 = vpop.f32.mrf.mxu3 }
  0xe2   : > { %v4075_v26 = vpop.f32.mrf.mxu0  ;;  %v4077_v27 = vpop.f32.mrf.mxu1 }
  0xe5   : > { %420 = vmatmul.f32.gmra.mxu0 %v4080_v28  ;;  %494 = vmatmul.f32.gmra.mxu1 %v4080_v28 }
  0xe6   : > { %568 = vmatmul.f32.gmra.mxu2 %v4080_v28  ;;  %642 = vmatmul.f32.gmra.mxu3 %v4080_v28 }
  0xe9   : > { %v4086_v33 = vpop.f32.mrf.mxu2  ;;  %v4088_v34 = vpop.f32.mrf.mxu3 }
  0xea   : > { %v4090_v36 = vpop.f32.mrf.mxu0  ;;  %v4092_v37 = vpop.f32.mrf.mxu1 }
  0xed   : > { %423 = vmatmul.f32.gmra.mxu0 %v4095_v38  ;;  %497 = vmatmul.f32.gmra.mxu1 %v4095_v38 }
  0xee   : > { %571 = vmatmul.f32.gmra.mxu2 %v4095_v38  ;;  %645 = vmatmul.f32.gmra.mxu3 %v4095_v38 }
  0xf1   : > { %v4101_v45 = vpop.f32.mrf.mxu2  ;;  %v4103_v46 = vpop.f32.mrf.mxu3 }
  0xf2   : > { %v4105_v48 = vpop.f32.mrf.mxu0  ;;  %v4107_v49 = vpop.f32.mrf.mxu1 }
  0xf5   : > { %729 = vmatmul.f32.vlgmr.msrb.gmra.mxu0 %v3949_v0  ;;  %803 = vmatmul.f32.vlgmr.msrb.gmra.mxu1 %v3949_v0 }
  0xf6   : > { %877 = vmatmul.f32.vlgmr.msrb.gmra.mxu2 %v3949_v0  ;;  %951 = vmatmul.f32.vlgmr.msrb.gmra.mxu3 %v3949_v0  ;;  %v2649_v0 = vld [vmem:[#allocation8 + $0x160] sm:$0xff] }
  0xf7   : > { %2820 = vmatpush.msra.mxu2 %v2649_v0 }
  0xf9   : > { %v4113_v53 = vpop.f32.mrf.mxu2  ;;  %v4115_v54 = vpop.f32.mrf.mxu3 }
  0xfa   : > { %v4117_v58 = vpop.f32.mrf.mxu0  ;;  %v4119_v59 = vpop.f32.mrf.mxu1 }
  0xfb   : > { %6977 = vst [vmem:[#allocation15_spill] sm:$0xff] %v4119_v59 }
  0xfd   : > { %732 = vmatmul.f32.gmra.mxu0 %v3956_v13  ;;  %806 = vmatmul.f32.gmra.mxu1 %v3956_v13 }
  0xfe   : > { %880 = vmatmul.f32.gmra.mxu2 %v3956_v13  ;;  %954 = vmatmul.f32.gmra.mxu3 %v3956_v13  ;;  %v2648_v13 = vld [vmem:[#allocation8 + $0x158] sm:$0xff] }
  0xff   : > { %2821 = vmatpush.msra.mxu2 %v2648_v13  ;;  %v2645_v13 = vld [vmem:[#allocation8 + $0x140] sm:$0xff] }
 0x101   : > { %v4125_v60 = vpop.f32.mrf.mxu2  ;;  %v4127_v62 = vpop.f32.mrf.mxu3  ;;  %2822 = vmatpush.msra.mxu2 %v2647_v24  ;;  %v2629_v24 = vld [vmem:[#allocation8 + $0xc0] sm:$0xff] }
 0x102   : > { %6978 = vst [vmem:[#allocation16_spill] sm:$0xff] %v4125_v60  ;;  %v4129_v1 = vpop.f32.mrf.mxu0  ;;  %v4131_v3 = vpop.f32.mrf.mxu1  ;;  %2750 = vmatpush.msra.mxu1 %v2629_v24 }
 0x103   : > { %6979 = vst [vmem:[#allocation17_spill] sm:$0xff] %v4127_v62  ;;  %2823 = vmatpush.msra.mxu2 %v2646_v52 }
 0x104   : > { %6980 = vst [vmem:[#allocation18_spill] sm:$0xff] %v4129_v1  ;;  %2751 = vmatpush.msra.mxu1 %v2628_v57  ;;  %v2627_v57 = vld [vmem:[#allocation8 + $0xb0] sm:$0xff] }
 0x105   : > { %6981 = vst [vmem:[#allocation19_spill] sm:$0xff] %v4131_v3  ;;  %735 = vmatmul.f32.gmra.mxu0 %v3963_v20  ;;  %809 = vmatmul.f32.gmra.mxu1 %v3963_v20 }
 0x106   : > { %883 = vmatmul.f32.gmra.mxu2 %v3963_v20  ;;  %957 = vmatmul.f32.gmra.mxu3 %v3963_v20 }
 0x107   : > { %2824 = vmatpush.msra.mxu2 %v2645_v13  ;;  %2752 = vmatpush.msra.mxu1 %v2627_v57  ;;  %v2610_v57 = vld [vmem:[#allocation8 + $0x28] sm:$0xff] }
 0x109   : > { %v4137_v7 = vpop.f32.mrf.mxu2  ;;  %v4139_v8 = vpop.f32.mrf.mxu3 }
 0x10a   : > { %6982 = vst [vmem:[#allocation20_spill] sm:$0xff] %v4137_v7  ;;  %v4141_v11 = vpop.f32.mrf.mxu0  ;;  %v4143_v12 = vpop.f32.mrf.mxu1 }
 0x10b   : > { %6983 = vst [vmem:[#allocation21_spill] sm:$0xff] %v4139_v8 }
 0x10c   : > { %6984 = vst [vmem:[#allocation22_spill] sm:$0xff] %v4141_v11 }
 0x10d   : > { %6985 = vst [vmem:[#allocation23_spill] sm:$0xff] %v4143_v12  ;;  %738 = vmatmul.f32.gmra.mxu0 %v3970_v25  ;;  %812 = vmatmul.f32.gmra.mxu1 %v3970_v25 }
 0x10e   : > { %886 = vmatmul.f32.gmra.mxu2 %v3970_v25  ;;  %960 = vmatmul.f32.gmra.mxu3 %v3970_v25  ;;  %v2615_v25 = vld [vmem:[#allocation8 + $0x50] sm:$0xff] }
 0x10f   : > { %2674 = vmatpush.msra.mxu0 %v2615_v25 }
 0x111   : > { %v4149_v20 = vpop.f32.mrf.mxu2  ;;  %v4151_v17 = vpop.f32.mrf.mxu3 }
 0x112   : > { %6986 = vst [vmem:[#allocation24_spill] sm:$0xff] %v4149_v20  ;;  %v4153_v29 = vpop.f32.mrf.mxu0  ;;  %v4155_v31 = vpop.f32.mrf.mxu1 }
 0x113   : > { %6987 = vst [vmem:[#allocation25_spill] sm:$0xff] %v4151_v17 }
 0x114   : > { %6988 = vst [vmem:[#allocation26_spill] sm:$0xff] %v4153_v29 }
 0x115   : > { %6989 = vst [vmem:[#allocation27_spill] sm:$0xff] %v4155_v31  ;;  %741 = vmatmul.f32.gmra.mxu0 %v3977_v30  ;;  %815 = vmatmul.f32.gmra.mxu1 %v3977_v30 }
 0x116   : > { %889 = vmatmul.f32.gmra.mxu2 %v3977_v30  ;;  %963 = vmatmul.f32.gmra.mxu3 %v3977_v30  ;;  %v2614_v30 = vld [vmem:[#allocation8 + $0x48] sm:$0xff] }
 0x117   : > { %2675 = vmatpush.msra.mxu0 %v2614_v30  ;;  %v2612_v30 = vld [vmem:[#allocation8 + $0x38] sm:$0xff] }
 0x119   : > { %v4161_v41 = vpop.f32.mrf.mxu2  ;;  %v4163_v42 = vpop.f32.mrf.mxu3  ;;  %2676 = vmatpush.msra.mxu0 %v2613_v16 }
 0x11a   : > { %6990 = vst [vmem:[#allocation28_spill] sm:$0xff] %v4161_v41  ;;  %v4165_v43 = vpop.f32.mrf.mxu0  ;;  %v4167_v50 = vpop.f32.mrf.mxu1 }
 0x11b   : > { %6991 = vst [vmem:[#allocation29_spill] sm:$0xff] %v4163_v42  ;;  %2677 = vmatpush.msra.mxu0 %v2612_v30  ;;  %v2611_v30 = vld [vmem:[#allocation8 + $0x30] sm:$0xff] }
 0x11c   : > { %6992 = vst [vmem:[#allocation30_spill] sm:$0xff] %v4165_v43 }
 0x11d   : > { %6993 = vst [vmem:[#allocation31_spill] sm:$0xff] %v4167_v50  ;;  %744 = vmatmul.f32.gmra.mxu0 %v3984_v35  ;;  %818 = vmatmul.f32.gmra.mxu1 %v3984_v35 }
 0x11e   : > { %892 = vmatmul.f32.gmra.mxu2 %v3984_v35  ;;  %966 = vmatmul.f32.gmra.mxu3 %v3984_v35  ;;  %v2661_v35 = vld [vmem:[#allocation8 + $0x1c0] sm:$0xff] }
 0x11f   : > { %2898 = vmatpush.msra.mxu3 %v2661_v35  ;;  %2678 = vmatpush.msra.mxu0 %v2611_v30  ;;  %v2658_v30 = vld [vmem:[#allocation8 + $0x1a8] sm:$0xff] }
 0x121   : > { %v4173_v0 = vpop.f32.mrf.mxu2  ;;  %v4175_v63 = vpop.f32.mrf.mxu3  ;;  %2899 = vmatpush.msra.mxu3 %v2660_v39  ;;  %2679 = vmatpush.msra.mxu0 %v2610_v57 }
 0x122   : > { %6994 = vst [vmem:[#allocation32_spill] sm:$0xff] %v4173_v0  ;;  %v4177_v5 = vpop.f32.mrf.mxu0  ;;  %v4179_v6 = vpop.f32.mrf.mxu1  ;;  %v2654_v0 = vld [vmem:[#allocation8 + $0x188] sm:$0xff] }
 0x123   : > { %6995 = vst [vmem:[#allocation33_spill] sm:$0xff] %v4175_v63 }
 0x124   : > { %6996 = vst [vmem:[#allocation34_spill] sm:$0xff] %v4177_v5 }
 0x125   : > { %6997 = vst [vmem:[#allocation35_spill] sm:$0xff] %v4179_v6  ;;  %747 = vmatmul.f32.gmra.mxu0 %v3991_v40  ;;  %821 = vmatmul.f32.gmra.mxu1 %v3991_v40 }
 0x126   : > { %895 = vmatmul.f32.gmra.mxu2 %v3991_v40  ;;  %969 = vmatmul.f32.gmra.mxu3 %v3991_v40  ;;  %v2644_v40 = vld [vmem:[#allocation8 + $0x138] sm:$0xff] }
 0x127   : > { %2825 = vmatpush.msra.mxu2 %v2644_v40  ;;  %v2659_v40 = vld [vmem:[#allocation8 + $0x1b0] sm:$0xff] }
 0x128   : > { %2900 = vmatpush.msra.mxu3 %v2659_v40 }
 0x129   : > { %v4185_v10 = vpop.f32.mrf.mxu2  ;;  %v4187_v14 = vpop.f32.mrf.mxu3 }
 0x12a   : > { %6998 = vst [vmem:[#allocation36_spill] sm:$0xff] %v4185_v10  ;;  %v4189_v32 = vpop.f32.mrf.mxu0  ;;  %v4191_v25 = vpop.f32.mrf.mxu1  ;;  %2901 = vmatpush.msra.mxu3 %v2658_v30  ;;  %v2657_v30 = vld [vmem:[#allocation8 + $0x1a0] sm:$0xff]  ;;  %v2622_v10 = vld [vmem:[#allocation8 + $0x88] sm:$0xff] }
 0x12b   : > { %6999 = vst [vmem:[#allocation37_spill] sm:$0xff] %v4187_v14  ;;  %v2606_v14 = vld [vmem:[#allocation8 + $0x8] sm:$0xff] }
 0x12c   : > { %7000 = vst [vmem:[#allocation38_spill] sm:$0xff] %v4189_v32  ;;  %2902 = vmatpush.msra.mxu3 %v2657_v30 }
 0x12d   : > { %7001 = vst [vmem:[#allocation39_spill] sm:$0xff] %v4191_v25  ;;  %750 = vmatmul.f32.gmra.mxu0 %v3998_v44  ;;  %824 = vmatmul.f32.gmra.mxu1 %v3998_v44 }
 0x12e   : > { %898 = vmatmul.f32.gmra.mxu2 %v3998_v44  ;;  %972 = vmatmul.f32.gmra.mxu3 %v3998_v44  ;;  %v2643_v44 = vld [vmem:[#allocation8 + $0x130] sm:$0xff] }
 0x12f   : > { %2826 = vmatpush.msra.mxu2 %v2643_v44 }
 0x131   : > { %v4197_v52 = vpop.f32.mrf.mxu2  ;;  %v4199_v55 = vpop.f32.mrf.mxu3 }
 0x132   : > { %7002 = vst [vmem:[#allocation40_spill] sm:$0xff] %v4197_v52  ;;  %v4201_v13 = vpop.f32.mrf.mxu0  ;;  %v4203_v35 = vpop.f32.mrf.mxu1 }
 0x133   : > { %7003 = vst [vmem:[#allocation41_spill] sm:$0xff] %v4199_v55 }
 0x134   : > { %7004 = vst [vmem:[#allocation42_spill] sm:$0xff] %v4201_v13 }
 0x135   : > { %7005 = vst [vmem:[#allocation43_spill] sm:$0xff] %v4203_v35  ;;  %753 = vmatmul.f32.gmra.mxu0 %v4005_v47  ;;  %827 = vmatmul.f32.gmra.mxu1 %v4005_v47 }
 0x136   : > { %901 = vmatmul.f32.gmra.mxu2 %v4005_v47  ;;  %975 = vmatmul.f32.gmra.mxu3 %v4005_v47 }
 0x139   : > { %v4209_v16 = vpop.f32.mrf.mxu2  ;;  %v4211_v24 = vpop.f32.mrf.mxu3 }
 0x13a   : > { %7006 = vst [vmem:[#allocation44_spill] sm:$0xff] %v4209_v16  ;;  %v4213_v39 = vpop.f32.mrf.mxu0  ;;  %v4215_v35 = vpop.f32.mrf.mxu1 }
 0x13b   : > { %7007 = vst [vmem:[#allocation45_spill] sm:$0xff] %v4211_v24 }
 0x13c   : > { %7008 = vst [vmem:[#allocation46_spill] sm:$0xff] %v4213_v39  ;;  %v2642_v39 = vld [vmem:[#allocation8 + $0x128] sm:$0xff] }
 0x13d   : > { %7009 = vst [vmem:[#allocation47_spill] sm:$0xff] %v4215_v35  ;;  %756 = vmatmul.f32.gmra.mxu0 %v4012_v51  ;;  %830 = vmatmul.f32.gmra.mxu1 %v4012_v51  ;;  %v2626_v35 = vld [vmem:[#allocation8 + $0xa8] sm:$0xff] }
 0x13e   : > { %904 = vmatmul.f32.gmra.mxu2 %v4012_v51  ;;  %978 = vmatmul.f32.gmra.mxu3 %v4012_v51 }
 0x13f   : > { %2827 = vmatpush.msra.mxu2 %v2642_v39  ;;  %2753 = vmatpush.msra.mxu1 %v2626_v35  ;;  %v2625_v35 = vld [vmem:[#allocation8 + $0xa0] sm:$0xff] }
 0x141   : > { %v4221_v47 = vpop.f32.mrf.mxu2  ;;  %v4223_v44 = vpop.f32.mrf.mxu3  ;;  %2754 = vmatpush.msra.mxu1 %v2625_v35 }
 0x142   : > { %7010 = vst [vmem:[#allocation48_spill] sm:$0xff] %v4221_v47  ;;  %v4225_v24 = vpop.f32.mrf.mxu0  ;;  %v4227_v40 = vpop.f32.mrf.mxu1 }
 0x143   : > { %7011 = vst [vmem:[#allocation49_spill] sm:$0xff] %v4223_v44  ;;  %v2641_v44 = vld [vmem:[#allocation8 + $0x120] sm:$0xff] }
 0x144   : > { %7012 = vst [vmem:[#allocation50_spill] sm:$0xff] %v4225_v24  ;;  %2828 = vmatpush.msra.mxu2 %v2641_v44 }
 0x145   : > { %7013 = vst [vmem:[#allocation51_spill] sm:$0xff] %v4227_v40  ;;  %759 = vmatmul.f32.gmra.mxu0 %v4019_v56  ;;  %833 = vmatmul.f32.gmra.mxu1 %v4019_v56 }
 0x146   : > { %907 = vmatmul.f32.gmra.mxu2 %v4019_v56  ;;  %981 = vmatmul.f32.gmra.mxu3 %v4019_v56  ;;  %v2609_v56 = vld [vmem:[#allocation8 + $0x20] sm:$0xff] }
 0x147   : > { %2680 = vmatpush.msra.mxu0 %v2609_v56 }
 0x149   : > { %v4233_v51 = vpop.f32.mrf.mxu2  ;;  %v4235_v24 = vpop.f32.mrf.mxu3 }
 0x14a   : > { %7014 = vst [vmem:[#allocation52_spill] sm:$0xff] %v4233_v51  ;;  %v4237_v40 = vpop.f32.mrf.mxu0  ;;  %v4239_v39 = vpop.f32.mrf.mxu1 }
 0x14b   : > { %7015 = vst [vmem:[#allocation53_spill] sm:$0xff] %v4235_v24 }
 0x14c   : > { %7016 = vst [vmem:[#allocation54_spill] sm:$0xff] %v4237_v40 }
 0x14d   : > { %7017 = vst [vmem:[#allocation55_spill] sm:$0xff] %v4239_v39  ;;  %762 = vmatmul.f32.gmra.mxu0 %v4026_v61  ;;  %836 = vmatmul.f32.gmra.mxu1 %v4026_v61 }
 0x14e   : > { %910 = vmatmul.f32.gmra.mxu2 %v4026_v61  ;;  %984 = vmatmul.f32.gmra.mxu3 %v4026_v61 }
 0x151   : > { %v4245_v57 = vpop.f32.mrf.mxu2  ;;  %v4247_v24 = vpop.f32.mrf.mxu3 }
 0x152   : > { %7018 = vst [vmem:[#allocation56_spill] sm:$0xff] %v4245_v57  ;;  %v4249_v51 = vpop.f32.mrf.mxu0  ;;  %v4251_v44 = vpop.f32.mrf.mxu1 }
 0x153   : > { %7019 = vst [vmem:[#allocation57_spill] sm:$0xff] %v4247_v24 }
 0x154   : > { %7020 = vst [vmem:[#allocation58_spill] sm:$0xff] %v4249_v51 }
 0x155   : > { %7021 = vst [vmem:[#allocation59_spill] sm:$0xff] %v4251_v44  ;;  %765 = vmatmul.f32.gmra.mxu0 %v4033_v2  ;;  %839 = vmatmul.f32.gmra.mxu1 %v4033_v2 }
 0x156   : > { %913 = vmatmul.f32.gmra.mxu2 %v4033_v2  ;;  %987 = vmatmul.f32.gmra.mxu3 %v4033_v2 }
 0x159   : > { %v4257_v61 = vpop.f32.mrf.mxu2  ;;  %v4259_v30 = vpop.f32.mrf.mxu3 }
 0x15a   : > { %7022 = vst [vmem:[#allocation60_spill] sm:$0xff] %v4257_v61  ;;  %v4261_v56 = vpop.f32.mrf.mxu0  ;;  %v4263_v35 = vpop.f32.mrf.mxu1 }
 0x15b   : > { %7023 = vst [vmem:[#allocation61_spill] sm:$0xff] %v4259_v30 }
 0x15c   : > { %7024 = vst [vmem:[#allocation62_spill] sm:$0xff] %v4261_v56 }
 0x15d   : > { %7025 = vst [vmem:[#allocation63_spill] sm:$0xff] %v4263_v35  ;;  %768 = vmatmul.f32.gmra.mxu0 %v4040_v4  ;;  %842 = vmatmul.f32.gmra.mxu1 %v4040_v4 }
 0x15e   : > { %916 = vmatmul.f32.gmra.mxu2 %v4040_v4  ;;  %990 = vmatmul.f32.gmra.mxu3 %v4040_v4 }
 0x161   : > { %v4269_v44 = vpop.f32.mrf.mxu2  ;;  %v4271_v47 = vpop.f32.mrf.mxu3 }
 0x162   : > { %7026 = vst [vmem:[#allocation64_spill] sm:$0xff] %v4269_v44  ;;  %v4273_v2 = vpop.f32.mrf.mxu0  ;;  %v4275_v61 = vpop.f32.mrf.mxu1 }
 0x163   : > { %7027 = vst [vmem:[#allocation65_spill] sm:$0xff] %v4271_v47  ;;  %v2608_v47 = vld [vmem:[#allocation8 + $0x18] sm:$0xff] }
 0x164   : > { %7028 = vst [vmem:[#allocation66_spill] sm:$0xff] %v4273_v2  ;;  %v2624_v2 = vld [vmem:[#allocation8 + $0x98] sm:$0xff]  ;;  %2681 = vmatpush.msra.mxu0 %v2608_v47  ;;  %v2623_v47 = vld [vmem:[#allocation8 + $0x90] sm:$0xff] }
 0x165   : > { %7029 = vst [vmem:[#allocation67_spill] sm:$0xff] %v4275_v61  ;;  %771 = vmatmul.f32.gmra.mxu0 %v4047_v9  ;;  %845 = vmatmul.f32.gmra.mxu1 %v4047_v9  ;;  %v2656_v61 = vld [vmem:[#allocation8 + $0x198] sm:$0xff] }
 0x166   : > { %919 = vmatmul.f32.gmra.mxu2 %v4047_v9  ;;  %993 = vmatmul.f32.gmra.mxu3 %v4047_v9 }
 0x167   : > { %2755 = vmatpush.msra.mxu1 %v2624_v2  ;;  %2903 = vmatpush.msra.mxu3 %v2656_v61 }
 0x169   : > { %v4281_v35 = vpop.f32.mrf.mxu2  ;;  %v4283_v56 = vpop.f32.mrf.mxu3  ;;  %2756 = vmatpush.msra.mxu1 %v2623_v47 }
 0x16a   : > { %7030 = vst [vmem:[#allocation68_spill] sm:$0xff] %v4281_v35  ;;  %v4285_v4 = vpop.f32.mrf.mxu0  ;;  %v4287_v44 = vpop.f32.mrf.mxu1 }
 0x16b   : > { %7031 = vst [vmem:[#allocation69_spill] sm:$0xff] %v4283_v56  ;;  %2757 = vmatpush.msra.mxu1 %v2622_v10 }
 0x16c   : > { %7032 = vst [vmem:[#allocation70_spill] sm:$0xff] %v4285_v4 }
 0x16d   : > { %7033 = vst [vmem:[#allocation71_spill] sm:$0xff] %v4287_v44  ;;  %774 = vmatmul.f32.gmra.mxu0 %v4054_v15  ;;  %848 = vmatmul.f32.gmra.mxu1 %v4054_v15  ;;  %v2640_v44 = vld [vmem:[#allocation8 + $0x118] sm:$0xff] }
 0x16e   : > { %922 = vmatmul.f32.gmra.mxu2 %v4054_v15  ;;  %996 = vmatmul.f32.gmra.mxu3 %v4054_v15  ;;  %v2607_v15 = vld [vmem:[#allocation8 + $0x10] sm:$0xff] }
 0x16f   : > { %2829 = vmatpush.msra.mxu2 %v2640_v44  ;;  %2682 = vmatpush.msra.mxu0 %v2607_v15 }
 0x171   : > { %v4293_v9 = vpop.f32.mrf.mxu2  ;;  %v4295_v35 = vpop.f32.mrf.mxu3  ;;  %2683 = vmatpush.msra.mxu0 %v2606_v14 }
 0x172   : > { %7034 = vst [vmem:[#allocation72_spill] sm:$0xff] %v4293_v9  ;;  %v4297_v56 = vpop.f32.mrf.mxu0  ;;  %v4299_v4 = vpop.f32.mrf.mxu1  ;;  %v2655_v9 = vld [vmem:[#allocation8 + $0x190] sm:$0xff] }
 0x173   : > { %7035 = vst [vmem:[#allocation73_spill] sm:$0xff] %v4295_v35  ;;  %v3113_v30 = vmul.f32 -1.442695, %v4297_v56  ;;  %v3114_v51 = vmul.f32 -1.442695, %v4299_v4  ;;  %2904 = vmatpush.msra.mxu3 %v2655_v9 }
 0x175   : > { %3279 = vpow2.f32 %v3113_v30  ;;  %777 = vmatmul.f32.gmra.mxu0 %v4065_v21  ;;  %851 = vmatmul.f32.gmra.mxu1 %v4065_v21  ;;  %v2639_v30 = vld [vmem:[#allocation8 + $0x110] sm:$0xff] }
 0x176   : > { %3281 = vpow2.f32 %v3114_v51  ;;  %925 = vmatmul.f32.gmra.mxu2 %v4065_v21  ;;  %999 = vmatmul.f32.gmra.mxu3 %v4065_v21 }
 0x177   : > { %2830 = vmatpush.msra.mxu2 %v2639_v30  ;;  %2905 = vmatpush.msra.mxu3 %v2654_v0 }
 0x179   : > { %v4307_v2 = vpop.f32.mrf.mxu2  ;;  %v4309_v35 = vpop.f32.mrf.mxu3 }
 0x17a   : > { %v3115_v44 = vmul.f32 -1.442695, %v4307_v2  ;;  %v3116_v61 = vmul.f32 -1.442695, %v4309_v35  ;;  %v4317_v39 = vpop.f32.mrf.mxu0 }
 0x17b   : > { %v3280_v24 = vpop.eup %3279  ;;  %v3117_v9 = vmul.f32 -1.442695, %v4317_v39 }
 0x17c   : > { %v3282_v51 = vpop.eup %3281  ;;  %v4313_v57 = vadd.f32 1.0, %v3280_v24  ;;  %3283 = vpow2.f32 %v3115_v44  ;;  %v4325_v24 = vpop.f32.mrf.mxu1 }
 0x17d   : > { %v4315_v21 = vadd.f32 1.0, %v3282_v51  ;;  %3285 = vpow2.f32 %v3116_v61  ;;  %780 = vmatmul.f32.gmra.mxu0 %v4080_v28  ;;  %854 = vmatmul.f32.gmra.mxu1 %v4080_v28  ;;  %v3118_v44 = vmul.f32 -1.442695, %v4325_v24 }
 0x17e   : > { %3287 = vrcp.f32 %v4313_v57  ;;  %928 = vmatmul.f32.gmra.mxu2 %v4080_v28  ;;  %1002 = vmatmul.f32.gmra.mxu3 %v4080_v28  ;;  %v1322_v32 = vand.u32 2147483647, %v4313_v57  ;;  %vm1318_vm0 = vweird.f32 %v4313_v57 }
 0x17f   : > { %3289 = vrcp.f32 %v4315_v21  ;;  %vm1333_vm1 = vweird.f32 %v4315_v21 }
 0x180   : > { %3291 = vpow2.f32 %v3117_v9  ;;  %vm4366_vm3 = vcmp.eq.f32.partialorder %v1322_v32, 8.507059e+37 }
 0x181   : > { %v4328_v15 = vpop.f32.mrf.mxu2  ;;  %v4343_v55 = vpop.f32.mrf.mxu3 }
 0x182   : > { %v3284_v47 = vpop.eup %3283  ;;  %v3119_v28 = vmul.f32 -1.442695, %v4328_v15  ;;  %v3120_v52 = vmul.f32 -1.442695, %v4343_v55 }
 0x183   : > { %v3286_v61 = vpop.eup %3285  ;;  %v4331_v30 = vadd.f32 1.0, %v3284_v47 }
 0x184   : > { %v4333_v51 = vpop.eup %3287  ;;  %v4335_v40 = vadd.f32 1.0, %v3286_v61  ;;  %v4427_v10 = vpop.f32.mrf.mxu1 }
 0x185   : > { %v4338_v16 = vpop.eup %3289  ;;  %v1314_v13 = vmul.f32 %v4333_v51, %v4313_v57  ;;  %3293 = vrcp.f32 %v4331_v30  ;;  %783 = vmatmul.f32.gmra.mxu0 %v4095_v38  ;;  %857 = vmatmul.f32.gmra.mxu1 %v4095_v38  ;;  %vm1319_vm2 = vweird.f32 %v4333_v51  ;;  %v1352_v32 = vand.u32 2147483647, %v4331_v30 }
 0x186   : > { %v1329_v47 = vmul.f32 %v4338_v16, %v4315_v21  ;;  %3295 = vpow2.f32 %v3118_v44  ;;  %931 = vmatmul.f32.gmra.mxu2 %v4095_v38  ;;  %1005 = vmatmul.f32.gmra.mxu3 %v4095_v38  ;;  %v3292_v6 = vpop.eup %3291  ;;  %v1324_v38 = vand.u32 2147483648, %v4313_v57  ;;  %vm1334_vm4 = vweird.f32 %v4338_v16  ;;  %vm4384_vm5 = vmor %vm1318_vm0, %vm1319_vm2 }
 0x187   : > { %v1315_v9 = vsub.f32 1.0, %v1314_v13  ;;  %3297 = vrcp.f32 %v4335_v40  ;;  %v4374_v41 = vadd.f32 1.0, %v3292_v6  ;;  %v1354_v31 = vand.u32 2147483648, %v4331_v30  ;;  %vm4399_vm8 = vmor %vm1333_vm1, %vm1334_vm4 }
 0x188   : > { %v1330_v61 = vsub.f32 1.0, %v1329_v47  ;;  %3299 = vpow2.f32 %v3119_v28  ;;  %v1337_v28 = vand.u32 2147483647, %v4315_v21  ;;  %v1339_v47 = vand.u32 2147483648, %v4315_v21 }
 0x189   : > { %v1316_v25 = vmul.f32 %v4333_v51, %v1315_v9  ;;  %3301 = vpow2.f32 %v3120_v52  ;;  %vm1348_vm9 = vweird.f32 %v4331_v30  ;;  %vm1353_vm11 = vcmp.eq.f32.partialorder %v1352_v32, 8.507059e+37 }
 0x18a   : > { %v1331_v44 = vmul.f32 %v4338_v16, %v1330_v61  ;;  %v2638_v61 = vld [vmem:[#allocation8 + $0x108] sm:$0xff]  ;;  %vm4388_vm6 = vcmp.eq.f32.partialorder %v1337_v28, 8.507059e+37  ;;  %3303 = vrcp.f32 %v4374_v41  ;;  %v1355_v21 = vor.u32 1.1754944e-38, %v1354_v31  ;;  %v4422_v31 = vpop.f32.mrf.mxu0 }
 0x18b   : > { %v3294_v5 = vpop.eup %3293  ;;  %v1317_v14 = vadd.f32 %v4333_v51, %v1316_v25  ;;  %2831 = vmatpush.msra.mxu2 %v2638_v61  ;;  %v1325_v25 = vor.u32 1.1754944e-38, %v1324_v38  ;;  %vm1363_vm13 = vweird.f32 %v4335_v40  ;;  %vm1378_vm0 = vweird.f32 %v4374_v41 }
 0x18c   : > { %v3296_v13 = vpop.eup %3295  ;;  %v1344_v9 = vmul.f32 %v3294_v5, %v4331_v30  ;;  %v1332_v43 = vadd.f32 %v4338_v16, %v1331_v44  ;;  %vm1349_vm7 = vweird.f32 %v3294_v5 }
 0x18d   : > { %v4362_v63 = vpop.eup %3297  ;;  %v4378_v29 = vadd.f32 1.0, %v3296_v13  ;;  %v1321_v13 = vsel %vm4384_vm5, %v4333_v51, %v1317_v14  ;;  %vm1350_vm10 = vmor %vm1348_vm9, %vm1349_vm7  ;;  %v1369_v14 = vand.u32 2147483648, %v4335_v40 }
 0x18e   : > { %v3300_v50 = vpop.eup %3299  ;;  %v1345_v42 = vsub.f32 1.0, %v1344_v9  ;;  %v1359_v52 = vmul.f32 %v4362_v63, %v4335_v40  ;;  %v1340_v9 = vor.u32 1.1754944e-38, %v1339_v47  ;;  %v1336_v61 = vsel %vm4399_vm8, %v4338_v16, %v1332_v43 }
 0x18f   : > { %v4404_v28 = vadd.f32 1.0, %v3300_v50  ;;  %3305 = vrcp.f32 %v4378_v29  ;;  %v1326_v50 = vsel %vm4366_vm3, %v1325_v25, %v1321_v13  ;;  %vm1364_vm12 = vweird.f32 %v4362_v63 }
 0x190   : > { %v1346_v0 = vmul.f32 %v3294_v5, %v1345_v42  ;;  %v1360_v38 = vsub.f32 1.0, %v1359_v52  ;;  %v3302_v42 = vpop.eup %3301  ;;  %v1341_v43 = vsel %vm4388_vm6, %v1340_v9, %v1336_v61  ;;  %v2453_v25 = vmul.f32 %v1326_v50, %v4297_v56  ;;  %vm4430_vm14 = vmor %vm1363_vm13, %vm1364_vm12  ;;  %v4442_v9 = vpop.f32.mrf.mxu2 }
 0x191   : > { %3307 = vrcp.f32 %v4404_v28  ;;  %v4420_v32 = vadd.f32 1.0, %v3302_v42  ;;  %v2454_v13 = vmul.f32 %v1341_v43, %v4299_v4  ;;  %v1370_v42 = vor.u32 1.1754944e-38, %v1369_v14  ;;  %v4448_v4 = vpop.f32.mrf.mxu3  ;;  %v2605_v43 = vld [vmem:[#allocation8] sm:$0xff] }
 0x192   : > { %v1347_v52 = vadd.f32 %v3294_v5, %v1346_v0  ;;  %v1361_v51 = vmul.f32 %v4362_v63, %v1360_v38  ;;  %v2637_v0 = vld [vmem:[#allocation8 + $0x100] sm:$0xff]  ;;  %v4434_v38 = vpop.eup %3303  ;;  %v3122_v61 = vmul.f32 -1.442695, %v4427_v10  ;;  %2684 = vmatpush.msra.mxu0 %v2605_v43  ;;  %vm1393_vm3 = vweird.f32 %v4378_v29 }
 0x193   : > { %2832 = vmatpush.msra.mxu2 %v2637_v0  ;;  %3309 = vrcp.f32 %v4420_v32  ;;  %v1374_v14 = vmul.f32 %v4434_v38, %v4374_v41  ;;  %vm1379_vm1 = vweird.f32 %v4434_v38  ;;  %vm1408_vm8 = vweird.f32 %v4404_v28 }
 0x194   : > { %v1351_v30 = vsel %vm1350_vm10, %v3294_v5, %v1347_v52  ;;  %v1362_v47 = vadd.f32 %v4362_v63, %v1361_v51  ;;  %v1367_v5 = vand.u32 2147483647, %v4335_v40  ;;  %v3121_v40 = vmul.f32 -1.442695, %v4422_v31  ;;  %vm4506_vm5 = vmor %vm1378_vm0, %vm1379_vm1 }
 0x195   : > { %v1356_v16 = vsel %vm1353_vm11, %v1355_v21, %v1351_v30  ;;  %v4444_v56 = vpop.eup %3305  ;;  %v3123_v51 = vmul.f32 -1.442695, %v4442_v9  ;;  %v2530_v21 = vmul.f32 %v2454_v13, %v4062_v19  ;;  %v3124_v30 = vmul.f32 -1.442695, %v4448_v4 }
 0x196   : > { %v2455_v44 = vmul.f32 %v1356_v16, %v4307_v2  ;;  %v1366_v2 = vsel %vm4430_vm14, %v4362_v63, %v1362_v47  ;;  %vm1368_vm15 = vcmp.eq.f32.partialorder %v1367_v5, 8.507059e+37  ;;  %v2529_v63 = vmul.f32 %v2453_v25, %v4060_v18  ;;  %v2621_v16 = vld [vmem:[#allocation8 + $0x80] sm:$0xff]  ;;  %v4465_v25 = vpop.f32.mrf.mxu0 }
 0x197   : > { %v1371_v52 = vsel %vm1368_vm15, %v1370_v42, %v1366_v2  ;;  %v1389_v50 = vmul.f32 %v4444_v56, %v4378_v29  ;;  %3311 = vpow2.f32 %v3121_v40  ;;  %2758 = vmatpush.msra.mxu1 %v2621_v16  ;;  %v1375_v19 = vsub.f32 1.0, %v1374_v14 }
 0x198   : > { %v2531_v57 = vmul.f32 %v2455_v44, %v4071_v22  ;;  %v4450_v22 = vpop.eup %3307  ;;  %3313 = vpow2.f32 %v3122_v61  ;;  %v2456_v47 = vmul.f32 %v1371_v52, %v4309_v35  ;;  %2685 = vmatmul.f32.vlgmr.msra.gmra.mxu0 %v2529_v63  ;;  %2759 = vmatmul.f32.vlgmr.msra.gmra.mxu1 %v2530_v21  ;;  %v1382_v2 = vand.u32 2147483647, %v4374_v41  ;;  %v4474_v61 = vpop.f32.mrf.mxu1  ;;  %v2653_v21 = vld [vmem:[#allocation8 + $0x180] sm:$0xff] }
 0x199   : > { %v1404_v18 = vmul.f32 %v4450_v22, %v4404_v28  ;;  %v4463_v44 = vpop.eup %3309  ;;  %3315 = vpow2.f32 %v3123_v51  ;;  %v1390_v5 = vsub.f32 1.0, %v1389_v50  ;;  %v3125_v42 = vmul.f32 -1.442695, %v4465_v25  ;;  %2906 = vmatpush.msra.mxu3 %v2653_v21 }
 0x19a   : > { %2833 = vmatmul.f32.vlgmr.msra.gmra.mxu2 %v2531_v57  ;;  %3317 = vpow2.f32 %v3124_v30  ;;  %v2532_v35 = vmul.f32 %v2456_v47, %v4073_v23  ;;  %v1419_v13 = vmul.f32 %v4463_v44, %v4420_v32  ;;  %v1376_v52 = vmul.f32 %v4434_v38, %v1375_v19  ;;  %v4480_v23 = vpop.f32.mrf.mxu2 }
 0x19b   : > { %v1405_v0 = vsub.f32 1.0, %v1404_v18  ;;  %v1391_v63 = vmul.f32 %v4444_v56, %v1390_v5  ;;  %v1384_v50 = vand.u32 2147483648, %v4374_v41  ;;  %v1399_v30 = vand.u32 2147483648, %v4378_v29 }
 0x19c   : > { %v1420_v43 = vsub.f32 1.0, %v1419_v13  ;;  %v3126_v16 = vmul.f32 -1.442695, %v4474_v61  ;;  %2907 = vmatmul.f32.vlgmr.msra.gmra.mxu3 %v2532_v35  ;;  %vm4490_vm2 = vcmp.eq.f32.partialorder %v1382_v2, 8.507059e+37  ;;  %v3127_v5 = vmul.f32 -1.442695, %v4480_v23 }
 0x19d   : > { %v3312_v6 = vpop.eup %3311  ;;  %v1406_v18 = vmul.f32 %v4450_v22, %v1405_v0  ;;  %v1392_v0 = vadd.f32 %v4444_v56, %v1391_v63  ;;  %vm1394_vm4 = vweird.f32 %v4444_v56  ;;  %v1385_v35 = vor.u32 1.1754944e-38, %v1384_v50 }
 0x19e   : > { %v3314_v57 = vpop.eup %3313  ;;  %v4471_v40 = vadd.f32 1.0, %v3312_v6  ;;  %v1377_v6 = vadd.f32 %v4434_v38, %v1376_v52  ;;  %v1400_v2 = vor.u32 1.1754944e-38, %v1399_v30  ;;  %vm1409_vm6 = vweird.f32 %v4450_v22  ;;  %vm4519_vm7 = vmor %vm1393_vm3, %vm1394_vm4 }
 0x19f   : > { %v4478_v51 = vadd.f32 1.0, %v3314_v57  ;;  %v3316_v14 = vpop.eup %3315  ;;  %v1397_v57 = vand.u32 2147483647, %v4378_v29  ;;  %v1407_v52 = vadd.f32 %v4450_v22, %v1406_v18  ;;  %v1421_v63 = vmul.f32 %v4463_v44, %v1420_v43  ;;  %v4526_v18 = vpop.f32.mrf.mxu0  ;;  %vm4540_vm9 = vmor %vm1408_vm8, %vm1409_vm6 }
 0x1a0   : > { %3319 = vrcp.f32 %v4471_v40  ;;  %v3318_v47 = vpop.eup %3317  ;;  %v4499_v13 = vadd.f32 1.0, %v3316_v14  ;;  %v4513_v14 = vpop.f32.mrf.mxu3  ;;  %v1412_v41 = vand.u32 2147483647, %v4404_v28  ;;  %v1396_v29 = vsel %vm4519_vm7, %v4444_v56, %v1392_v0 }
 0x1a1   : > { %3321 = vrcp.f32 %v4478_v51  ;;  %v4502_v21 = vadd.f32 1.0, %v3318_v47  ;;  %v1414_v47 = vand.u32 2147483648, %v4404_v28  ;;  %v1427_v17 = vand.u32 2147483647, %v4420_v32 }
 0x1a2   : > { %3323 = vpow2.f32 %v3125_v42  ;;  %vm1424_vm10 = vweird.f32 %v4463_v44  ;;  %v3128_v56 = vmul.f32 -1.442695, %v4513_v14  ;;  %v3129_v42 = vmul.f32 -1.442695, %v4526_v18 }
 0x1a3   : > { %3325 = vpow2.f32 %v3126_v16  ;;  %v1381_v16 = vsel %vm4506_vm5, %v4434_v38, %v1377_v6  ;;  %v1422_v6 = vadd.f32 %v4463_v44, %v1421_v63  ;;  %vm1398_vm11 = vcmp.eq.f32.partialorder %v1397_v57, 8.507059e+37 }
 0x1a4   : > { %3327 = vpow2.f32 %v3127_v5  ;;  %v1411_v5 = vsel %vm4540_vm9, %v4450_v22, %v1407_v52  ;;  %vm1413_vm12 = vcmp.eq.f32.partialorder %v1412_v41, 8.507059e+37  ;;  %v1415_v30 = vor.u32 1.1754944e-38, %v1414_v47  ;;  %v4568_v41 = vpop.f32.mrf.mxu1 }
 0x1a5   : > { %3329 = vrcp.f32 %v4499_v13  ;;  %v1429_v12 = vand.u32 2147483648, %v4420_v32  ;;  %v1386_v8 = vsel %vm4490_vm2, %v1385_v35, %v1381_v16  ;;  %v1401_v7 = vsel %vm1398_vm11, %v1400_v2, %v1396_v29 }
 0x1a6   : > { %v4515_v50 = vpop.eup %3319  ;;  %3331 = vrcp.f32 %v4502_v21  ;;  %vm1423_vm13 = vweird.f32 %v4420_v32  ;;  %v1416_v63 = vsel %vm1413_vm12, %v1415_v30, %v1411_v5  ;;  %vm1428_vm15 = vcmp.eq.f32.partialorder %v1427_v17, 8.507059e+37 }
 0x1a7   : > { %v4528_v43 = vpop.eup %3321  ;;  %v1434_v38 = vmul.f32 %v4515_v50, %v4471_v40  ;;  %vm4564_vm14 = vmor %vm1423_vm13, %vm1424_vm10  ;;  %3333 = vpow2.f32 %v3128_v56  ;;  %v4578_v35 = vmul.f32 %v1386_v8, %v4317_v39  ;;  %v4581_v2 = vmul.f32 %v1401_v7, %v4325_v24 }
 0x1a8   : > { %v3324_v20 = vpop.eup %3323  ;;  %v1449_v0 = vmul.f32 %v4528_v43, %v4478_v51  ;;  %v1426_v32 = vsel %vm4564_vm14, %v4463_v44, %v1422_v6  ;;  %3335 = vpow2.f32 %v3129_v42  ;;  %v1430_v16 = vor.u32 1.1754944e-38, %v1429_v12  ;;  %v4660_v1 = vpop.f32.mrf.mxu3 }
 0x1a9   : > { %v3326_v11 = vpop.eup %3325  ;;  %v4560_v22 = vadd.f32 1.0, %v3324_v20  ;;  %v1435_v57 = vsub.f32 1.0, %v1434_v38  ;;  %v1442_v29 = vand.u32 2147483647, %v4471_v40  ;;  %v4585_v38 = vmul.f32 %v1416_v63, %v4328_v15  ;;  %7064 = vst [vmem:[#allocation74_spill] sm:$0xff] %v4660_v1 }
 0x1aa   : > { %v3328_v52 = vpop.eup %3327  ;;  %v1450_v20 = vsub.f32 1.0, %v1449_v0  ;;  %v1444_v56 = vand.u32 2147483648, %v4471_v40  ;;  %v4590_v17 = vmul.f32 -1.442695, %v4568_v41  ;;  %v1431_v44 = vsel %vm1428_vm15, %v1430_v16, %v1426_v32 }
 0x1ab   : > { %v4570_v47 = vpop.eup %3329  ;;  %3337 = vrcp.f32 %v4560_v22  ;;  %v1436_v8 = vmul.f32 %v4515_v50, %v1435_v57  ;;  %v4595_v39 = vadd.f32 1.0, %v3326_v11  ;;  %vm1438_vm0 = vweird.f32 %v4471_v40 }
 0x1ac   : > { %v4575_v19 = vpop.eup %3331  ;;  %v1464_v7 = vmul.f32 %v4570_v47, %v4499_v13  ;;  %v1451_v12 = vmul.f32 %v4528_v43, %v1450_v20  ;;  %v4601_v15 = vadd.f32 1.0, %v3328_v52  ;;  %vm4603_vm1 = vcmp.eq.f32.partialorder %v1442_v29, 8.507059e+37 }
 0x1ad   : > { %v1479_v24 = vmul.f32 %v4575_v19, %v4502_v21  ;;  %v3334_v5 = vpop.eup %3333  ;;  %vm1453_vm2 = vweird.f32 %v4478_v51  ;;  %v1457_v0 = vand.u32 2147483647, %v4478_v51  ;;  %v1459_v11 = vand.u32 2147483648, %v4478_v51 }
 0x1ae   : > { %v3336_v42 = vpop.eup %3335  ;;  %v4611_v30 = vmul.f32 %v1431_v44, %v4343_v55  ;;  %vm1439_vm3 = vweird.f32 %v4515_v50  ;;  %v1445_v63 = vor.u32 1.1754944e-38, %v1444_v56  ;;  %v1474_v52 = vand.u32 2147483648, %v4499_v13 }
 0x1af   : > { %v1437_v28 = vadd.f32 %v4515_v50, %v1436_v8  ;;  %vm1454_vm4 = vweird.f32 %v4528_v43  ;;  %v1465_v57 = vsub.f32 1.0, %v1464_v7  ;;  %3339 = vrcp.f32 %v4595_v39  ;;  %vm4635_vm6 = vmor %vm1438_vm0, %vm1439_vm3 }
 0x1b0   : > { %v1452_v20 = vadd.f32 %v4528_v43, %v1451_v12  ;;  %v1480_v16 = vsub.f32 1.0, %v1479_v24  ;;  %3341 = vrcp.f32 %v4601_v15  ;;  %v4622_v55 = vadd.f32 1.0, %v3334_v5  ;;  %vm4652_vm8 = vmor %vm1453_vm2, %vm1454_vm4 }
 0x1b1   : > { %v4618_v32 = vpop.eup %3337  ;;  %vm4624_vm5 = vcmp.eq.f32.partialorder %v1457_v0, 8.507059e+37  ;;  %v1460_v56 = vor.u32 1.1754944e-38, %v1459_v11  ;;  %v1489_v44 = vand.u32 2147483648, %v4502_v21  ;;  %v4629_v8 = vadd.f32 1.0, %v3336_v42  ;;  %v4643_v0 = vpop.f32.mrf.mxu2 }
 0x1b2   : > { %vm1468_vm7 = vweird.f32 %v4499_v13  ;;  %v1472_v12 = vand.u32 2147483647, %v4499_v13  ;;  %v1487_v24 = vand.u32 2147483647, %v4502_v21  ;;  %v1504_v5 = vand.u32 2147483648, %v4560_v22 }
 0x1b3   : > { %v1441_v11 = vsel %vm4635_vm6, %v4515_v50, %v1437_v28  ;;  %v1466_v42 = vmul.f32 %v4570_v47, %v1465_v57  ;;  %vm1483_vm9 = vweird.f32 %v4502_v21  ;;  %v1494_v3 = vmul.f32 %v4618_v32, %v4560_v22 }
 0x1b4   : > { %v1456_v50 = vsel %vm4652_vm8, %v4528_v43, %v1452_v20  ;;  %v4665_v28 = vor.u32 1.1754944e-38, %v1474_v52  ;;  %v1481_v51 = vmul.f32 %v4575_v19, %v1480_v16  ;;  %3343 = vrcp.f32 %v4622_v55 }
 0x1b5   : > { %v4669_v7 = vpop.eup %3339  ;;  %v1490_v57 = vor.u32 1.1754944e-38, %v1489_v44  ;;  %v1502_v62 = vand.u32 2147483647, %v4560_v22  ;;  %v1519_v60 = vand.u32 2147483648, %v4595_v39  ;;  %3345 = vrcp.f32 %v4629_v8 }
 0x1b6   : > { %v4674_v59 = vpop.eup %3341  ;;  %v1446_v43 = vsel %vm4603_vm1, %v1445_v63, %v1441_v11  ;;  %vm1469_vm10 = vweird.f32 %v4570_v47  ;;  %vm4679_vm11 = vcmp.eq.f32.partialorder %v1472_v12, 8.507059e+37  ;;  %vm4683_vm12 = vcmp.eq.f32.partialorder %v1487_v24, 8.507059e+37  ;;  %v4694_v12 = vpop.f32.mrf.mxu0 }
 0x1b7   : > { %v4687_v16 = vor.u32 1.1754944e-38, %v1504_v5  ;;  %v1461_v40 = vsel %vm4624_vm5, %v1460_v56, %v1456_v50  ;;  %v1467_v6 = vadd.f32 %v4570_v47, %v1466_v42  ;;  %vm1484_vm13 = vweird.f32 %v4575_v19  ;;  %v4708_v50 = vpop.f32.mrf.mxu1  ;;  %vm4716_vm15 = vmor %vm1468_vm7, %vm1469_vm10 }
 0x1b8   : > { %v1495_v63 = vsub.f32 1.0, %v1494_v3  ;;  %v1482_v11 = vadd.f32 %v4575_v19, %v1481_v51  ;;  %vm1498_vm14 = vweird.f32 %v4560_v22  ;;  %3347 = vpow2.f32 %v4590_v17  ;;  %vm4735_vm0 = vmor %vm1483_vm9, %vm1484_vm13 }
 0x1b9   : > { %v3131_v24 = vmul.f32 -1.442695, %v4643_v0  ;;  %v3132_v5 = vmul.f32 -1.442695, %v4660_v1  ;;  %v2461_v29 = vmul.f32 %v1446_v43, %v4422_v31  ;;  %v1509_v56 = vmul.f32 %v4669_v7, %v4595_v39 }
 0x1ba   : > { %v4704_v42 = vor.u32 1.1754944e-38, %v1519_v60  ;;  %v1524_v3 = vmul.f32 %v4674_v59, %v4601_v15  ;;  %v4710_v51 = vpop.eup %3343  ;;  %v3133_v31 = vmul.f32 -1.442695, %v4694_v12  ;;  %v2533_v60 = vmul.f32 %v4578_v35, %v4075_v26 }
 0x1bb   : > { %3349 = vpow2.f32 %v3131_v24  ;;  %v2534_v43 = vmul.f32 %v4581_v2, %v4077_v27  ;;  %v4725_v44 = vpop.eup %3345  ;;  %v2462_v1 = vmul.f32 %v1461_v40, %v4427_v10  ;;  %v1471_v13 = vsel %vm4716_vm15, %v4570_v47, %v1467_v6  ;;  %v4745_v47 = vpop.f32.mrf.mxu2 }
 0x1bc   : > { %v1496_v26 = vmul.f32 %v4618_v32, %v1495_v63  ;;  %vm1499_vm1 = vweird.f32 %v4618_v32  ;;  %v1486_v27 = vsel %vm4735_vm0, %v4575_v19, %v1482_v11  ;;  %3351 = vpow2.f32 %v3132_v5  ;;  %2688 = vmatmul.f32.gmra.mxu0 %v2533_v60  ;;  %v4754_v40 = vpop.f32.mrf.mxu3 }
 0x1bd   : > { %v3134_v10 = vmul.f32 -1.442695, %v4708_v50  ;;  %2762 = vmatmul.f32.gmra.mxu1 %v2534_v43  ;;  %v2535_v21 = vmul.f32 %v4585_v38, %v4086_v33  ;;  %v1510_v35 = vsub.f32 1.0, %v1509_v56  ;;  %vm1513_vm2 = vweird.f32 %v4595_v39  ;;  %vm4792_vm6 = vmor %vm1498_vm14, %vm1499_vm1 }
 0x1be   : > { %vm1514_vm3 = vweird.f32 %v4669_v7  ;;  %v1532_v2 = vand.u32 2147483647, %v4601_v15  ;;  %v1539_v19 = vmul.f32 %v4710_v51, %v4622_v55  ;;  %v3348_v6 = vpop.eup %3347  ;;  %vm4756_vm4 = vcmp.eq.f32.partialorder %v1502_v62, 8.507059e+37  ;;  %v4841_v63 = vpop.f32.mrf.mxu0 }
 0x1bf   : > { %v1525_v11 = vsub.f32 1.0, %v1524_v3  ;;  %v1554_v33 = vmul.f32 %v4725_v44, %v4629_v8  ;;  %3353 = vpow2.f32 %v3133_v31  ;;  %2836 = vmatmul.f32.gmra.mxu2 %v2535_v21  ;;  %v2536_v38 = vmul.f32 %v4611_v30, %v4088_v34 }
 0x1c0   : > { %v1476_v5 = vsel %vm4679_vm11, %v4665_v28, %v1471_v13  ;;  %v1491_v56 = vsel %vm4683_vm12, %v1490_v57, %v1486_v27  ;;  %v4769_v62 = vadd.f32 1.0, %v3348_v6  ;;  %v3135_v17 = vmul.f32 -1.442695, %v4745_v47  ;;  %vm4832_vm11 = vmor %vm1513_vm2, %vm1514_vm3 }
 0x1c1   : > { %v3350_v3 = vpop.eup %3349  ;;  %v1497_v60 = vadd.f32 %v4618_v32, %v1496_v26  ;;  %3355 = vpow2.f32 %v3134_v10  ;;  %v3136_v31 = vmul.f32 -1.442695, %v4754_v40  ;;  %2910 = vmatmul.f32.gmra.mxu3 %v2536_v38  ;;  %v2537_v34 = vmul.f32 %v2461_v29, %v4090_v36 }
 0x1c2   : > { %v1511_v30 = vmul.f32 %v4669_v7, %v1510_v35  ;;  %v1534_v28 = vand.u32 2147483648, %v4601_v15  ;;  %v1540_v52 = vsub.f32 1.0, %v1539_v19  ;;  %3357 = vrcp.f32 %v4769_v62  ;;  %v3352_v57 = vpop.eup %3351 }
 0x1c3   : > { %v1526_v20 = vmul.f32 %v4674_v59, %v1525_v11  ;;  %vm1528_vm5 = vweird.f32 %v4601_v15  ;;  %v1555_v43 = vsub.f32 1.0, %v1554_v33  ;;  %v4780_v13 = vadd.f32 1.0, %v3350_v3 }
 0x1c4   : > { %v4783_v24 = vmul.f32 %v1476_v5, %v4442_v9  ;;  %v4786_v36 = vmul.f32 %v1491_v56, %v4448_v4  ;;  %v7077_v26 = vand.u32 2147483647, %v4595_v39  ;;  %3359 = vpow2.f32 %v3135_v17  ;;  %2691 = vmatmul.f32.gmra.mxu0 %v2537_v34 }
 0x1c5   : > { %v2538_v9 = vmul.f32 %v2462_v1, %v4092_v37  ;;  %v3354_v10 = vpop.eup %3353  ;;  %v1501_v4 = vsel %vm4792_vm6, %v4618_v32, %v1497_v60  ;;  %vm4806_vm8 = vcmp.eq.f32.partialorder %v1532_v2, 8.507059e+37  ;;  %v4810_v21 = vadd.f32 1.0, %v3352_v57 }
 0x1c6   : > { %vm4798_vm7 = vcmp.eq.f32.partialorder %v7077_v26, 8.507059e+37  ;;  %3361 = vpow2.f32 %v3136_v31  ;;  %v1512_v35 = vadd.f32 %v4669_v7, %v1511_v30  ;;  %v1535_v19 = vor.u32 1.1754944e-38, %v1534_v28 }
 0x1c7   : > { %v1541_v6 = vmul.f32 %v4710_v51, %v1540_v52  ;;  %3363 = vrcp.f32 %v4780_v13  ;;  %2765 = vmatmul.f32.gmra.mxu1 %v2538_v9  ;;  %v3356_v37 = vpop.eup %3355  ;;  %v1527_v1 = vadd.f32 %v4674_v59, %v1526_v20  ;;  %vm1529_vm9 = vweird.f32 %v4674_v59 }
 0x1c8   : > { %vm1543_vm10 = vweird.f32 %v4622_v55  ;;  %v1556_v32 = vmul.f32 %v4725_v44, %v1555_v43  ;;  %v4819_v2 = vpop.eup %3357  ;;  %v1506_v11 = vsel %vm4756_vm4, %v4687_v16, %v1501_v4  ;;  %v1547_v33 = vand.u32 2147483647, %v4622_v55  ;;  %vm4850_vm13 = vmor %vm1528_vm5, %vm1529_vm9 }
 0x1c9   : > { %v1549_v38 = vand.u32 2147483648, %v4622_v55  ;;  %v4826_v5 = vadd.f32 1.0, %v3354_v10  ;;  %vm1558_vm12 = vweird.f32 %v4629_v8  ;;  %v1562_v17 = vand.u32 2147483647, %v4629_v8 }
 0x1ca   : > { %v1569_v16 = vmul.f32 %v4819_v2, %v4769_v62  ;;  %3365 = vrcp.f32 %v4810_v21  ;;  %v3360_v3 = vpop.eup %3359  ;;  %v1516_v39 = vsel %vm4832_vm11, %v4669_v7, %v1512_v35  ;;  %v1542_v31 = vadd.f32 %v4710_v51, %v1541_v6 }
 0x1cb   : > { %vm1544_vm14 = vweird.f32 %v4710_v51  ;;  %vm1559_vm15 = vweird.f32 %v4725_v44  ;;  %v1531_v30 = vsel %vm4850_vm13, %v4674_v59, %v1527_v1  ;;  %v1557_v7 = vadd.f32 %v4725_v44, %v1556_v32 }
 0x1cc   : > { %v3362_v34 = vpop.eup %3361  ;;  %v1570_v28 = vsub.f32 1.0, %v1569_v16  ;;  %v4861_v52 = vadd.f32 1.0, %v3356_v37  ;;  %v4866_v57 = vmul.f32 %v1506_v11, %v4465_v25  ;;  %v1564_v20 = vand.u32 2147483648, %v4629_v8  ;;  %vm4876_vm0 = vmor %vm1543_vm10, %vm1544_vm14  ;;  %v4925_v11 = vpop.f32.mrf.mxu1 }
 0x1cd   : > { %v4863_v15 = vpop.eup %3363  ;;  %3367 = vrcp.f32 %v4826_v5  ;;  %v3137_v43 = vmul.f32 -1.442695, %v4841_v63  ;;  %v1521_v59 = vsel %vm4798_vm7, %v4704_v42, %v1516_v39  ;;  %vm4880_vm1 = vcmp.eq.f32.partialorder %v1547_v33, 8.507059e+37  ;;  %vm4895_vm2 = vmor %vm1558_vm12, %vm1559_vm15 }
 0x1ce   : > { %v1550_v25 = vor.u32 1.1754944e-38, %v1549_v38  ;;  %v4884_v9 = vadd.f32 1.0, %v3360_v3  ;;  %v1536_v10 = vsel %vm4806_vm8, %v1535_v19, %v1531_v30  ;;  %v1546_v42 = vsel %vm4876_vm0, %v4710_v51, %v1542_v31 }
 0x1cf   : > { %vm4899_vm3 = vcmp.eq.f32.partialorder %v1562_v17, 8.507059e+37  ;;  %v4903_v4 = vadd.f32 1.0, %v3362_v34  ;;  %v1561_v51 = vsel %vm4895_vm2, %v4725_v44, %v1557_v7  ;;  %v1571_v35 = vmul.f32 %v4819_v2, %v1570_v28 }
 0x1d0   : > { %v4905_v22 = vpop.eup %3365  ;;  %v1584_v8 = vmul.f32 %v4863_v15, %v4780_v13  ;;  %3369 = vrcp.f32 %v4861_v52  ;;  %v4915_v19 = vmul.f32 %v1521_v59, %v4474_v61  ;;  %v1565_v6 = vor.u32 1.1754944e-38, %v1564_v20 }
 0x1d1   : > { %v1577_v37 = vand.u32 2147483647, %v4769_v62  ;;  %3371 = vpow2.f32 %v3137_v43  ;;  %v4919_v1 = vmul.f32 %v1536_v10, %v4480_v23  ;;  %v1551_v44 = vsel %vm4880_vm1, %v1550_v25, %v1546_v42  ;;  %v4971_v42 = vpop.f32.mrf.mxu2 }
 0x1d2   : > { %v1579_v32 = vand.u32 2147483648, %v4769_v62  ;;  %3373 = vrcp.f32 %v4884_v9  ;;  %v1566_v61 = vsel %vm4899_vm3, %v1565_v6, %v1561_v51  ;;  %vm1573_vm4 = vweird.f32 %v4769_v62 }
 0x1d3   : > { %v4927_v33 = vpop.eup %3367  ;;  %v1599_v23 = vmul.f32 %v4905_v22, %v4810_v21  ;;  %3375 = vrcp.f32 %v4903_v4  ;;  %v1572_v38 = vadd.f32 %v4819_v2, %v1571_v35  ;;  %vm1574_vm5 = vweird.f32 %v4819_v2 }
 0x1d4   : > { %v1585_v56 = vsub.f32 1.0, %v1584_v8  ;;  %v1594_v17 = vand.u32 2147483648, %v4780_v13  ;;  %v4939_v16 = vmul.f32 %v1551_v44, %v4513_v14  ;;  %vm4941_vm6 = vcmp.eq.f32.partialorder %v1577_v37, 8.507059e+37  ;;  %vm4958_vm7 = vmor %vm1573_vm4, %vm1574_vm5 }
 0x1d5   : > { %v1609_v39 = vand.u32 2147483648, %v4810_v21  ;;  %v3138_v60 = vmul.f32 -1.442695, %v4925_v11  ;;  %v1580_v34 = vor.u32 1.1754944e-38, %v1579_v32  ;;  %v1592_v30 = vand.u32 2147483647, %v4780_v13 }
 0x1d6   : > { %v4947_v31 = vpop.eup %3369  ;;  %v1614_v7 = vmul.f32 %v4927_v33, %v4826_v5  ;;  %v1624_v28 = vand.u32 2147483648, %v4826_v5  ;;  %v4954_v20 = vmul.f32 %v1566_v61, %v4526_v18  ;;  %vm1588_vm8 = vweird.f32 %v4780_v13 }
 0x1d7   : > { %v3372_v14 = vpop.eup %3371  ;;  %v1600_v59 = vsub.f32 1.0, %v1599_v23  ;;  %v1607_v29 = vand.u32 2147483647, %v4810_v21  ;;  %v1576_v25 = vsel %vm4958_vm7, %v4819_v2, %v1572_v38  ;;  %v1586_v18 = vmul.f32 %v4863_v15, %v1585_v56 }
 0x1d8   : > { %v4964_v26 = vpop.eup %3373  ;;  %v1595_v10 = vor.u32 1.1754944e-38, %v1594_v17  ;;  %v1639_v62 = vand.u32 2147483648, %v4861_v52  ;;  %vm1603_vm9 = vweird.f32 %v4810_v21  ;;  %v4976_v27 = vor.u32 1.1754944e-38, %v1609_v39  ;;  %v5004_v39 = vpop.f32.mrf.mxu3 }
 0x1d9   : > { %v4973_v55 = vpop.eup %3375  ;;  %v1622_v51 = vand.u32 2147483647, %v4826_v5  ;;  %v1629_v35 = vmul.f32 %v4947_v31, %v4861_v52  ;;  %v1637_v2 = vand.u32 2147483647, %v4861_v52  ;;  %vm1589_vm10 = vweird.f32 %v4863_v15 }
 0x1da   : > { %vm4983_vm11 = vcmp.eq.f32.partialorder %v1592_v30, 8.507059e+37  ;;  %v1615_v6 = vsub.f32 1.0, %v1614_v7  ;;  %vm1618_vm12 = vweird.f32 %v4826_v5  ;;  %v4988_v37 = vor.u32 1.1754944e-38, %v1624_v28  ;;  %vm5023_vm1 = vmor %vm1588_vm8, %vm1589_vm10 }
 0x1db   : > { %v4990_v44 = vadd.f32 1.0, %v3372_v14  ;;  %v1581_v32 = vsel %vm4941_vm6, %v1580_v34, %v1576_v25  ;;  %v1601_v61 = vmul.f32 %v4905_v22, %v1600_v59  ;;  %vm1604_vm13 = vweird.f32 %v4905_v22 }
 0x1dc   : > { %v1644_v23 = vmul.f32 %v4964_v26, %v4884_v9  ;;  %v1587_v38 = vadd.f32 %v4863_v15, %v1586_v18  ;;  %v4999_v56 = vor.u32 1.1754944e-38, %v1639_v62  ;;  %v1659_v17 = vmul.f32 %v4973_v55, %v4903_v4  ;;  %v5031_v62 = vpop.f32.mrf.mxu0  ;;  %vm5051_vm4 = vmor %vm1603_vm9, %vm1604_vm13 }
 0x1dd   : > { %3377 = vrcp.f32 %v4990_v44  ;;  %vm5006_vm14 = vcmp.eq.f32.partialorder %v1607_v29, 8.507059e+37  ;;  %vm1619_vm15 = vweird.f32 %v4927_v33  ;;  %v1630_v34 = vsub.f32 1.0, %v1629_v35 }
 0x1de   : > { %v1652_v30 = vand.u32 2147483647, %v4884_v9  ;;  %v1654_v7 = vand.u32 2147483648, %v4884_v9  ;;  %v5014_v28 = vmul.f32 %v1581_v32, %v4568_v41  ;;  %v1616_v14 = vmul.f32 %v4927_v33, %v1615_v6  ;;  %vm5082_vm6 = vmor %vm1618_vm12, %vm1619_vm15 }
 0x1df   : > { %vm1633_vm0 = vweird.f32 %v4861_v52  ;;  %3379 = vpow2.f32 %v3138_v60  ;;  %v3139_v43 = vmul.f32 -1.442695, %v4971_v42  ;;  %v1602_v29 = vadd.f32 %v4905_v22, %v1601_v61  ;;  %v5033_v60 = vpop.f32.mrf.mxu1 }
 0x1e0   : > { %v1645_v25 = vsub.f32 1.0, %v1644_v23  ;;  %v3140_v41 = vmul.f32 -1.442695, %v5004_v39  ;;  %v2539_v18 = vmul.f32 %v4783_v24, %v4101_v45  ;;  %v1591_v13 = vsel %vm5023_vm1, %v4863_v15, %v1587_v38 }
 0x1e1   : > { %vm1634_vm2 = vweird.f32 %v4947_v31  ;;  %v1660_v35 = vsub.f32 1.0, %v1659_v17  ;;  %3381 = vpow2.f32 %v3139_v43  ;;  %v1631_v6 = vmul.f32 %v4947_v31, %v1630_v34 }
 0x1e2   : > { %vm1648_vm3 = vweird.f32 %v4884_v9  ;;  %v5041_v32 = vor.u32 1.1754944e-38, %v1654_v7  ;;  %3383 = vpow2.f32 %v3140_v41  ;;  %2839 = vmatmul.f32.gmra.mxu2 %v2539_v18  ;;  %v2540_v45 = vmul.f32 %v4786_v36, %v4103_v46  ;;  %v5060_v46 = vpop.f32.mrf.mxu2  ;;  %v5107_v41 = vpop.f32.mrf.mxu3 }
 0x1e3   : > { %v5045_v24 = vpop.eup %3377  ;;  %v1617_v61 = vadd.f32 %v4927_v33, %v1616_v14  ;;  %v3141_v23 = vmul.f32 -1.442695, %v5031_v62  ;;  %v3142_v38 = vmul.f32 -1.442695, %v5033_v60  ;;  %v2541_v17 = vmul.f32 %v4866_v57, %v4105_v48 }
 0x1e4   : > { %v1596_v36 = vsel %vm4983_vm11, %v1595_v10, %v1591_v13  ;;  %v1606_v21 = vsel %vm5051_vm4, %v4905_v22, %v1602_v29  ;;  %vm5067_vm5 = vcmp.eq.f32.partialorder %v1622_v51, 8.507059e+37  ;;  %v1646_v7 = vmul.f32 %v4964_v26, %v1645_v25  ;;  %2913 = vmatmul.f32.gmra.mxu3 %v2540_v45  ;;  %vm5125_vm11 = vmor %vm1633_vm0, %vm1634_vm2 }
 0x1e5   : > { %v2542_v14 = vmul.f32 %v4915_v19, %v4107_v49  ;;  %v3380_v48 = vpop.eup %3379  ;;  %v1661_v57 = vmul.f32 %v4973_v55, %v1660_v35  ;;  %v1667_v8 = vand.u32 2147483647, %v4903_v4  ;;  %v1674_v10 = vmul.f32 %v5045_v24, %v4990_v44  ;;  %2694 = vmatmul.f32.gmra.mxu0 %v2541_v17 }
 0x1e6   : > { %3385 = vpow2.f32 %v3141_v23  ;;  %vm5086_vm7 = vcmp.eq.f32.partialorder %v1637_v2, 8.507059e+37  ;;  %v5090_v19 = vadd.f32 1.0, %v3380_v48  ;;  %v3143_v51 = vmul.f32 -1.442695, %v5060_v46 }
 0x1e7   : > { %3387 = vpow2.f32 %v3142_v38  ;;  %2768 = vmatmul.f32.gmra.mxu1 %v2542_v14  ;;  %v2543_v43 = vmul.f32 %v4919_v1, %v4113_v53  ;;  %v3382_v59 = vpop.eup %3381  ;;  %v1611_v5 = vsel %vm5006_vm14, %v4976_v27, %v1606_v21  ;;  %v1621_v2 = vsel %vm5082_vm6, %v4927_v33, %v1617_v61 }
 0x1e8   : > { %v1632_v29 = vadd.f32 %v4947_v31, %v1631_v6  ;;  %vm1649_vm8 = vweird.f32 %v4964_v26  ;;  %vm5103_vm9 = vcmp.eq.f32.partialorder %v1652_v30, 8.507059e+37  ;;  %v3384_v53 = vpop.eup %3383  ;;  %v1647_v1 = vadd.f32 %v4964_v26, %v1646_v7  ;;  %v7116_v6 = vld [vmem:[#allocation15_spill] sm:$0xff] }
 0x1e9   : > { %vm1664_vm10 = vweird.f32 %v4973_v55  ;;  %3389 = vrcp.f32 %v5090_v19  ;;  %v2544_v33 = vmul.f32 %v4939_v16, %v4115_v54  ;;  %v1662_v27 = vadd.f32 %v4973_v55, %v1661_v57  ;;  %v5130_v16 = vpop.f32.mrf.mxu0  ;;  %vm5141_vm12 = vmor %vm1648_vm3, %vm1649_vm8 }
 0x1ea   : > { %v5115_v3 = vadd.f32 1.0, %v3382_v59  ;;  %v5117_v30 = vadd.f32 1.0, %v3384_v53  ;;  %v2545_v18 = vmul.f32 %v4954_v20, %v4117_v58  ;;  %v1675_v35 = vsub.f32 1.0, %v1674_v10  ;;  %2842 = vmatmul.f32.gmra.mxu2 %v2543_v43 }
 0x1eb   : > { %3391 = vpow2.f32 %v3143_v51  ;;  %v3144_v54 = vmul.f32 -1.442695, %v5107_v41  ;;  %v2546_v45 = vmul.f32 %v5014_v28, %v7116_v6  ;;  %v5135_v58 = vmul.f32 %v1596_v36, %v4643_v0  ;;  %v7119_v28 = vld [vmem:[#allocation74_spill] sm:$0xff] }
 0x1ec   : > { %v3386_v15 = vpop.eup %3385  ;;  %vm1663_vm13 = vweird.f32 %v4903_v4  ;;  %v1669_v20 = vand.u32 2147483648, %v4903_v4  ;;  %3393 = vrcp.f32 %v5115_v3  ;;  %v5149_v23 = vmul.f32 %v1611_v5, %v7119_v28  ;;  %2916 = vmatmul.f32.gmra.mxu3 %v2544_v33  ;;  %v5206_v5 = vpop.f32.mrf.mxu1 }
 0x1ed   : > { %v3388_v61 = vpop.eup %3387  ;;  %v1636_v0 = vsel %vm5125_vm11, %v4947_v31, %v1632_v29  ;;  %vm5156_vm14 = vmor %vm1663_vm13, %vm1664_vm10  ;;  %vm5160_vm15 = vcmp.eq.f32.partialorder %v1667_v8, 8.507059e+37  ;;  %3395 = vrcp.f32 %v5117_v30  ;;  %v1626_v4 = vsel %vm5067_vm5, %v4988_v37, %v1621_v2  ;;  %2697 = vmatmul.f32.gmra.mxu0 %v2545_v18 }
 0x1ee   : > { %v1651_v31 = vsel %vm5141_vm12, %v4964_v26, %v1647_v1  ;;  %v1666_v17 = vsel %vm5156_vm14, %v4973_v55, %v1662_v27  ;;  %v3145_v36 = vmul.f32 -1.442695, %v5130_v16  ;;  %v1676_v7 = vmul.f32 %v5045_v24, %v1675_v35 }
 0x1ef   : > { %v5175_v21 = vpop.eup %3389  ;;  %v5178_v14 = vadd.f32 1.0, %v3386_v15  ;;  %v5180_v48 = vadd.f32 1.0, %v3388_v61  ;;  %3397 = vpow2.f32 %v3144_v54  ;;  %2771 = vmatmul.f32.gmra.mxu1 %v2546_v45  ;;  %v1641_v26 = vsel %vm5086_vm7, %v4999_v56, %v1636_v0 }
 0x1f0   : > { %v1670_v37 = vor.u32 1.1754944e-38, %v1669_v20  ;;  %v1682_v55 = vand.u32 2147483647, %v4990_v44  ;;  %v1689_v34 = vmul.f32 %v5175_v21, %v5090_v19  ;;  %v1656_v8 = vsel %vm5103_vm9, %v5041_v32, %v1651_v31 }
 0x1f1   : > { %v3392_v57 = vpop.eup %3391  ;;  %vm1678_vm0 = vweird.f32 %v4990_v44  ;;  %v1684_v10 = vand.u32 2147483648, %v4990_v44  ;;  %3399 = vrcp.f32 %v5178_v14  ;;  %vm1679_vm1 = vweird.f32 %v5045_v24 }
 0x1f2   : > { %v5194_v22 = vpop.eup %3393  ;;  %v1671_v56 = vsel %vm5160_vm15, %v1670_v37, %v1666_v17  ;;  %v1699_v49 = vand.u32 2147483648, %v5090_v19  ;;  %3401 = vrcp.f32 %v5180_v48  ;;  %v1677_v32 = vadd.f32 %v5045_v24, %v1676_v7  ;;  %vm5233_vm3 = vmor %vm1678_vm0, %vm1679_vm1 }
 0x1f3   : > { %v5201_v51 = vpop.eup %3395  ;;  %v1690_v43 = vsub.f32 1.0, %v1689_v34  ;;  %v1704_v59 = vmul.f32 %v5194_v22, %v5115_v3  ;;  %3403 = vpow2.f32 %v3145_v36  ;;  %v5209_v2 = vmul.f32 %v1626_v4, %v4694_v12 }
 0x1f4   : > { %v5212_v29 = vmul.f32 %v1641_v26, %v4708_v50  ;;  %vm5214_vm2 = vcmp.eq.f32.partialorder %v1682_v55, 8.507059e+37  ;;  %v1719_v53 = vmul.f32 %v5201_v51, %v5117_v30  ;;  %v1685_v33 = vor.u32 1.1754944e-38, %v1684_v10 }
 0x1f5   : > { %v3398_v1 = vpop.eup %3397  ;;  %v1697_v27 = vand.u32 2147483647, %v5090_v19  ;;  %v1705_v18 = vsub.f32 1.0, %v1704_v59  ;;  %v5221_v13 = vadd.f32 1.0, %v3392_v57  ;;  %v5224_v12 = vmul.f32 %v1656_v8, %v4745_v47 }
 0x1f6   : > { %v5227_v50 = vmul.f32 %v1671_v56, %v4754_v40  ;;  %v1720_v54 = vsub.f32 1.0, %v1719_v53  ;;  %v3146_v6 = vmul.f32 -1.442695, %v5206_v5  ;;  %v1681_v47 = vsel %vm5233_vm3, %v5045_v24, %v1677_v32 }
 0x1f7   : > { %v5238_v45 = vpop.eup %3399  ;;  %v1691_v40 = vmul.f32 %v5175_v21, %v1690_v43  ;;  %vm1693_vm4 = vweird.f32 %v5090_v19  ;;  %v1700_v15 = vor.u32 1.1754944e-38, %v1699_v49  ;;  %v1706_v44 = vmul.f32 %v5194_v22, %v1705_v18 }
 0x1f8   : > { %v5245_v52 = vpop.eup %3401  ;;  %vm1708_vm5 = vweird.f32 %v5115_v3  ;;  %3405 = vrcp.f32 %v5221_v13  ;;  %v5250_v20 = vadd.f32 1.0, %v3398_v1  ;;  %vm5252_vm6 = vcmp.eq.f32.partialorder %v1697_v27, 8.507059e+37  ;;  %v5309_v1 = vpop.f32.mrf.mxu2 }
 0x1f9   : > { %v3404_v61 = vpop.eup %3403  ;;  %v1712_v24 = vand.u32 2147483647, %v5115_v3  ;;  %v1714_v0 = vand.u32 2147483648, %v5115_v3  ;;  %v1721_v9 = vmul.f32 %v5201_v51, %v1720_v54  ;;  %vm1723_vm7 = vweird.f32 %v5117_v30 }
 0x1fa   : > { %v1686_v38 = vsel %vm5214_vm2, %v1685_v33, %v1681_v47  ;;  %vm1694_vm8 = vweird.f32 %v5175_v21  ;;  %v1727_v4 = vand.u32 2147483647, %v5117_v30  ;;  %v1729_v31 = vand.u32 2147483648, %v5117_v30  ;;  %v5311_v33 = vpop.f32.mrf.mxu3 }
 0x1fb   : > { %v1692_v17 = vadd.f32 %v5175_v21, %v1691_v40  ;;  %v1734_v36 = vmul.f32 %v5238_v45, %v5178_v14  ;;  %v1749_v7 = vmul.f32 %v5245_v52, %v5180_v48  ;;  %3407 = vpow2.f32 %v3146_v6  ;;  %vm5290_vm12 = vmor %vm1693_vm4, %vm1694_vm8 }
 0x1fc   : > { %v1707_v26 = vadd.f32 %v5194_v22, %v1706_v44  ;;  %vm1709_vm9 = vweird.f32 %v5194_v22  ;;  %3409 = vrcp.f32 %v5250_v20  ;;  %v5273_v37 = vadd.f32 1.0, %v3404_v61 }
 0x1fd   : > { %v5276_v55 = vmul.f32 %v1686_v38, %v4841_v63  ;;  %vm5278_vm10 = vcmp.eq.f32.partialorder %v1712_v24, 8.507059e+37  ;;  %v1722_v57 = vadd.f32 %v5201_v51, %v1721_v9  ;;  %vm1724_vm11 = vweird.f32 %v5201_v51  ;;  %vm5305_vm14 = vmor %vm1708_vm5, %vm1709_vm9 }
 0x1fe   : > { %v5284_v8 = vpop.eup %3405  ;;  %v1715_v63 = vor.u32 1.1754944e-38, %v1714_v0  ;;  %vm5294_vm13 = vcmp.eq.f32.partialorder %v1727_v4, 8.507059e+37  ;;  %v1744_v49 = vand.u32 2147483648, %v5178_v14  ;;  %v1759_v32 = vand.u32 2147483648, %v5180_v48  ;;  %vm5320_vm15 = vmor %vm1723_vm7, %vm1724_vm11 }
 0x1ff   : > { %v1696_v43 = vsel %vm5290_vm12, %v5175_v21, %v1692_v17  ;;  %v1730_v59 = vor.u32 1.1754944e-38, %v1729_v31  ;;  %v1735_v25 = vsub.f32 1.0, %v1734_v36  ;;  %v1750_v53 = vsub.f32 1.0, %v1749_v7  ;;  %v7144_v36 = vld [vmem:[#allocation16_spill] sm:$0xff] }
 0x200   : > { %v1711_v27 = vsel %vm5305_vm14, %v5194_v22, %v1707_v26  ;;  %vm1738_vm0 = vweird.f32 %v5178_v14  ;;  %v1742_v21 = vand.u32 2147483647, %v5178_v14  ;;  %3411 = vrcp.f32 %v5273_v37  ;;  %v5367_v26 = vpop.f32.mrf.mxu0 }
 0x201   : > { %v3408_v18 = vpop.eup %3407  ;;  %v1726_v35 = vsel %vm5320_vm15, %v5201_v51, %v1722_v57  ;;  %vm1753_vm1 = vweird.f32 %v5180_v48  ;;  %v1757_v22 = vand.u32 2147483647, %v5180_v48  ;;  %v1764_v30 = vmul.f32 %v5284_v8, %v5221_v13 }
 0x202   : > { %v5334_v54 = vpop.eup %3409  ;;  %v1701_v6 = vsel %vm5252_vm6, %v1700_v15, %v1696_v43  ;;  %vm1739_vm2 = vweird.f32 %v5238_v45  ;;  %v5339_v47 = vor.u32 1.1754944e-38, %v1744_v49  ;;  %v5341_v40 = vor.u32 1.1754944e-38, %v1759_v32  ;;  %v5406_v3 = vpop.f32.mrf.mxu3 }
 0x203   : > { %v1716_v51 = vsel %vm5278_vm10, %v1715_v63, %v1711_v27  ;;  %v1736_v44 = vmul.f32 %v5238_v45, %v1735_v25  ;;  %v1751_v61 = vmul.f32 %v5245_v52, %v1750_v53  ;;  %v1774_v24 = vand.u32 2147483648, %v5221_v13  ;;  %vm5397_vm8 = vmor %vm1738_vm0, %vm1739_vm2  ;;  %v7147_v53 = vld [vmem:[#allocation17_spill] sm:$0xff]  ;;  %v5404_v27 = vpop.f32.mrf.mxu2 }
 0x204   : > { %v1731_v0 = vsel %vm5294_vm13, %v1730_v59, %v1726_v35  ;;  %vm1754_vm3 = vweird.f32 %v5245_v52  ;;  %v5351_v15 = vadd.f32 1.0, %v3408_v18  ;;  %v3147_v28 = vmul.f32 -1.442695, %v5309_v1 }
 0x205   : > { %vm5354_vm4 = vcmp.eq.f32.partialorder %v1742_v21, 8.507059e+37  ;;  %vm5358_vm5 = vcmp.eq.f32.partialorder %v1757_v22, 8.507059e+37  ;;  %v1765_v4 = vsub.f32 1.0, %v1764_v30  ;;  %v1779_v31 = vmul.f32 %v5334_v54, %v5250_v20  ;;  %vm5412_vm9 = vmor %vm1753_vm1, %vm1754_vm3 }
 0x206   : > { %v3148_v17 = vmul.f32 -1.442695, %v5311_v33  ;;  %v2547_v7 = vmul.f32 %v5135_v58, %v7144_v36  ;;  %v5369_v34 = vpop.eup %3411  ;;  %v5372_v57 = vmul.f32 %v1701_v6, %v4925_v11  ;;  %v5375_v10 = vmul.f32 %v1716_v51, %v4971_v42  ;;  %v5386_v11 = vpop.f32.mrf.mxu1  ;;  %v7152_v6 = vld [vmem:[#allocation18_spill] sm:$0xff]  ;;  %v7154_v36 = vld [vmem:[#allocation20_spill] sm:$0xff] }
 0x207   : > { %v1772_v63 = vand.u32 2147483647, %v5221_v13  ;;  %3413 = vrcp.f32 %v5351_v15  ;;  %v1737_v56 = vadd.f32 %v5238_v45, %v1736_v44  ;;  %v1752_v49 = vadd.f32 %v5245_v52, %v1751_v61  ;;  %v7153_v44 = vld [vmem:[#allocation19_spill] sm:$0xff] }
 0x208   : > { %vm1768_vm6 = vweird.f32 %v5221_v13  ;;  %v5382_v58 = vor.u32 1.1754944e-38, %v1774_v24  ;;  %v1794_v32 = vmul.f32 %v5369_v34, %v5273_v37  ;;  %2845 = vmatmul.f32.gmra.mxu2 %v2547_v7  ;;  %v5389_v42 = vmul.f32 %v1731_v0, %v5004_v39  ;;  %v5457_v9 = vpop.f32.mrf.mxu0 }
 0x209   : > { %vm1769_vm7 = vweird.f32 %v5284_v8  ;;  %v1787_v43 = vand.u32 2147483647, %v5250_v20  ;;  %3415 = vpow2.f32 %v3147_v28  ;;  %v1766_v59 = vmul.f32 %v5284_v8, %v1765_v4 }
 0x20a   : > { %v1780_v25 = vsub.f32 1.0, %v1779_v31  ;;  %3417 = vpow2.f32 %v3148_v17  ;;  %v2548_v39 = vmul.f32 %v5149_v23, %v7147_v53  ;;  %v1789_v21 = vand.u32 2147483648, %v5250_v20  ;;  %vm5463_vm14 = vmor %vm1768_vm6, %vm1769_vm7 }
 0x20b   : > { %v1795_v18 = vsub.f32 1.0, %v1794_v32  ;;  %v3149_v35 = vmul.f32 -1.442695, %v5367_v26  ;;  %v3150_v22 = vmul.f32 -1.442695, %v5386_v11  ;;  %v1741_v23 = vsel %vm5397_vm8, %v5238_v45, %v1737_v56 }
 0x20c   : > { %v1756_v30 = vsel %vm5412_vm9, %v5245_v52, %v1752_v49  ;;  %vm5425_vm10 = vcmp.eq.f32.partialorder %v1772_v63, 8.507059e+37  ;;  %vm1783_vm11 = vweird.f32 %v5250_v20  ;;  %2919 = vmatmul.f32.gmra.mxu3 %v2548_v39  ;;  %v2549_v51 = vmul.f32 %v5209_v2, %v7152_v6  ;;  %v7155_v49 = vld [vmem:[#allocation21_spill] sm:$0xff] }
 0x20d   : > { %v2550_v61 = vmul.f32 %v5212_v29, %v7153_v44  ;;  %v5434_v24 = vpop.eup %3413  ;;  %vm1798_vm12 = vweird.f32 %v5273_v37  ;;  %3419 = vpow2.f32 %v3149_v35  ;;  %v3151_v45 = vmul.f32 -1.442695, %v5404_v27 }
 0x20e   : > { %v3152_v52 = vmul.f32 -1.442695, %v5406_v3  ;;  %v1767_v0 = vadd.f32 %v5284_v8, %v1766_v59  ;;  %v1781_v28 = vmul.f32 %v5334_v54, %v1780_v25  ;;  %v1809_v4 = vmul.f32 %v5434_v24, %v5351_v15  ;;  %2700 = vmatmul.f32.gmra.mxu0 %v2549_v51 }
 0x20f   : > { %3421 = vpow2.f32 %v3150_v22  ;;  %2774 = vmatmul.f32.gmra.mxu1 %v2550_v61  ;;  %v3416_v2 = vpop.eup %3415  ;;  %v1746_v29 = vsel %vm5354_vm4, %v5339_v47, %v1741_v23  ;;  %v1761_v31 = vsel %vm5358_vm5, %v5341_v40, %v1756_v30  ;;  %v1796_v17 = vmul.f32 %v5369_v34, %v1795_v18  ;;  %v5504_v30 = vpop.f32.mrf.mxu1  ;;  %v7166_v47 = vld [vmem:[#allocation22_spill] sm:$0xff] }
 0x210   : > { %v2551_v7 = vmul.f32 %v5224_v12, %v7154_v36  ;;  %v3418_v63 = vpop.eup %3417  ;;  %vm1784_vm13 = vweird.f32 %v5334_v54  ;;  %v5453_v56 = vadd.f32 1.0, %v3416_v2  ;;  %3423 = vpow2.f32 %v3151_v45 }
 0x211   : > { %v2552_v32 = vmul.f32 %v5227_v50, %v7155_v49  ;;  %v1802_v12 = vand.u32 2147483647, %v5273_v37  ;;  %v1804_v40 = vand.u32 2147483648, %v5273_v37  ;;  %v5469_v38 = vadd.f32 1.0, %v3418_v63  ;;  %vm5496_vm1 = vmor %vm1783_vm11, %vm1784_vm13 }
 0x212   : > { %3425 = vpow2.f32 %v3152_v52  ;;  %2848 = vmatmul.f32.gmra.mxu2 %v2551_v7  ;;  %v1771_v50 = vsel %vm5463_vm14, %v5284_v8, %v1767_v0  ;;  %v1782_v19 = vadd.f32 %v5334_v54, %v1781_v28  ;;  %v1810_v59 = vsub.f32 1.0, %v1809_v4 }
 0x213   : > { %3427 = vrcp.f32 %v5453_v56  ;;  %v3420_v13 = vpop.eup %3419  ;;  %v1797_v25 = vadd.f32 %v5369_v34, %v1796_v17  ;;  %vm1799_vm15 = vweird.f32 %v5369_v34  ;;  %v3153_v53 = vmul.f32 -1.442695, %v5457_v9 }
 0x214   : > { %3429 = vrcp.f32 %v5469_v38  ;;  %v5481_v14 = vmul.f32 %v1746_v29, %v5031_v62  ;;  %vm5483_vm0 = vcmp.eq.f32.partialorder %v1787_v43, 8.507059e+37  ;;  %v1790_v18 = vor.u32 1.1754944e-38, %v1789_v21  ;;  %2922 = vmatmul.f32.gmra.mxu3 %v2552_v32  ;;  %vm5516_vm2 = vmor %vm1798_vm12, %vm1799_vm15 }
 0x215   : > { %v3422_v39 = vpop.eup %3421  ;;  %v5487_v35 = vadd.f32 1.0, %v3420_v13  ;;  %v1776_v22 = vsel %vm5425_vm10, %v5382_v58, %v1771_v50  ;;  %v1817_v62 = vand.u32 2147483647, %v5351_v15  ;;  %v1819_v43 = vand.u32 2147483648, %v5351_v15 }
 0x216   : > { %v5502_v21 = vadd.f32 1.0, %v3422_v39  ;;  %v3424_v6 = vpop.eup %3423  ;;  %v5507_v48 = vmul.f32 %v1761_v31, %v5033_v60  ;;  %v1786_v20 = vsel %vm5496_vm1, %v5334_v54, %v1782_v19  ;;  %v1811_v51 = vmul.f32 %v5434_v24, %v1810_v59 }
 0x217   : > { %3431 = vrcp.f32 %v5487_v35  ;;  %v1801_v60 = vsel %vm5516_vm2, %v5369_v34, %v1797_v25  ;;  %vm1803_vm3 = vcmp.eq.f32.partialorder %v1802_v12, 8.507059e+37  ;;  %v1805_v61 = vor.u32 1.1754944e-38, %v1804_v40 }
 0x218   : > { %v3426_v44 = vpop.eup %3425  ;;  %3433 = vpow2.f32 %v3153_v53  ;;  %v5528_v37 = vmul.f32 %v1776_v22, %v5060_v46  ;;  %vm1813_vm4 = vweird.f32 %v5351_v15  ;;  %v3154_v45 = vmul.f32 -1.442695, %v5504_v30 }
 0x219   : > { %v5525_v54 = vpop.eup %3427  ;;  %3435 = vrcp.f32 %v5502_v21  ;;  %v1791_v0 = vsel %vm5483_vm0, %v1790_v18, %v1786_v20  ;;  %vm5537_vm5 = vcmp.eq.f32.partialorder %v1817_v62, 8.507059e+37  ;;  %v1820_v28 = vor.u32 1.1754944e-38, %v1819_v43 }
 0x21a   : > { %v5533_v52 = vpop.eup %3429  ;;  %v1824_v46 = vmul.f32 %v5525_v54, %v5453_v56  ;;  %v1806_v4 = vsel %vm1803_vm3, %v1805_v61, %v1801_v60  ;;  %v1812_v2 = vadd.f32 %v5434_v24, %v1811_v51  ;;  %vm1814_vm6 = vweird.f32 %v5434_v24 }
 0x21b   : > { %v1839_v29 = vmul.f32 %v5533_v52, %v5469_v38  ;;  %v1832_v17 = vand.u32 2147483647, %v5453_v56  ;;  %v1834_v36 = vand.u32 2147483648, %v5453_v56  ;;  %v5549_v7 = vadd.f32 1.0, %v3424_v6  ;;  %vm5562_vm7 = vmor %vm1813_vm4, %vm1814_vm6 }
 0x21c   : > { %v1825_v31 = vsub.f32 1.0, %v1824_v46  ;;  %v5553_v32 = vadd.f32 1.0, %v3426_v44  ;;  %3437 = vpow2.f32 %v3154_v45  ;;  %v2553_v12 = vmul.f32 %v5276_v55, %v7166_v47 }
 0x21d   : > { %v5551_v63 = vpop.eup %3431  ;;  %v1840_v49 = vsub.f32 1.0, %v1839_v29  ;;  %v5558_v50 = vmul.f32 %v1791_v0, %v5107_v41  ;;  %v1847_v59 = vand.u32 2147483647, %v5469_v38  ;;  %3439 = vrcp.f32 %v5549_v7 }
 0x21e   : > { %v3434_v40 = vpop.eup %3433  ;;  %v1854_v13 = vmul.f32 %v5551_v63, %v5487_v35  ;;  %v5573_v55 = vmul.f32 %v1806_v4, %v5130_v16  ;;  %v1816_v41 = vsel %vm5562_vm7, %v5434_v24, %v1812_v2  ;;  %v1826_v15 = vmul.f32 %v5525_v54, %v1825_v31  ;;  %2703 = vmatmul.f32.gmra.mxu0 %v2553_v12  ;;  %v5630_v2 = vpop.f32.mrf.mxu2 }
 0x21f   : > { %v5570_v25 = vpop.eup %3435  ;;  %v1841_v53 = vmul.f32 %v5533_v52, %v1840_v49  ;;  %vm1828_vm8 = vweird.f32 %v5453_v56  ;;  %vm1843_vm9 = vweird.f32 %v5469_v38  ;;  %v1849_v39 = vand.u32 2147483648, %v5469_v38  ;;  %v5643_v49 = vpop.f32.mrf.mxu3 }
 0x220   : > { %v1855_v8 = vsub.f32 1.0, %v1854_v13  ;;  %vm5583_vm10 = vcmp.eq.f32.partialorder %v1832_v17, 8.507059e+37  ;;  %v1835_v16 = vor.u32 1.1754944e-38, %v1834_v36  ;;  %v1869_v24 = vmul.f32 %v5570_v25, %v5502_v21 }
 0x221   : > { %3441 = vrcp.f32 %v5553_v32  ;;  %v1821_v22 = vsel %vm5537_vm5, %v1820_v28, %v1816_v41  ;;  %vm1829_vm11 = vweird.f32 %v5525_v54  ;;  %vm5593_vm12 = vcmp.eq.f32.partialorder %v1847_v59, 8.507059e+37 }
 0x222   : > { %v5597_v62 = vadd.f32 1.0, %v3434_v40  ;;  %v3438_v43 = vpop.eup %3437  ;;  %v1827_v6 = vadd.f32 %v5525_v54, %v1826_v15  ;;  %v1842_v20 = vadd.f32 %v5533_v52, %v1841_v53  ;;  %vm1844_vm13 = vweird.f32 %v5533_v52  ;;  %vm5613_vm15 = vmor %vm1828_vm8, %vm1829_vm11 }
 0x223   : > { %v1856_v58 = vmul.f32 %v5551_v63, %v1855_v8  ;;  %v5603_v51 = vpop.eup %3439  ;;  %v1850_v44 = vor.u32 1.1754944e-38, %v1849_v39  ;;  %vm1858_vm14 = vweird.f32 %v5487_v35  ;;  %v1862_v60 = vand.u32 2147483647, %v5487_v35  ;;  %vm5621_vm0 = vmor %vm1843_vm9, %vm1844_vm13 }
 0x224   : > { %v1864_v61 = vand.u32 2147483648, %v5487_v35  ;;  %v5609_v45 = vmul.f32 %v1821_v22, %v5206_v5  ;;  %v1870_v34 = vsub.f32 1.0, %v1869_v24  ;;  %v1877_v28 = vand.u32 2147483647, %v5502_v21  ;;  %v7183_v22 = vld [vmem:[#allocation23_spill] sm:$0xff] }
 0x225   : > { %v1879_v46 = vand.u32 2147483648, %v5502_v21  ;;  %vm1859_vm1 = vweird.f32 %v5551_v63  ;;  %v1894_v5 = vand.u32 2147483648, %v5549_v7  ;;  %3443 = vrcp.f32 %v5597_v62 }
 0x226   : > { %v5628_v56 = vadd.f32 1.0, %v3438_v43  ;;  %v1831_v38 = vsel %vm5613_vm15, %v5525_v54, %v1827_v6  ;;  %v1846_v31 = vsel %vm5621_vm0, %v5533_v52, %v1842_v20  ;;  %v1857_v17 = vadd.f32 %v5551_v63, %v1856_v58  ;;  %vm5663_vm5 = vmor %vm1858_vm14, %vm1859_vm1 }
 0x227   : > { %v5632_v29 = vpop.eup %3441  ;;  %v1884_v36 = vmul.f32 %v5603_v51, %v5549_v7  ;;  %vm5645_vm2 = vcmp.eq.f32.partialorder %v1862_v60, 8.507059e+37  ;;  %v1865_v12 = vor.u32 1.1754944e-38, %v1864_v61  ;;  %vm1873_vm3 = vweird.f32 %v5502_v21  ;;  %v5695_v60 = vpop.f32.mrf.mxu0 }
 0x228   : > { %v1899_v54 = vmul.f32 %v5632_v29, %v5553_v32  ;;  %v1871_v40 = vmul.f32 %v5570_v25, %v1870_v34  ;;  %vm1874_vm4 = vweird.f32 %v5570_v25  ;;  %v1880_v52 = vor.u32 1.1754944e-38, %v1879_v46  ;;  %v7184_v34 = vld [vmem:[#allocation24_spill] sm:$0xff] }
 0x229   : > { %v1892_v19 = vand.u32 2147483647, %v5549_v7  ;;  %v1836_v59 = vsel %vm5583_vm10, %v1835_v16, %v1831_v38  ;;  %v1851_v13 = vsel %vm5593_vm12, %v1850_v44, %v1846_v31  ;;  %v1909_v15 = vand.u32 2147483648, %v5553_v32  ;;  %vm5716_vm10 = vmor %vm1873_vm3, %vm1874_vm4  ;;  %v7187_v38 = vld [vmem:[#allocation25_spill] sm:$0xff] }
 0x22a   : > { %3445 = vrcp.f32 %v5628_v56  ;;  %v1861_v53 = vsel %vm5663_vm5, %v5551_v63, %v1857_v17  ;;  %vm5672_vm6 = vcmp.eq.f32.partialorder %v1877_v28, 8.507059e+37  ;;  %v1885_v8 = vsub.f32 1.0, %v1884_v36 }
 0x22b   : > { %v5676_v18 = vor.u32 1.1754944e-38, %v1894_v5  ;;  %v1907_v35 = vand.u32 2147483647, %v5553_v32  ;;  %v5679_v16 = vpop.eup %3443  ;;  %v1900_v24 = vsub.f32 1.0, %v1899_v54  ;;  %v2554_v23 = vmul.f32 %v5372_v57, %v7183_v22  ;;  %v5697_v57 = vpop.f32.mrf.mxu1 }
 0x22c   : > { %v3155_v43 = vmul.f32 -1.442695, %v5630_v2  ;;  %v3156_v6 = vmul.f32 -1.442695, %v5643_v49  ;;  %v5686_v63 = vmul.f32 %v1836_v59, %v5309_v1  ;;  %v5689_v20 = vmul.f32 %v1851_v13, %v5311_v33  ;;  %v5734_v54 = vpop.f32.mrf.mxu3  ;;  %v7191_v59 = vld [vmem:[#allocation27_spill] sm:$0xff] }
 0x22d   : > { %v1872_v58 = vadd.f32 %v5570_v25, %v1871_v40  ;;  %vm1888_vm7 = vweird.f32 %v5549_v7  ;;  %v1914_v44 = vmul.f32 %v5679_v16, %v5597_v62  ;;  %v5701_v61 = vsel %vm5645_vm2, %v1865_v12, %v1861_v53  ;;  %2777 = vmatmul.f32.gmra.mxu1 %v2554_v23  ;;  %v7190_v40 = vld [vmem:[#allocation26_spill] sm:$0xff] }
 0x22e   : > { %vm1889_vm8 = vweird.f32 %v5603_v51  ;;  %vm1903_vm9 = vweird.f32 %v5553_v32  ;;  %v5705_v1 = vor.u32 1.1754944e-38, %v1909_v15  ;;  %3447 = vpow2.f32 %v3155_v43 }
 0x22f   : > { %v1886_v33 = vmul.f32 %v5603_v51, %v1885_v8  ;;  %v1915_v0 = vsub.f32 1.0, %v1914_v44  ;;  %3449 = vpow2.f32 %v3156_v6  ;;  %v2555_v28 = vmul.f32 %v5375_v10, %v7184_v34  ;;  %v5725_v10 = vpop.f32.mrf.mxu2  ;;  %v7192_v6 = vld [vmem:[#allocation28_spill] sm:$0xff]  ;;  %vm5761_vm14 = vmor %vm1888_vm7, %vm1889_vm8 }
 0x230   : > { %v5710_v46 = vpop.eup %3445  ;;  %v1901_v5 = vmul.f32 %v5632_v29, %v1900_v24  ;;  %v2556_v31 = vmul.f32 %v5389_v42, %v7187_v38  ;;  %v3157_v17 = vmul.f32 -1.442695, %v5695_v60  ;;  %v3158_v36 = vmul.f32 -1.442695, %v5697_v57 }
 0x231   : > { %v1876_v47 = vsel %vm5716_vm10, %v5570_v25, %v1872_v58  ;;  %vm1918_vm11 = vweird.f32 %v5597_v62  ;;  %v1922_v21 = vand.u32 2147483647, %v5597_v62  ;;  %v1929_v12 = vmul.f32 %v5710_v46, %v5628_v56  ;;  %2851 = vmatmul.f32.gmra.mxu2 %v2555_v28 }
 0x232   : > { %vm5736_vm12 = vcmp.eq.f32.partialorder %v1892_v19, 8.507059e+37  ;;  %vm1904_vm13 = vweird.f32 %v5632_v29  ;;  %2925 = vmatmul.f32.gmra.mxu3 %v2556_v31  ;;  %3451 = vpow2.f32 %v3157_v17  ;;  %v2557_v25 = vmul.f32 %v5481_v14, %v7190_v40 }
 0x233   : > { %v2558_v13 = vmul.f32 %v5507_v48, %v7191_v59  ;;  %v1916_v41 = vmul.f32 %v5679_v16, %v1915_v0  ;;  %v1930_v15 = vsub.f32 1.0, %v1929_v12  ;;  %3453 = vpow2.f32 %v3158_v36  ;;  %vm5774_vm15 = vmor %vm1903_vm9, %vm1904_vm13 }
 0x234   : > { %v3159_v53 = vmul.f32 -1.442695, %v5725_v10  ;;  %v3448_v19 = vpop.eup %3447  ;;  %v1881_v8 = vsel %vm5672_vm6, %v1880_v52, %v1876_v47  ;;  %v1887_v24 = vadd.f32 %v5603_v51, %v1886_v33  ;;  %v1902_v22 = vadd.f32 %v5632_v29, %v1901_v5  ;;  %2706 = vmatmul.f32.gmra.mxu0 %v2557_v25  ;;  %v7195_v33 = vld [vmem:[#allocation29_spill] sm:$0xff] }
 0x235   : > { %v3160_v14 = vmul.f32 -1.442695, %v5734_v54  ;;  %v3450_v23 = vpop.eup %3449  ;;  %v1931_v48 = vmul.f32 %v5710_v46, %v1930_v15  ;;  %v5753_v43 = vadd.f32 1.0, %v3448_v19  ;;  %v2559_v58 = vmul.f32 %v5528_v37, %v7192_v6  ;;  %2780 = vmatmul.f32.gmra.mxu1 %v2558_v13 }
 0x236   : > { %3455 = vpow2.f32 %v3159_v53  ;;  %v1924_v39 = vand.u32 2147483648, %v5597_v62  ;;  %v5766_v44 = vadd.f32 1.0, %v3450_v23  ;;  %v2560_v0 = vmul.f32 %v5558_v50, %v7195_v33 }
 0x237   : > { %3457 = vpow2.f32 %v3160_v14  ;;  %v1917_v7 = vadd.f32 %v5679_v16, %v1916_v41  ;;  %vm1919_vm0 = vweird.f32 %v5679_v16  ;;  %vm1933_vm1 = vweird.f32 %v5628_v56 }
 0x238   : > { %3459 = vrcp.f32 %v5753_v43  ;;  %v3452_v34 = vpop.eup %3451  ;;  %v1891_v50 = vsel %vm5761_vm14, %v5603_v51, %v1887_v24  ;;  %v1906_v28 = vsel %vm5774_vm15, %v5632_v29, %v1902_v22  ;;  %v1937_v4 = vand.u32 2147483647, %v5628_v56  ;;  %vm5805_vm4 = vmor %vm1918_vm11, %vm1919_vm0 }
 0x239   : > { %3461 = vrcp.f32 %v5766_v44  ;;  %v3454_v5 = vpop.eup %3453  ;;  %v1932_v38 = vadd.f32 %v5710_v46, %v1931_v48  ;;  %vm1934_vm2 = vweird.f32 %v5710_v46  ;;  %v1939_v31 = vand.u32 2147483648, %v5628_v56  ;;  %2854 = vmatmul.f32.gmra.mxu2 %v2559_v58 }
 0x23a   : > { %v5793_v17 = vadd.f32 1.0, %v3452_v34  ;;  %v5797_v51 = vmul.f32 %v5701_v61, %v5367_v26  ;;  %vm1908_vm3 = vcmp.eq.f32.partialorder %v1907_v35, 8.507059e+37  ;;  %vm5809_vm5 = vcmp.eq.f32.partialorder %v1922_v21, 8.507059e+37  ;;  %2928 = vmatmul.f32.gmra.mxu3 %v2560_v0  ;;  %v5815_v26 = vpop.f32.mrf.mxu0  ;;  %vm5832_vm6 = vmor %vm1933_vm1, %vm1934_vm2 }
 0x23b   : > { %v5813_v47 = vadd.f32 1.0, %v3454_v5  ;;  %v1896_v32 = vsel %vm5736_vm12, %v5676_v18, %v1891_v50  ;;  %v1911_v62 = vsel %vm1908_vm3, %v5705_v1, %v1906_v28  ;;  %v1921_v35 = vsel %vm5805_vm4, %v5679_v16, %v1917_v7  ;;  %v5841_v16 = vpop.f32.mrf.mxu1  ;;  %v7227_v18 = vld [vmem:[#allocation33_spill] sm:$0xff] }
 0x23c   : > { %v3456_v61 = vpop.eup %3455  ;;  %3463 = vrcp.f32 %v5793_v17  ;;  %v5826_v12 = vmul.f32 %v1881_v8, %v5386_v11  ;;  %v1925_v40 = vor.u32 1.1754944e-38, %v1924_v39  ;;  %vm5836_vm7 = vcmp.eq.f32.partialorder %v1937_v4, 8.507059e+37 }
 0x23d   : > { %v3458_v21 = vpop.eup %3457  ;;  %3465 = vrcp.f32 %v5813_v47  ;;  %v1936_v11 = vsel %vm5832_vm6, %v5710_v46, %v1932_v38  ;;  %v1940_v25 = vor.u32 1.1754944e-38, %v1939_v31  ;;  %v5848_v56 = vadd.f32 1.0, %v3456_v61  ;;  %v7208_v61 = vld [vmem:[#allocation30_spill] sm:$0xff] }
 0x23e   : > { %v5843_v1 = vpop.eup %3459  ;;  %v3161_v59 = vmul.f32 -1.442695, %v5815_v26  ;;  %v5854_v41 = vmul.f32 %v1896_v32, %v5404_v27  ;;  %v5857_v15 = vmul.f32 %v1911_v62, %v5406_v3  ;;  %v1926_v53 = vsel %vm5809_vm5, %v1925_v40, %v1921_v35 }
 0x23f   : > { %v5851_v13 = vpop.eup %3461  ;;  %v1944_v19 = vmul.f32 %v5843_v1, %v5753_v43  ;;  %v1954_v46 = vand.u32 2147483648, %v5753_v43  ;;  %v1969_v24 = vand.u32 2147483648, %v5766_v44  ;;  %v3162_v22 = vmul.f32 -1.442695, %v5841_v16 }
 0x240   : > { %v1959_v8 = vmul.f32 %v5851_v13, %v5766_v44  ;;  %v1941_v27 = vsel %vm5836_vm7, %v1940_v25, %v1936_v11  ;;  %v1952_v14 = vand.u32 2147483647, %v5753_v43  ;;  %3467 = vrcp.f32 %v5848_v56 }
 0x241   : > { %v1945_v3 = vsub.f32 1.0, %v1944_v19  ;;  %v5875_v48 = vmul.f32 %v1926_v53, %v5457_v9  ;;  %v5877_v58 = vadd.f32 1.0, %v3458_v21  ;;  %3469 = vpow2.f32 %v3161_v59 }
 0x242   : > { %v5872_v23 = vpop.eup %3463  ;;  %v1960_v6 = vsub.f32 1.0, %v1959_v8  ;;  %vm1948_vm8 = vweird.f32 %v5753_v43  ;;  %v1967_v33 = vand.u32 2147483647, %v5766_v44  ;;  %v5887_v37 = vmul.f32 %v1941_v27, %v5504_v30  ;;  %v5938_v8 = vpop.f32.mrf.mxu3 }
 0x243   : > { %v5879_v52 = vpop.eup %3465  ;;  %v1946_v39 = vmul.f32 %v5843_v1, %v1945_v3  ;;  %v1974_v0 = vmul.f32 %v5872_v23, %v5793_v17  ;;  %v1955_v9 = vor.u32 1.1754944e-38, %v1954_v46  ;;  %vm1963_vm9 = vweird.f32 %v5766_v44  ;;  %v5936_v46 = vpop.f32.mrf.mxu2  ;;  %v7215_v3 = vld [vmem:[#allocation31_spill] sm:$0xff] }
 0x244   : > { %v5890_v7 = vor.u32 1.1754944e-38, %v1969_v24  ;;  %v1989_v34 = vmul.f32 %v5879_v52, %v5813_v47  ;;  %vm5894_vm10 = vcmp.eq.f32.partialorder %v1952_v14, 8.507059e+37  ;;  %v1982_v4 = vand.u32 2147483647, %v5793_v17 }
 0x245   : > { %v1975_v28 = vsub.f32 1.0, %v1974_v0  ;;  %v1984_v5 = vand.u32 2147483648, %v5793_v17  ;;  %3471 = vrcp.f32 %v5877_v58  ;;  %vm1949_vm11 = vweird.f32 %v5843_v1  ;;  %v5955_v0 = vpop.f32.mrf.mxu0 }
 0x246   : > { %v1961_v30 = vmul.f32 %v5851_v13, %v1960_v6  ;;  %vm1978_vm12 = vweird.f32 %v5793_v17  ;;  %v1990_v38 = vsub.f32 1.0, %v1989_v34  ;;  %v5904_v31 = vpop.eup %3467  ;;  %v1947_v29 = vadd.f32 %v5843_v1, %v1946_v39  ;;  %vm5929_vm1 = vmor %vm1948_vm8, %vm1949_vm11 }
 0x247   : > { %v1976_v36 = vmul.f32 %v5872_v23, %v1975_v28  ;;  %3473 = vpow2.f32 %v3162_v22  ;;  %v2561_v32 = vmul.f32 %v5573_v55, %v7208_v61  ;;  %v3470_v62 = vpop.eup %3469  ;;  %vm5910_vm13 = vcmp.eq.f32.partialorder %v1967_v33, 8.507059e+37 }
 0x248   : > { %v1991_v21 = vmul.f32 %v5879_v52, %v1990_v38  ;;  %vm1993_vm14 = vweird.f32 %v5813_v47  ;;  %v1997_v40 = vand.u32 2147483647, %v5813_v47  ;;  %v2004_v42 = vmul.f32 %v5904_v31, %v5848_v56 }
 0x249   : > { %vm1964_vm15 = vweird.f32 %v5851_v13  ;;  %vm5920_vm0 = vcmp.eq.f32.partialorder %v1982_v4, 8.507059e+37  ;;  %v1985_v55 = vor.u32 1.1754944e-38, %v1984_v5  ;;  %v1999_v11 = vand.u32 2147483648, %v5813_v47  ;;  %2709 = vmatmul.f32.gmra.mxu0 %v2561_v32  ;;  %v7226_v32 = vld [vmem:[#allocation32_spill] sm:$0xff] }
 0x24a   : > { %v1962_v59 = vadd.f32 %v5851_v13, %v1961_v30  ;;  %vm1979_vm2 = vweird.f32 %v5872_v23  ;;  %v2005_v53 = vsub.f32 1.0, %v2004_v42  ;;  %v2014_v19 = vand.u32 2147483648, %v5848_v56  ;;  %vm5961_vm4 = vmor %vm1963_vm9, %vm1964_vm15 }
 0x24b   : > { %v5940_v24 = vpop.eup %3471  ;;  %v1951_v43 = vsel %vm5929_vm1, %v5843_v1, %v1947_v29  ;;  %v1977_v22 = vadd.f32 %v5872_v23, %v1976_v36  ;;  %v5946_v27 = vadd.f32 1.0, %v3470_v62  ;;  %v2562_v14 = vmul.f32 %v5609_v45, %v7215_v3  ;;  %vm5980_vm7 = vmor %vm1978_vm12, %vm1979_vm2  ;;  %v7231_v45 = vld [vmem:[#allocation35_spill] sm:$0xff] }
 0x24c   : > { %v1992_v6 = vadd.f32 %v5879_v52, %v1991_v21  ;;  %vm1994_vm3 = vweird.f32 %v5879_v52  ;;  %v2012_v39 = vand.u32 2147483647, %v5848_v56  ;;  %v2019_v33 = vmul.f32 %v5940_v24, %v5877_v58 }
 0x24d   : > { %v3474_v34 = vpop.eup %3473  ;;  %vm5965_vm5 = vcmp.eq.f32.partialorder %v1997_v40, 8.507059e+37  ;;  %v2000_v28 = vor.u32 1.1754944e-38, %v1999_v11  ;;  %vm2008_vm6 = vweird.f32 %v5848_v56  ;;  %3475 = vrcp.f32 %v5946_v27  ;;  %2783 = vmatmul.f32.gmra.mxu1 %v2562_v14  ;;  %vm5993_vm8 = vmor %vm1993_vm14, %vm1994_vm3 }
 0x24e   : > { %v1956_v4 = vsel %vm5894_vm10, %v1955_v9, %v1951_v43  ;;  %v1966_v44 = vsel %vm5961_vm4, %v5851_v13, %v1962_v59  ;;  %v2006_v30 = vmul.f32 %v5904_v31, %v2005_v53  ;;  %v2029_v38 = vand.u32 2147483648, %v5877_v58  ;;  %v6047_v43 = vpop.f32.mrf.mxu3 }
 0x24f   : > { %v1981_v9 = vsel %vm5980_vm7, %v5872_v23, %v1977_v22  ;;  %v2015_v17 = vor.u32 1.1754944e-38, %v2014_v19  ;;  %v5997_v50 = vadd.f32 1.0, %v3474_v34  ;;  %v3163_v29 = vmul.f32 -1.442695, %v5936_v46  ;;  %v6045_v19 = vpop.f32.mrf.mxu2  ;;  %v6065_v34 = vpop.f32.mrf.mxu0 }
 0x250   : > { %v1996_v36 = vsel %vm5993_vm8, %v5879_v52, %v1992_v6  ;;  %vm6003_vm9 = vcmp.eq.f32.partialorder %v2012_v39, 8.507059e+37  ;;  %v2020_v23 = vsub.f32 1.0, %v2019_v33  ;;  %v2027_v47 = vand.u32 2147483647, %v5877_v58  ;;  %v7230_v33 = vld [vmem:[#allocation34_spill] sm:$0xff] }
 0x251   : > { %v2563_v62 = vmul.f32 %v5686_v63, %v7226_v32  ;;  %v6011_v21 = vmul.f32 %v1956_v4, %v5630_v2  ;;  %v6016_v40 = vsel %vm5910_vm13, %v5890_v7, %v1966_v44  ;;  %3477 = vrcp.f32 %v5997_v50  ;;  %v6029_v63 = vpop.f32.mrf.mxu1 }
 0x252   : > { %v3164_v52 = vmul.f32 -1.442695, %v5938_v8  ;;  %v6022_v42 = vsel %vm5920_vm0, %v1985_v55, %v1981_v9  ;;  %v2007_v11 = vadd.f32 %v5904_v31, %v2006_v30  ;;  %vm2009_vm10 = vweird.f32 %v5904_v31 }
 0x253   : > { %vm2023_vm11 = vweird.f32 %v5877_v58  ;;  %v6027_v2 = vor.u32 1.1754944e-38, %v2029_v38  ;;  %2857 = vmatmul.f32.gmra.mxu2 %v2563_v62  ;;  %v6031_v7 = vpop.eup %3475  ;;  %v6035_v35 = vsel %vm5965_vm5, %v2000_v28, %v1996_v36  ;;  %3479 = vpow2.f32 %v3163_v29  ;;  %vm6053_vm14 = vmor %vm2008_vm6, %vm2009_vm10 }
 0x254   : > { %v2564_v55 = vmul.f32 %v5689_v20, %v7227_v18  ;;  %v3165_v25 = vmul.f32 -1.442695, %v5955_v0  ;;  %v2021_v59 = vmul.f32 %v5940_v24, %v2020_v23  ;;  %vm2024_vm12 = vweird.f32 %v5940_v24 }
 0x255   : > { %v2034_v53 = vmul.f32 %v6031_v7, %v5946_v27  ;;  %vm2038_vm13 = vweird.f32 %v5946_v27  ;;  %v2042_v22 = vand.u32 2147483647, %v5946_v27  ;;  %v2044_v3 = vand.u32 2147483648, %v5946_v27  ;;  %vm6092_vm0 = vmor %vm2023_vm11, %vm2024_vm12 }
 0x256   : > { %3481 = vpow2.f32 %v3164_v52  ;;  %2931 = vmatmul.f32.gmra.mxu3 %v2564_v55  ;;  %v3166_v14 = vmul.f32 -1.442695, %v6029_v63  ;;  %v2011_v6 = vsel %vm6053_vm14, %v5904_v31, %v2007_v11  ;;  %v2565_v56 = vmul.f32 %v5797_v51, %v7230_v33  ;;  %v7232_v51 = vld [vmem:[#allocation36_spill] sm:$0xff]  ;;  %v7236_v55 = vld [vmem:[#allocation38_spill] sm:$0xff] }
 0x257   : > { %v2035_v39 = vsub.f32 1.0, %v2034_v53  ;;  %3483 = vpow2.f32 %v3165_v25  ;;  %v6067_v1 = vpop.eup %3477  ;;  %v2566_v28 = vmul.f32 %v5826_v12, %v7231_v45  ;;  %v3167_v4 = vmul.f32 -1.442695, %v6045_v19  ;;  %v7233_v12 = vld [vmem:[#allocation37_spill] sm:$0xff] }
 0x258   : > { %3485 = vpow2.f32 %v3166_v14  ;;  %v3168_v44 = vmul.f32 -1.442695, %v6047_v43  ;;  %v2022_v5 = vadd.f32 %v5940_v24, %v2021_v59  ;;  %v2049_v30 = vmul.f32 %v6067_v1, %v5997_v50  ;;  %2712 = vmatmul.f32.gmra.mxu0 %v2565_v56 }
 0x259   : > { %v2036_v31 = vmul.f32 %v6031_v7, %v2035_v39  ;;  %v2567_v38 = vmul.f32 %v5854_v41, %v7232_v51  ;;  %v3480_v9 = vpop.eup %3479  ;;  %v2016_v13 = vsel %vm6003_vm9, %v2015_v17, %v2011_v6  ;;  %vm2039_vm15 = vweird.f32 %v6031_v7  ;;  %2786 = vmatmul.f32.gmra.mxu1 %v2566_v28  ;;  %v6137_v28 = vpop.f32.mrf.mxu1 }
 0x25a   : > { %v2568_v29 = vmul.f32 %v5857_v15, %v7233_v12  ;;  %v3169_v36 = vmul.f32 -1.442695, %v6065_v34  ;;  %v2050_v32 = vsub.f32 1.0, %v2049_v30  ;;  %v6086_v62 = vadd.f32 1.0, %v3480_v9  ;;  %vm6110_vm2 = vmor %vm2038_vm13, %vm2039_vm15 }
 0x25b   : > { %v2037_v23 = vadd.f32 %v6031_v7, %v2036_v31  ;;  %3487 = vpow2.f32 %v3167_v4  ;;  %2860 = vmatmul.f32.gmra.mxu2 %v2567_v38  ;;  %vm2053_vm1 = vweird.f32 %v5997_v50  ;;  %v2057_v15 = vand.u32 2147483647, %v5997_v50  ;;  %v6139_v4 = vpop.f32.mrf.mxu2 }
 0x25c   : > { %v3482_v41 = vpop.eup %3481  ;;  %v2059_v61 = vand.u32 2147483648, %v5997_v50  ;;  %3489 = vpow2.f32 %v3168_v44  ;;  %v2026_v11 = vsel %vm6092_vm0, %v5940_v24, %v2022_v5  ;;  %v2051_v18 = vmul.f32 %v6067_v1, %v2050_v32  ;;  %v7239_v24 = vld [vmem:[#allocation39_spill] sm:$0xff] }
 0x25d   : > { %v3484_v52 = vpop.eup %3483  ;;  %3491 = vrcp.f32 %v6086_v62  ;;  %v2569_v25 = vmul.f32 %v5875_v48, %v7236_v55  ;;  %vm2054_vm3 = vweird.f32 %v6067_v1  ;;  %v6115_v20 = vadd.f32 1.0, %v3482_v41 }
 0x25e   : > { %v3486_v59 = vpop.eup %3485  ;;  %2934 = vmatmul.f32.gmra.mxu3 %v2568_v29  ;;  %3493 = vpow2.f32 %v3169_v36  ;;  %v2570_v14 = vmul.f32 %v5887_v37, %v7239_v24  ;;  %v2041_v48 = vsel %vm6110_vm2, %v6031_v7, %v2037_v23  ;;  %v2052_v6 = vadd.f32 %v6067_v1, %v2051_v18  ;;  %vm6156_vm6 = vmor %vm2053_vm1, %vm2054_vm3 }
 0x25f   : > { %v6123_v27 = vadd.f32 1.0, %v3484_v52  ;;  %v6125_v39 = vadd.f32 1.0, %v3486_v59  ;;  %v6129_v33 = vmul.f32 %v6016_v40, %v5643_v49  ;;  %vm2028_vm4 = vcmp.eq.f32.partialorder %v2027_v47, 8.507059e+37 }
 0x260   : > { %v2045_v56 = vor.u32 1.1754944e-38, %v2044_v3  ;;  %3495 = vrcp.f32 %v6115_v20  ;;  %v2031_v45 = vsel %vm2028_vm4, %v6027_v2, %v2026_v11  ;;  %vm2043_vm5 = vcmp.eq.f32.partialorder %v2042_v22, 8.507059e+37  ;;  %2715 = vmatmul.f32.gmra.mxu0 %v2569_v25 }
 0x261   : > { %v3488_v37 = vpop.eup %3487  ;;  %v2074_v7 = vand.u32 2147483648, %v6086_v62  ;;  %3497 = vrcp.f32 %v6123_v27  ;;  %v6143_v58 = vmul.f32 %v6022_v42, %v5695_v60  ;;  %v6147_v47 = vmul.f32 %v6035_v35, %v5697_v57  ;;  %2789 = vmatmul.f32.gmra.mxu1 %v2570_v14 }
 0x262   : > { %v3490_v49 = vpop.eup %3489  ;;  %v6150_v40 = vmul.f32 %v2016_v13, %v5725_v10  ;;  %v2046_v2 = vsel %vm2043_vm5, %v2045_v56, %v2041_v48  ;;  %v2056_v60 = vsel %vm6156_vm6, %v6067_v1, %v2052_v6  ;;  %vm2058_vm7 = vcmp.eq.f32.partialorder %v2057_v15, 8.507059e+37 }
 0x263   : > { %v6160_v3 = vpop.eup %3491  ;;  %v2060_v57 = vor.u32 1.1754944e-38, %v2059_v61  ;;  %3499 = vrcp.f32 %v6125_v39  ;;  %v6167_v42 = vmul.f32 %v2031_v45, %v5734_v54  ;;  %v3170_v35 = vmul.f32 -1.442695, %v6137_v28 }
 0x264   : > { %v3494_v10 = vpop.eup %3493  ;;  %v2064_v50 = vmul.f32 %v6160_v3, %v6086_v62  ;;  %v6173_v44 = vmul.f32 -1.442695, %v6139_v4  ;;  %v6176_v5 = vmul.f32 %v2046_v2, %v5815_v26  ;;  %vm2068_vm8 = vweird.f32 %v6086_v62 }
 0x265   : > { %v2072_v1 = vand.u32 2147483647, %v6086_v62  ;;  %v6180_v31 = vor.u32 1.1754944e-38, %v2074_v7  ;;  %v6182_v30 = vadd.f32 1.0, %v3488_v37  ;;  %v2061_v51 = vsel %vm2058_vm7, %v2060_v57, %v2056_v60 }
 0x266   : > { %v6184_v54 = vpop.eup %3495  ;;  %v2065_v38 = vsub.f32 1.0, %v2064_v50  ;;  %vm2083_vm9 = vweird.f32 %v6115_v20  ;;  %v2087_v9 = vand.u32 2147483647, %v6115_v20  ;;  %v2089_v12 = vand.u32 2147483648, %v6115_v20 }
 0x267   : > { %v6188_v13 = vpop.eup %3497  ;;  %v2079_v26 = vmul.f32 %v6184_v54, %v6115_v20  ;;  %vm2098_vm10 = vweird.f32 %v6123_v27  ;;  %v6194_v29 = vadd.f32 1.0, %v3490_v49  ;;  %v2102_v32 = vand.u32 2147483647, %v6123_v27 }
 0x268   : > { %v2066_v36 = vmul.f32 %v6160_v3, %v2065_v38  ;;  %v2094_v23 = vmul.f32 %v6188_v13, %v6123_v27  ;;  %3501 = vrcp.f32 %v6182_v30  ;;  %v6204_v17 = vmul.f32 %v2061_v51, %v5841_v16 }
 0x269   : > { %v6201_v41 = vpop.eup %3499  ;;  %vm2069_vm11 = vweird.f32 %v6160_v3  ;;  %v2080_v15 = vsub.f32 1.0, %v2079_v26  ;;  %v2104_v61 = vand.u32 2147483648, %v6123_v27  ;;  %vm6208_vm12 = vcmp.eq.f32.partialorder %v2072_v1, 8.507059e+37 }
 0x26a   : > { %vm6212_vm13 = vcmp.eq.f32.partialorder %v2087_v9, 8.507059e+37  ;;  %v2095_v18 = vsub.f32 1.0, %v2094_v23  ;;  %v2109_v55 = vmul.f32 %v6201_v41, %v6125_v39  ;;  %v6218_v25 = vadd.f32 1.0, %v3494_v10  ;;  %vm6239_vm1 = vmor %vm2068_vm8, %vm2069_vm11 }
 0x26b   : > { %3503 = vpow2.f32 %v3170_v35  ;;  %v2081_v16 = vmul.f32 %v6184_v54, %v2080_v15  ;;  %v2117_v59 = vand.u32 2147483647, %v6125_v39  ;;  %v2119_v53 = vand.u32 2147483648, %v6125_v39 }
 0x26c   : > { %3505 = vrcp.f32 %v6194_v29  ;;  %v2067_v24 = vadd.f32 %v6160_v3, %v2066_v36  ;;  %vm2084_vm14 = vweird.f32 %v6184_v54  ;;  %v2096_v14 = vmul.f32 %v6188_v13, %v2095_v18 }
 0x26d   : > { %v2110_v48 = vsub.f32 1.0, %v2109_v55  ;;  %v2082_v6 = vadd.f32 %v6184_v54, %v2081_v16  ;;  %v2090_v56 = vor.u32 1.1754944e-38, %v2089_v12  ;;  %vm2099_vm15 = vweird.f32 %v6188_v13  ;;  %vm6249_vm2 = vmor %vm2083_vm9, %vm2084_vm14 }
 0x26e   : > { %vm6229_vm0 = vcmp.eq.f32.partialorder %v2102_v32, 8.507059e+37  ;;  %v6233_v45 = vpop.eup %3501  ;;  %v2097_v49 = vadd.f32 %v6188_v13, %v2096_v14  ;;  %v2134_v22 = vand.u32 2147483648, %v6182_v30  ;;  %3507 = vrcp.f32 %v6218_v25  ;;  %vm6270_vm5 = vmor %vm2098_vm10, %vm2099_vm15 }
 0x26f   : > { %v2111_v2 = vmul.f32 %v6201_v41, %v2110_v48  ;;  %v2105_v57 = vor.u32 1.1754944e-38, %v2104_v61  ;;  %vm2113_vm3 = vweird.f32 %v6125_v39  ;;  %vm6254_vm4 = vcmp.eq.f32.partialorder %v2117_v59, 8.507059e+37  ;;  %v6293_v61 = vpop.f32.mrf.mxu3 }
 0x270   : > { %v2124_v10 = vmul.f32 %v6233_v45, %v6182_v30  ;;  %v2071_v35 = vsel %vm6239_vm1, %v6160_v3, %v2067_v24  ;;  %v2086_v20 = vsel %vm6249_vm2, %v6184_v54, %v2082_v6  ;;  %v2120_v51 = vor.u32 1.1754944e-38, %v2119_v53 }
 0x271   : > { %v3504_v50 = vpop.eup %3503  ;;  %v2132_v38 = vand.u32 2147483647, %v6182_v30  ;;  %v2101_v3 = vsel %vm6270_vm5, %v6188_v13, %v2097_v49  ;;  %v2112_v26 = vadd.f32 %v6201_v41, %v2111_v2  ;;  %vm2114_vm6 = vweird.f32 %v6201_v41  ;;  %v6348_v49 = vpop.f32.mrf.mxu1 }
 0x272   : > { %v6275_v9 = vpop.eup %3505  ;;  %v2125_v54 = vsub.f32 1.0, %v2124_v10  ;;  %vm2128_vm7 = vweird.f32 %v6182_v30  ;;  %v2135_v27 = vor.u32 1.1754944e-38, %v2134_v22  ;;  %v2149_v36 = vand.u32 2147483648, %v6194_v29  ;;  %vm6301_vm8 = vmor %vm2113_vm3, %vm2114_vm6 }
 0x273   : > { %v2139_v12 = vmul.f32 %v6275_v9, %v6194_v29  ;;  %v2076_v23 = vsel %vm6208_vm12, %v6180_v31, %v2071_v35  ;;  %v2091_v13 = vsel %vm6212_vm13, %v2090_v56, %v2086_v20  ;;  %v2147_v15 = vand.u32 2147483647, %v6194_v29  ;;  %v6334_v56 = vpop.f32.mrf.mxu0 }
 0x274   : > { %v2126_v32 = vmul.f32 %v6233_v45, %v2125_v54  ;;  %v6295_v18 = vpop.eup %3507  ;;  %v2106_v55 = vsel %vm6229_vm0, %v2105_v57, %v2101_v3  ;;  %vm6305_vm9 = vcmp.eq.f32.partialorder %v2132_v38, 8.507059e+37  ;;  %vm2143_vm10 = vweird.f32 %v6194_v29  ;;  %v7266_v3 = vld [vmem:[#allocation42_spill] sm:$0xff] }
 0x275   : > { %v2140_v52 = vsub.f32 1.0, %v2139_v12  ;;  %v6310_v11 = vadd.f32 1.0, %v3504_v50  ;;  %3509 = vpow2.f32 %v6173_v44  ;;  %v2116_v59 = vsel %vm6301_vm8, %v6201_v41, %v2112_v26  ;;  %v7267_v26 = vld [vmem:[#allocation43_spill] sm:$0xff]  ;;  %v6378_v12 = vpop.f32.mrf.mxu2 }
 0x276   : > { %v2127_v39 = vadd.f32 %v6233_v45, %v2126_v32  ;;  %vm2129_vm11 = vweird.f32 %v6233_v45  ;;  %v2154_v53 = vmul.f32 %v6295_v18, %v6218_v25  ;;  %v6321_v24 = vmul.f32 %v2076_v23, %v5936_v46  ;;  %v7283_v23 = vld [vmem:[#allocation54_spill] sm:$0xff] }
 0x277   : > { %v2141_v14 = vmul.f32 %v6275_v9, %v2140_v52  ;;  %v6324_v48 = vor.u32 1.1754944e-38, %v2149_v36  ;;  %3511 = vrcp.f32 %v6310_v11  ;;  %v6328_v44 = vmul.f32 %v2091_v13, %v5938_v8  ;;  %vm6340_vm13 = vmor %vm2128_vm7, %vm2129_vm11 }
 0x278   : > { %v6331_v41 = vmul.f32 %v2106_v55, %v5955_v0  ;;  %v2155_v6 = vsub.f32 1.0, %v2154_v53  ;;  %vm2158_vm12 = vweird.f32 %v6218_v25  ;;  %v2121_v46 = vsel %vm6254_vm4, %v2120_v51, %v2116_v59  ;;  %v7262_v0 = vld [vmem:[#allocation40_spill] sm:$0xff] }
 0x279   : > { %vm2144_vm14 = vweird.f32 %v6275_v9  ;;  %v3172_v8 = vmul.f32 -1.442695, %v6293_v61  ;;  %v2571_v7 = vmul.f32 %v6011_v21, %v7262_v0  ;;  %v2131_v2 = vsel %vm6340_vm13, %v6233_v45, %v2127_v39  ;;  %v7265_v21 = vld [vmem:[#allocation41_spill] sm:$0xff]  ;;  %v7274_v59 = vld [vmem:[#allocation44_spill] sm:$0xff] }
 0x27a   : > { %vm6353_vm15 = vcmp.eq.f32.partialorder %v2147_v15, 8.507059e+37  ;;  %v2156_v30 = vmul.f32 %v6295_v18, %v2155_v6  ;;  %v2162_v60 = vand.u32 2147483647, %v6218_v25  ;;  %v2164_v57 = vand.u32 2147483648, %v6218_v25  ;;  %vm6386_vm1 = vmor %vm2143_vm10, %vm2144_vm14 }
 0x27b   : > { %v3510_v62 = vpop.eup %3509  ;;  %v2142_v10 = vadd.f32 %v6275_v9, %v2141_v14  ;;  %3513 = vpow2.f32 %v3172_v8  ;;  %2863 = vmatmul.f32.gmra.mxu2 %v2571_v7  ;;  %v2572_v50 = vmul.f32 %v6129_v33, %v7265_v21  ;;  %v3173_v45 = vmul.f32 -1.442695, %v6334_v56  ;;  %v6434_v37 = vpop.f32.mrf.mxu0 }
 0x27c   : > { %v2157_v35 = vadd.f32 %v6295_v18, %v2156_v30  ;;  %vm2159_vm0 = vweird.f32 %v6295_v18  ;;  %v6366_v20 = vadd.f32 1.0, %v3510_v62  ;;  %v3174_v1 = vmul.f32 -1.442695, %v6348_v49 }
 0x27d   : > { %v6369_v51 = vpop.eup %3511  ;;  %v6372_v38 = vmul.f32 %v2121_v46, %v6029_v63  ;;  %2937 = vmatmul.f32.gmra.mxu3 %v2572_v50  ;;  %3515 = vpow2.f32 %v3173_v45  ;;  %v2573_v33 = vmul.f32 %v6143_v58, %v7266_v3  ;;  %v2574_v54 = vmul.f32 %v6147_v47, %v7267_v26  ;;  %v6397_v47 = vpop.f32.mrf.mxu3  ;;  %vm6406_vm3 = vmor %vm2158_vm12, %vm2159_vm0  ;;  %v7275_v46 = vld [vmem:[#allocation45_spill] sm:$0xff]  ;;  %v7280_v50 = vld [vmem:[#allocation46_spill] sm:$0xff] }
 0x27e   : > { %v2136_v36 = vsel %vm6305_vm9, %v2135_v27, %v2131_v2  ;;  %vm6390_vm2 = vcmp.eq.f32.partialorder %v2162_v60, 8.507059e+37  ;;  %v2169_v58 = vmul.f32 %v6369_v51, %v6310_v11  ;;  %3517 = vrcp.f32 %v6366_v20 }
 0x27f   : > { %v2146_v27 = vsel %vm6386_vm1, %v6275_v9, %v2142_v10  ;;  %v2165_v13 = vor.u32 1.1754944e-38, %v2164_v57  ;;  %vm2173_vm4 = vweird.f32 %v6310_v11  ;;  %v2177_v32 = vand.u32 2147483647, %v6310_v11  ;;  %2718 = vmatmul.f32.gmra.mxu0 %v2573_v33  ;;  %2792 = vmatmul.f32.gmra.mxu1 %v2574_v54  ;;  %v6455_v57 = vpop.f32.mrf.mxu1 }
 0x280   : > { %v2161_v15 = vsel %vm6406_vm3, %v6295_v18, %v2157_v35  ;;  %v2170_v9 = vsub.f32 1.0, %v2169_v58  ;;  %3519 = vpow2.f32 %v3174_v1  ;;  %v3175_v55 = vmul.f32 -1.442695, %v6378_v12 }
 0x281   : > { %v3514_v25 = vpop.eup %3513  ;;  %v6417_v16 = vmul.f32 %v2136_v36, %v6045_v19  ;;  %v2179_v31 = vand.u32 2147483648, %v6310_v11  ;;  %v3176_v52 = vmul.f32 -1.442695, %v6397_v47  ;;  %v2575_v39 = vmul.f32 %v6150_v40, %v7274_v59 }
 0x282   : > { %v2171_v53 = vmul.f32 %v6369_v51, %v2170_v9  ;;  %vm2174_vm5 = vweird.f32 %v6369_v51  ;;  %v6425_v18 = vadd.f32 1.0, %v3514_v25  ;;  %3521 = vpow2.f32 %v3175_v55  ;;  %v6558_v9 = vpop.f32.mrf.mxu2 }
 0x283   : > { %v3516_v14 = vpop.eup %3515  ;;  %v2151_v19 = vsel %vm6353_vm15, %v6324_v48, %v2146_v27  ;;  %v2166_v6 = vsel %vm6390_vm2, %v2165_v13, %v2161_v15  ;;  %3523 = vpow2.f32 %v3176_v52  ;;  %2866 = vmatmul.f32.gmra.mxu2 %v2575_v39  ;;  %v2576_v40 = vmul.f32 %v6167_v42, %v7275_v46  ;;  %vm6444_vm6 = vmor %vm2173_vm4, %vm2174_vm5 }
 0x284   : > { %v3518_v8 = vpop.eup %3517  ;;  %v2172_v0 = vadd.f32 %v6369_v51, %v2171_v53  ;;  %v2192_v7 = vand.u32 2147483647, %v6366_v20  ;;  %v2194_v2 = vand.u32 2147483648, %v6366_v20  ;;  %3525 = vrcp.f32 %v6425_v18 }
 0x285   : > { %vm6448_vm7 = vcmp.eq.f32.partialorder %v2177_v32, 8.507059e+37  ;;  %v2180_v22 = vor.u32 1.1754944e-38, %v2179_v31  ;;  %v2184_v30 = vmul.f32 %v3518_v8, %v6366_v20  ;;  %v6453_v60 = vadd.f32 1.0, %v3516_v14  ;;  %2940 = vmatmul.f32.gmra.mxu3 %v2576_v40  ;;  %v7288_v14 = vld [vmem:[#allocation55_spill] sm:$0xff] }
 0x286   : > { %v3520_v62 = vpop.eup %3519  ;;  %v2509_v10 = vmul.f32 %v2166_v6, %v6065_v34  ;;  %v2176_v11 = vsel %vm6444_vm6, %v6369_v51, %v2172_v0  ;;  %v3177_v21 = vmul.f32 -1.442695, %v6434_v37  ;;  %v2577_v45 = vmul.f32 %v6176_v5, %v7280_v50 }
 0x287   : > { %v6465_v35 = vmul.f32 %v2151_v19, %v6047_v43  ;;  %v2185_v1 = vsub.f32 1.0, %v2184_v30  ;;  %vm2188_vm8 = vweird.f32 %v6366_v20  ;;  %3527 = vrcp.f32 %v6453_v60 }
 0x288   : > { %v3522_v3 = vpop.eup %3521  ;;  %v2181_v34 = vsel %vm6448_vm7, %v2180_v22, %v2176_v11  ;;  %vm6471_vm9 = vcmp.eq.f32.partialorder %v2192_v7, 8.507059e+37  ;;  %v2195_v51 = vor.u32 1.1754944e-38, %v2194_v2  ;;  %v3178_v26 = vmul.f32 -1.442695, %v6455_v57  ;;  %2721 = vmatmul.f32.gmra.mxu0 %v2577_v45 }
 0x289   : > { %v3524_v5 = vpop.eup %3523  ;;  %v2186_v43 = vmul.f32 %v3518_v8, %v2185_v1  ;;  %vm2189_vm10 = vweird.f32 %v3518_v8  ;;  %v6476_v54 = vadd.f32 1.0, %v3520_v62  ;;  %v6478_v36 = vadd.f32 1.0, %v3522_v3 }
 0x28a   : > { %v3526_v63 = vpop.eup %3525  ;;  %v6481_v58 = vmul.f32 %v2509_v10, %v7283_v23  ;;  %v2207_v27 = vand.u32 2147483647, %v6425_v18  ;;  %v2209_v29 = vand.u32 2147483648, %v6425_v18  ;;  %3529 = vpow2.f32 %v3177_v21  ;;  %vm6490_vm11 = vmor %vm2188_vm8, %vm2189_vm10 }
 0x28b   : > { %v2510_v13 = vmul.f32 %v2181_v34, %v6137_v28  ;;  %v2187_v32 = vadd.f32 %v3518_v8, %v2186_v43  ;;  %v2199_v15 = vmul.f32 %v3526_v63, %v6425_v18  ;;  %3531 = vrcp.f32 %v6476_v54 }
 0x28c   : > { %vm2203_vm12 = vweird.f32 %v6425_v18  ;;  %v2222_v55 = vand.u32 2147483647, %v6453_v60  ;;  %3533 = vrcp.f32 %v6478_v36  ;;  %v6497_v25 = vadd.f32 1.0, %v3524_v5 }
 0x28d   : > { %v3528_v28 = vpop.eup %3527  ;;  %v2191_v31 = vsel %vm6490_vm11, %v3518_v8, %v2187_v32  ;;  %v2200_v52 = vsub.f32 1.0, %v2199_v15  ;;  %v2224_v59 = vand.u32 2147483648, %v6453_v60  ;;  %3535 = vpow2.f32 %v3178_v26  ;;  %v7297_v32 = vld [vmem:[#allocation47_spill] sm:$0xff] }
 0x28e   : > { %vm6502_vm13 = vcmp.eq.f32.partialorder %v2207_v27, 8.507059e+37  ;;  %v2210_v39 = vor.u32 1.1754944e-38, %v2209_v29  ;;  %v2214_v53 = vmul.f32 %v3528_v28, %v6453_v60  ;;  %vm2218_vm14 = vweird.f32 %v6453_v60 }
 0x28f   : > { %v6509_v19 = vmul.f32 %v2510_v13, %v7288_v14  ;;  %v2201_v6 = vmul.f32 %v3526_v63, %v2200_v52  ;;  %vm2204_vm15 = vweird.f32 %v3526_v63  ;;  %v2237_v46 = vand.u32 2147483647, %v6476_v54  ;;  %v6579_v14 = vpop.f32.mrf.mxu3 }
 0x290   : > { %v3530_v40 = vpop.eup %3529  ;;  %v2196_v8 = vsel %vm6471_vm9, %v2195_v51, %v2191_v31  ;;  %v2215_v0 = vsub.f32 1.0, %v2214_v53  ;;  %v2239_v7 = vand.u32 2147483648, %v6476_v54  ;;  %3537 = vrcp.f32 %v6497_v25  ;;  %vm6525_vm2 = vmor %vm2203_vm12, %vm2204_vm15 }
 0x291   : > { %v3532_v2 = vpop.eup %3531  ;;  %v2202_v48 = vadd.f32 %v3526_v63, %v2201_v6  ;;  %vm6516_vm0 = vcmp.eq.f32.partialorder %v2222_v55, 8.507059e+37  ;;  %v2225_v22 = vor.u32 1.1754944e-38, %v2224_v59  ;;  %vm2233_vm1 = vweird.f32 %v6476_v54 }
 0x292   : > { %v6521_v30 = vpop.eup %3533  ;;  %v2216_v10 = vmul.f32 %v3528_v28, %v2215_v0  ;;  %vm2219_vm3 = vweird.f32 %v3528_v28  ;;  %v2229_v11 = vmul.f32 %v3532_v2, %v6476_v54  ;;  %vm2248_vm4 = vweird.f32 %v6478_v36  ;;  %v6586_v54 = vpop.f32.mrf.mxu0 }
 0x293   : > { %v2252_v21 = vand.u32 2147483647, %v6478_v36  ;;  %v3536_v50 = vpop.eup %3535  ;;  %v2511_v45 = vmul.f32 %v2196_v8, %v6139_v4  ;;  %v2206_v1 = vsel %vm6525_vm2, %v3526_v63, %v2202_v48  ;;  %vm6535_vm5 = vcmp.eq.f32.partialorder %v2237_v46, 8.507059e+37  ;;  %vm2220_vm6 = vmor %vm2218_vm14, %vm2219_vm3  ;;  %v7300_v8 = vld [vmem:[#allocation56_spill] sm:$0xff] }
 0x294   : > { %v2244_v3 = vmul.f32 %v6521_v30, %v6478_v36  ;;  %v2217_v34 = vadd.f32 %v3528_v28, %v2216_v10  ;;  %v2230_v33 = vsub.f32 1.0, %v2229_v11  ;;  %v2240_v51 = vor.u32 1.1754944e-38, %v2239_v7 }
 0x295   : > { %v2254_v26 = vand.u32 2147483648, %v6478_v36  ;;  %v2211_v5 = vsel %vm6502_vm13, %v2210_v39, %v2206_v1  ;;  %vm2234_vm7 = vweird.f32 %v3532_v2  ;;  %v6546_v43 = vadd.f32 1.0, %v3530_v40  ;;  %v6588_v40 = vpop.f32.mrf.mxu1  ;;  %v7303_v36 = vld [vmem:[#allocation57_spill] sm:$0xff]  ;;  %v7306_v1 = vld [vmem:[#allocation58_spill] sm:$0xff] }
 0x296   : > { %v2245_v4 = vsub.f32 1.0, %v2244_v3  ;;  %v6548_v63 = vpop.eup %3537  ;;  %v2221_v23 = vsel %vm2220_vm6, %v3528_v28, %v2217_v34  ;;  %v2231_v27 = vmul.f32 %v3532_v2, %v2230_v33  ;;  %vm6550_vm8 = vcmp.eq.f32.partialorder %v2252_v21, 8.507059e+37  ;;  %vm6573_vm11 = vmor %vm2233_vm1, %vm2234_vm7  ;;  %v7307_v3 = vld [vmem:[#allocation48_spill] sm:$0xff] }
 0x297   : > { %v6554_v13 = vadd.f32 1.0, %v3536_v50  ;;  %v2578_v15 = vmul.f32 %v6204_v17, %v7297_v32  ;;  %v2226_v60 = vsel %vm6516_vm0, %v2225_v22, %v2221_v23  ;;  %v2259_v28 = vmul.f32 %v6548_v63, %v6497_v25  ;;  %v7318_v23 = vld [vmem:[#allocation60_spill] sm:$0xff] }
 0x298   : > { %v2246_v55 = vmul.f32 %v6521_v30, %v2245_v4  ;;  %vm2263_vm9 = vweird.f32 %v6497_v25  ;;  %v2232_v31 = vadd.f32 %v3532_v2, %v2231_v27  ;;  %vm2249_vm10 = vweird.f32 %v6521_v30 }
 0x299   : > { %v2269_v52 = vand.u32 2147483648, %v6497_v25  ;;  %3539 = vrcp.f32 %v6546_v43  ;;  %2795 = vmatmul.f32.gmra.mxu1 %v2578_v15  ;;  %v2512_v17 = vmul.f32 %v2211_v5, %v6293_v61  ;;  %v2260_v39 = vsub.f32 1.0, %v2259_v28  ;;  %vm6597_vm12 = vmor %vm2248_vm4, %vm2249_vm10 }
 0x29a   : > { %v2247_v20 = vadd.f32 %v6521_v30, %v2246_v55  ;;  %v2267_v53 = vand.u32 2147483647, %v6497_v25  ;;  %v2513_v6 = vmul.f32 %v2226_v60, %v6334_v56  ;;  %v2236_v46 = vsel %vm6573_vm11, %v3532_v2, %v2232_v31  ;;  %v7312_v60 = vld [vmem:[#allocation49_spill] sm:$0xff] }
 0x29b   : > { %3541 = vrcp.f32 %v6554_v13  ;;  %v3179_v61 = vmul.f32 -1.442695, %v6558_v9  ;;  %v6591_v0 = vmul.f32 %v2511_v45, %v7300_v8  ;;  %v2255_v7 = vor.u32 1.1754944e-38, %v2254_v26  ;;  %v6661_v8 = vpop.f32.mrf.mxu0 }
 0x29c   : > { %v2261_v2 = vmul.f32 %v6548_v63, %v2260_v39  ;;  %v2282_v48 = vand.u32 2147483647, %v6546_v43  ;;  %v2241_v42 = vsel %vm6535_vm5, %v2240_v51, %v2236_v46  ;;  %v2251_v22 = vsel %vm6597_vm12, %v6521_v30, %v2247_v20  ;;  %v7314_v39 = vld [vmem:[#allocation51_spill] sm:$0xff]  ;;  %v7315_v46 = vld [vmem:[#allocation52_spill] sm:$0xff] }
 0x29d   : > { %v2270_v62 = vor.u32 1.1754944e-38, %v2269_v52  ;;  %v2284_v10 = vand.u32 2147483648, %v6546_v43  ;;  %v6610_v11 = vmul.f32 %v2512_v17, %v7303_v36  ;;  %vm2264_vm13 = vweird.f32 %v6548_v63  ;;  %v7313_v52 = vld [vmem:[#allocation50_spill] sm:$0xff] }
 0x29e   : > { %v2262_v21 = vadd.f32 %v6548_v63, %v2261_v2  ;;  %vm6614_vm14 = vcmp.eq.f32.partialorder %v2267_v53, 8.507059e+37  ;;  %vm2278_vm15 = vweird.f32 %v6546_v43  ;;  %v6620_v18 = vmul.f32 %v2513_v6, %v7306_v1  ;;  %vm6635_vm1 = vmor %vm2263_vm9, %vm2264_vm13  ;;  %v6656_v53 = vpop.f32.mrf.mxu3 }
 0x29f   : > { %v3540_v45 = vpop.eup %3539  ;;  %3543 = vpow2.f32 %v3179_v61  ;;  %v3180_v30 = vmul.f32 -1.442695, %v6579_v14  ;;  %v2579_v34 = vmul.f32 %v6321_v24, %v7307_v3  ;;  %v2514_v33 = vmul.f32 %v2241_v42, %v6348_v49  ;;  %v6641_v49 = vpop.f32.mrf.mxu2 }
 0x2a0   : > { %v2256_v51 = vsel %vm6550_vm8, %v2255_v7, %v2251_v22  ;;  %v2274_v26 = vmul.f32 %v3540_v45, %v6546_v43  ;;  %vm6629_vm0 = vcmp.eq.f32.partialorder %v2282_v48, 8.507059e+37  ;;  %v2285_v27 = vor.u32 1.1754944e-38, %v2284_v10  ;;  %v7316_v43 = vld [vmem:[#allocation53_spill] sm:$0xff] }
 0x2a1   : > { %v3542_v4 = vpop.eup %3541  ;;  %vm2293_vm2 = vweird.f32 %v6554_v13  ;;  %v2297_v24 = vand.u32 2147483647, %v6554_v13  ;;  %3545 = vpow2.f32 %v3180_v30  ;;  %2869 = vmatmul.f32.gmra.mxu2 %v2579_v34  ;;  %v2266_v29 = vsel %vm6635_vm1, %v6548_v63, %v2262_v21  ;;  %v7317_v34 = vld [vmem:[#allocation59_spill] sm:$0xff] }
 0x2a2   : > { %v2275_v32 = vsub.f32 1.0, %v2274_v26  ;;  %v2289_v25 = vmul.f32 %v3542_v4, %v6554_v13  ;;  %v2299_v15 = vand.u32 2147483648, %v6554_v13  ;;  %v2580_v55 = vmul.f32 %v6328_v44, %v7312_v60 }
 0x2a3   : > { %v3181_v28 = vmul.f32 -1.442695, %v6586_v54  ;;  %v3182_v31 = vmul.f32 -1.442695, %v6588_v40  ;;  %v2581_v17 = vmul.f32 %v6331_v41, %v7313_v52  ;;  %vm2279_vm3 = vweird.f32 %v3540_v45  ;;  %v6663_v41 = vpop.f32.mrf.mxu1 }
 0x2a4   : > { %v2276_v59 = vmul.f32 %v3540_v45, %v2275_v32  ;;  %v2290_v20 = vsub.f32 1.0, %v2289_v25  ;;  %v2582_v63 = vmul.f32 %v6372_v38, %v7314_v39  ;;  %vm2294_vm4 = vweird.f32 %v3542_v4  ;;  %2943 = vmatmul.f32.gmra.mxu3 %v2580_v55  ;;  %vm2280_vm5 = vmor %vm2278_vm15, %vm2279_vm3  ;;  %v6705_v25 = vpop.f32.mrf.mxu0 }
 0x2a5   : > { %v3544_v6 = vpop.eup %3543  ;;  %3547 = vpow2.f32 %v3181_v28  ;;  %2724 = vmatmul.f32.gmra.mxu0 %v2581_v17  ;;  %v3183_v44 = vmul.f32 -1.442695, %v6641_v49  ;;  %v2583_v61 = vmul.f32 %v6417_v16, %v7315_v46  ;;  %v2515_v48 = vmul.f32 %v2256_v51, %v6378_v12  ;;  %vm2295_vm6 = vmor %vm2293_vm2, %vm2294_vm4 }
 0x2a6   : > { %v2277_v56 = vadd.f32 %v3540_v45, %v2276_v59  ;;  %v2291_v7 = vmul.f32 %v3542_v4, %v2290_v20  ;;  %v6665_v2 = vadd.f32 1.0, %v3544_v6  ;;  %3549 = vpow2.f32 %v3182_v31  ;;  %2798 = vmatmul.f32.gmra.mxu1 %v2582_v63  ;;  %v7322_v20 = vld [vmem:[#allocation62_spill] sm:$0xff]  ;;  %v7323_v63 = vld [vmem:[#allocation63_spill] sm:$0xff]  ;;  %v6737_v46 = vpop.f32.mrf.mxu3 }
 0x2a7   : > { %v3546_v38 = vpop.eup %3545  ;;  %v2271_v42 = vsel %vm6614_vm14, %v2270_v62, %v2266_v29  ;;  %v2300_v16 = vor.u32 1.1754944e-38, %v2299_v15  ;;  %3551 = vpow2.f32 %v3183_v44  ;;  %v3184_v36 = vmul.f32 -1.442695, %v6656_v53  ;;  %v6692_v5 = vpop.f32.mrf.mxu2 }
 0x2a8   : > { %v2281_v22 = vsel %vm2280_vm5, %v3540_v45, %v2277_v56  ;;  %v2292_v10 = vadd.f32 %v3542_v4, %v2291_v7  ;;  %3553 = vrcp.f32 %v6665_v2  ;;  %v6680_v12 = vadd.f32 1.0, %v3546_v38 }
 0x2a9   : > { %v2286_v21 = vsel %vm6629_vm0, %v2285_v27, %v2281_v22  ;;  %2872 = vmatmul.f32.gmra.mxu2 %v2583_v61  ;;  %v2584_v62 = vmul.f32 %v6465_v35, %v7316_v43  ;;  %v3185_v50 = vmul.f32 -1.442695, %v6661_v8  ;;  %v2516_v45 = vmul.f32 %v2271_v42, %v6397_v47 }
 0x2aa   : > { %v2296_v1 = vsel %vm2295_vm6, %v3542_v4, %v2292_v10  ;;  %vm2298_vm7 = vcmp.eq.f32.partialorder %v2297_v24, 8.507059e+37  ;;  %v3186_v30 = vmul.f32 -1.442695, %v6663_v41  ;;  %v6688_v51 = vmul.f32 %v2514_v33, %v7317_v34 }
 0x2ab   : > { %v3548_v3 = vpop.eup %3547  ;;  %v2301_v13 = vsel %vm2298_vm7, %v2300_v16, %v2296_v1  ;;  %v2312_v26 = vand.u32 2147483647, %v6665_v2  ;;  %3555 = vrcp.f32 %v6680_v12  ;;  %v6695_v27 = vmul.f32 %v2515_v48, %v7318_v23  ;;  %v6707_v15 = vpop.f32.mrf.mxu1 }
 0x2ac   : > { %v3550_v35 = vpop.eup %3549  ;;  %v2517_v47 = vmul.f32 %v2286_v21, %v6434_v37  ;;  %v2314_v4 = vand.u32 2147483648, %v6665_v2  ;;  %3557 = vpow2.f32 %v3184_v36  ;;  %v2518_v33 = vmul.f32 %v2301_v13, %v6455_v57  ;;  %2946 = vmatmul.f32.gmra.mxu3 %v2584_v62  ;;  %v7319_v37 = vld [vmem:[#allocation61_spill] sm:$0xff] }
 0x2ad   : > { %v3552_v24 = vpop.eup %3551  ;;  %v6700_v29 = vadd.f32 1.0, %v3548_v3  ;;  %v6702_v32 = vadd.f32 1.0, %v3550_v35  ;;  %3559 = vpow2.f32 %v3185_v50  ;;  %2727 = vmatmul.f32.gmra.mxu0 %v6481_v58  ;;  %v6710_v55 = vmul.f32 %v2516_v45, %v7319_v37  ;;  %v6760_v45 = vpop.f32.mrf.mxu0 }
 0x2ae   : > { %v3554_v60 = vpop.eup %3553  ;;  %vm2308_vm8 = vweird.f32 %v6665_v2  ;;  %3561 = vpow2.f32 %v3186_v30  ;;  %2801 = vmatmul.f32.gmra.mxu1 %v6509_v19  ;;  %v6715_v57 = vmul.f32 -1.442695, %v6692_v5  ;;  %vm6718_vm9 = vcmp.eq.f32.partialorder %v2312_v26, 8.507059e+37 }
 0x2af   : > { %v2304_v28 = vmul.f32 %v3554_v60, %v6665_v2  ;;  %3563 = vrcp.f32 %v6700_v29  ;;  %v6723_v31 = vadd.f32 1.0, %v3552_v24  ;;  %v2315_v52 = vor.u32 1.1754944e-38, %v2314_v4 }
 0x2b0   : > { %v2327_v17 = vand.u32 2147483647, %v6680_v12  ;;  %v2329_v59 = vand.u32 2147483648, %v6680_v12  ;;  %3565 = vrcp.f32 %v6702_v32  ;;  %v6731_v39 = vmul.f32 %v2517_v47, %v7322_v20 }
 0x2b1   : > { %v6728_v19 = vpop.eup %3555  ;;  %v6734_v6 = vmul.f32 %v2518_v33, %v7323_v63  ;;  %v2305_v44 = vsub.f32 1.0, %v2304_v28  ;;  %vm2323_vm10 = vweird.f32 %v6680_v12  ;;  %2875 = vmatmul.f32.gmra.mxu2 %v6591_v0  ;;  %v2342_v7 = vand.u32 2147483647, %v6700_v29 }
 0x2b2   : > { %v3558_v61 = vpop.eup %3557  ;;  %v2319_v56 = vmul.f32 %v6728_v19, %v6680_v12  ;;  %v2344_v38 = vand.u32 2147483648, %v6700_v29  ;;  %v2359_v48 = vand.u32 2147483648, %v6702_v32  ;;  %vm2309_vm11 = vweird.f32 %v3554_v60 }
 0x2b3   : > { %v3560_v42 = vpop.eup %3559  ;;  %v2306_v16 = vmul.f32 %v3554_v60, %v2305_v44  ;;  %v2357_v22 = vand.u32 2147483647, %v6702_v32  ;;  %3567 = vrcp.f32 %v6723_v31  ;;  %vm6747_vm12 = vcmp.eq.f32.partialorder %v2327_v17, 8.507059e+37  ;;  %v6762_v1 = vpop.f32.mrf.mxu1  ;;  %vm2310_vm0 = vmor %vm2308_vm8, %vm2309_vm11 }
 0x2b4   : > { %v3562_v10 = vpop.eup %3561  ;;  %v2320_v36 = vsub.f32 1.0, %v2319_v56  ;;  %v2330_v21 = vor.u32 1.1754944e-38, %v2329_v59  ;;  %vm2338_vm13 = vweird.f32 %v6700_v29  ;;  %vm2324_vm14 = vweird.f32 %v6728_v19  ;;  %2949 = vmatmul.f32.gmra.mxu3 %v6610_v11  ;;  %v6802_v17 = vpop.f32.mrf.mxu3 }
 0x2b5   : > { %v6752_v43 = vpop.eup %3563  ;;  %v2307_v62 = vadd.f32 %v3554_v60, %v2306_v16  ;;  %vm2353_vm15 = vweird.f32 %v6702_v32  ;;  %v6756_v50 = vadd.f32 1.0, %v3558_v61  ;;  %2730 = vmatmul.f32.gmra.mxu0 %v6620_v18  ;;  %vm6772_vm1 = vcmp.eq.f32.partialorder %v2342_v7, 8.507059e+37  ;;  %vm2325_vm4 = vmor %vm2323_vm10, %vm2324_vm14  ;;  %v7332_v7 = vld [vmem:[#allocation64_spill] sm:$0xff] }
 0x2b6   : > { %v6764_v30 = vpop.eup %3565  ;;  %v2321_v3 = vmul.f32 %v6728_v19, %v2320_v36  ;;  %v2334_v34 = vmul.f32 %v6752_v43, %v6700_v29  ;;  %v2345_v11 = vor.u32 1.1754944e-38, %v2344_v38  ;;  %v2360_v18 = vor.u32 1.1754944e-38, %v2359_v48  ;;  %2804 = vmatmul.f32.gmra.mxu1 %v6688_v51 }
 0x2b7   : > { %v2311_v26 = vsel %vm2310_vm0, %v3554_v60, %v2307_v62  ;;  %v2349_v35 = vmul.f32 %v6764_v30, %v6702_v32  ;;  %vm6779_vm2 = vcmp.eq.f32.partialorder %v2357_v22, 8.507059e+37  ;;  %v2372_v23 = vand.u32 2147483647, %v6723_v31  ;;  %v2692_v22 = vpop.f32.mrf.mxu0 }
 0x2b8   : > { %v2374_v47 = vand.u32 2147483648, %v6723_v31  ;;  %v2316_v4 = vsel %vm6718_vm9, %v2315_v52, %v2311_v26  ;;  %v2322_v24 = vadd.f32 %v6728_v19, %v2321_v3  ;;  %v2335_v33 = vsub.f32 1.0, %v2334_v34  ;;  %v6800_v52 = vpop.f32.mrf.mxu2 }
 0x2b9   : > { %vm2368_vm3 = vweird.f32 %v6723_v31  ;;  %3569 = vrcp.f32 %v6756_v50  ;;  %v3568_v51 = vpop.eup %3567  ;;  %v2519_v60 = vmul.f32 %v2316_v4, %v6558_v9  ;;  %v2350_v37 = vsub.f32 1.0, %v2349_v35  ;;  %2878 = vmatmul.f32.gmra.mxu2 %v6695_v27  ;;  %v7339_v4 = vld [vmem:[#allocation67_spill] sm:$0xff] }
 0x2ba   : > { %v6795_v28 = vadd.f32 1.0, %v3560_v42  ;;  %v6797_v58 = vadd.f32 1.0, %v3562_v10  ;;  %v2326_v59 = vsel %vm2325_vm4, %v6728_v19, %v2322_v24  ;;  %v2336_v9 = vmul.f32 %v6752_v43, %v2335_v33 }
 0x2bb   : > { %vm2339_vm5 = vweird.f32 %v6752_v43  ;;  %v2364_v12 = vmul.f32 %v3568_v51, %v6723_v31  ;;  %v2331_v20 = vsel %vm6747_vm12, %v2330_v21, %v2326_v59  ;;  %v2351_v63 = vmul.f32 %v6764_v30, %v2350_v37  ;;  %v2766_v10 = vpop.f32.mrf.mxu1 }
 0x2bc   : > { %vm2354_vm6 = vweird.f32 %v6764_v30  ;;  %v2387_v27 = vand.u32 2147483647, %v6756_v50  ;;  %v2337_v44 = vadd.f32 %v6752_v43, %v2336_v9  ;;  %vm6814_vm7 = vcmp.eq.f32.partialorder %v2372_v23, 8.507059e+37  ;;  %vm6822_vm8 = vmor %vm2338_vm13, %vm2339_vm5  ;;  %2952 = vmatmul.f32.gmra.mxu3 %v6710_v55  ;;  %v2911_v35 = vpop.f32.mrf.mxu3 }
 0x2bd   : > { %v2365_v61 = vsub.f32 1.0, %v2364_v12  ;;  %v2375_v56 = vor.u32 1.1754944e-38, %v2374_v47  ;;  %v2595_v38 = vmul.f32 %v2519_v60, %v7332_v7  ;;  %v2520_v48 = vmul.f32 %v2331_v20, %v6579_v14  ;;  %2733 = vmatmul.f32.gmra.mxu0 %v6731_v39  ;;  %vm2355_vm10 = vmor %vm2353_vm15, %vm2354_vm6 }
 0x2be   : > { %v2352_v16 = vadd.f32 %v6764_v30, %v2351_v63  ;;  %vm2383_vm9 = vweird.f32 %v6756_v50  ;;  %3571 = vrcp.f32 %v6795_v28  ;;  %v2341_v14 = vsel %vm6822_vm8, %v6752_v43, %v2337_v44  ;;  %2807 = vmatmul.f32.gmra.mxu1 %v6734_v6  ;;  %v7337_v6 = vld [vmem:[#allocation65_spill] sm:$0xff] }
 0x2bf   : > { %v3570_v36 = vpop.eup %3569  ;;  %v2366_v29 = vmul.f32 %v3568_v51, %v2365_v61  ;;  %vm2369_vm11 = vweird.f32 %v3568_v51  ;;  %v2389_v0 = vand.u32 2147483648, %v6756_v50  ;;  %v2346_v55 = vsel %vm6772_vm1, %v2345_v11, %v2341_v14  ;;  %v2695_v12 = vpop.f32.mrf.mxu0 }
 0x2c0   : > { %v2356_v39 = vsel %vm2355_vm10, %v6764_v30, %v2352_v16  ;;  %v2379_v21 = vmul.f32 %v3570_v36, %v6756_v50  ;;  %vm6844_vm12 = vcmp.eq.f32.partialorder %v2387_v27, 8.507059e+37  ;;  %v2521_v32 = vmul.f32 %v2346_v55, %v6586_v54  ;;  %vm2370_vm13 = vmor %vm2368_vm3, %vm2369_vm11  ;;  %v2837_v11 = vpop.f32.mrf.mxu2  ;;  %v7338_v54 = vld [vmem:[#allocation66_spill] sm:$0xff] }
 0x2c1   : > { %v2361_v62 = vsel %vm6779_vm2, %v2360_v18, %v2356_v39  ;;  %v2367_v3 = vadd.f32 %v3568_v51, %v2366_v29  ;;  %v2402_v34 = vand.u32 2147483647, %v6795_v28  ;;  %v2596_v26 = vmul.f32 %v2520_v48, %v7337_v6  ;;  %2881 = vmatmul.f32.gmra.mxu2 %v2595_v38  ;;  %v7343_v39 = vld [vmem:[#allocation69_spill] sm:$0xff] }
 0x2c2   : > { %v2522_v13 = vmul.f32 %v2361_v62, %v6588_v40  ;;  %v2380_v30 = vsub.f32 1.0, %v2379_v21  ;;  %3573 = vrcp.f32 %v6797_v58  ;;  %v2597_v23 = vmul.f32 %v2521_v32, %v7338_v54 }
 0x2c3   : > { %v2371_v2 = vsel %vm2370_vm13, %v3568_v51, %v2367_v3  ;;  %v2390_v18 = vor.u32 1.1754944e-38, %v2389_v0  ;;  %vm2398_vm14 = vweird.f32 %v6795_v28  ;;  %vm2384_vm15 = vweird.f32 %v3570_v36  ;;  %v2769_v20 = vpop.f32.mrf.mxu1 }
 0x2c4   : > { %v3572_v47 = vpop.eup %3571  ;;  %v2598_v24 = vmul.f32 %v2522_v13, %v7339_v4  ;;  %v2376_v40 = vsel %vm6814_vm7, %v2375_v56, %v2371_v2  ;;  %v2381_v31 = vmul.f32 %v3570_v36, %v2380_v30  ;;  %vm6864_vm0 = vcmp.eq.f32.partialorder %v2402_v34, 8.507059e+37  ;;  %2955 = vmatmul.f32.gmra.mxu3 %v2596_v26  ;;  %vm2385_vm2 = vmor %vm2383_vm9, %vm2384_vm15  ;;  %v2914_v0 = vpop.f32.mrf.mxu3  ;;  %v7344_v30 = vld [vmem:[#allocation70_spill] sm:$0xff] }
 0x2c5   : > { %v2523_v33 = vmul.f32 %v2376_v40, %v6641_v49  ;;  %v2394_v60 = vmul.f32 %v3572_v47, %v6795_v28  ;;  %v2404_v51 = vand.u32 2147483648, %v6795_v28  ;;  %vm2413_vm1 = vweird.f32 %v6797_v58  ;;  %2736 = vmatmul.f32.gmra.mxu0 %v2597_v23  ;;  %v7342_v49 = vld [vmem:[#allocation68_spill] sm:$0xff] }
 0x2c6   : > { %v2382_v59 = vadd.f32 %v3570_v36, %v2381_v31  ;;  %3575 = vpow2.f32 %v6715_v57  ;;  %v3188_v9 = vmul.f32 -1.442695, %v6737_v46  ;;  %vm2399_vm3 = vweird.f32 %v3572_v47  ;;  %2810 = vmatmul.f32.gmra.mxu1 %v2598_v24 }
 0x2c7   : > { %v2599_v63 = vmul.f32 %v2523_v33, %v7342_v49  ;;  %v2395_v27 = vsub.f32 1.0, %v2394_v60  ;;  %v2417_v44 = vand.u32 2147483647, %v6797_v58  ;;  %v2761_v57 = vadd.f32 %v6707_v15, %v6705_v25  ;;  %vm2400_vm4 = vmor %vm2398_vm14, %vm2399_vm3  ;;  %v2698_v28 = vpop.f32.mrf.mxu0 }
 0x2c8   : > { %v3574_v61 = vpop.eup %3573  ;;  %v2386_v19 = vsel %vm2385_vm2, %v3570_v36, %v2382_v59  ;;  %3577 = vpow2.f32 %v3188_v9  ;;  %v2764_v56 = vadd.f32 %v6762_v1, %v6760_v45  ;;  %v2767_v48 = vadd.f32 %v2766_v10, %v2692_v22  ;;  %v2840_v29 = vpop.f32.mrf.mxu2 }
 0x2c9   : > { %v2391_v7 = vsel %vm6844_vm12, %v2390_v18, %v2386_v19  ;;  %v2396_v38 = vmul.f32 %v3572_v47, %v2395_v27  ;;  %v2409_v50 = vmul.f32 %v3574_v61, %v6797_v58  ;;  %v2405_v16 = vor.u32 1.1754944e-38, %v2404_v51  ;;  %2884 = vmatmul.f32.gmra.mxu2 %v2599_v63 }
 0x2ca   : > { %v2524_v42 = vmul.f32 %v2391_v7, %v6656_v53  ;;  %v2835_v14 = vadd.f32 %v6800_v52, %v2761_v57  ;;  %v2838_v36 = vadd.f32 %v2837_v11, %v2764_v56  ;;  %v2419_v45 = vand.u32 2147483648, %v6797_v58  ;;  %v7345_v58 = vld [vmem:[#allocation71_spill] sm:$0xff] }
 0x2cb   : > { %v2397_v25 = vadd.f32 %v3572_v47, %v2396_v38  ;;  %v2410_v15 = vsub.f32 1.0, %v2409_v50  ;;  %v2841_v1 = vadd.f32 %v2840_v29, %v2767_v48  ;;  %vm2414_vm5 = vweird.f32 %v3574_v61  ;;  %v2772_v34 = vpop.f32.mrf.mxu1 }
 0x2cc   : > { %v3576_v55 = vpop.eup %3575  ;;  %v2600_v21 = vmul.f32 %v2524_v42, %v7343_v39  ;;  %v2909_v53 = vadd.f32 %v6802_v17, %v2835_v14  ;;  %v2912_v52 = vadd.f32 %v2911_v35, %v2838_v36  ;;  %vm2415_vm6 = vmor %vm2413_vm1, %vm2414_vm5  ;;  %v2420_v26 = vor.u32 1.1754944e-38, %v2419_v45 }
 0x2cd   : > { %v2401_v22 = vsel %vm2400_vm4, %v3572_v47, %v2397_v25  ;;  %v2411_v10 = vmul.f32 %v3574_v61, %v2410_v15  ;;  %v1311_v43 = vadd.f32 1.0, %v3576_v55  ;;  %v2915_v32 = vadd.f32 %v2914_v0, %v2841_v1  ;;  %v7346_v15 = vld [vmem:[#allocation72_spill] sm:$0xff] }
 0x2ce   : > { %v3578_v62 = vpop.eup %3577  ;;  %v2406_v3 = vsel %vm6864_vm0, %v2405_v16, %v2401_v22  ;;  %2965 = vst [vmem:[%s6895_s21] sm:$0xff] %v2909_v53  ;;  %2958 = vmatmul.f32.gmra.mxu3 %v2600_v21  ;;  %vm2418_vm7 = vcmp.eq.f32.partialorder %v2417_v44, 8.507059e+37  ;;  %v2770_v23 = vadd.f32 %v2769_v20, %v2695_v12  ;;  %v2773_v12 = vadd.f32 %v2772_v34, %v2698_v28 }
 0x2cf   : > { %v2525_v17 = vmul.f32 %v2406_v3, %v6661_v8  ;;  %v2412_v6 = vadd.f32 %v3574_v61, %v2411_v10  ;;  %3579 = vrcp.f32 %v1311_v43  ;;  %2966 = vst [vmem:[%s6895_s21 + $0x8] sm:$0xff] %v2912_v52  ;;  %v1312_v13 = vadd.f32 1.0, %v3578_v62  ;;  %v2917_v8 = vpop.f32.mrf.mxu3  ;;  %v2701_v33 = vpop.f32.mrf.mxu0  ;;  %v7347_v52 = vld [vmem:[#allocation73_spill] sm:$0xff] }
 0x2d0   : > { %2967 = vst [vmem:[%s6895_s21 + $0x10] sm:$0xff] %v2915_v32  ;;  %v2843_v2 = vpop.f32.mrf.mxu2  ;;  %v2434_v59 = vand.u32 2147483648, %v1311_v43  ;;  %v2432_v49 = vand.u32 2147483647, %v1311_v43  ;;  %vm2428_vm9 = vweird.f32 %v1311_v43 }
 0x2d1   : > { %v2601_v11 = vmul.f32 %v2525_v17, %v7344_v30  ;;  %v2416_v35 = vsel %vm2415_vm6, %v3574_v61, %v2412_v6  ;;  %3581 = vrcp.f32 %v1312_v13  ;;  %v2844_v47 = vadd.f32 %v2843_v2, %v2770_v23 }
 0x2d2   : > { %v2421_v54 = vsel %vm2418_vm7, %v2420_v26, %v2416_v35  ;;  %v2435_v19 = vor.u32 1.1754944e-38, %v2434_v59  ;;  %v2449_v57 = vand.u32 2147483648, %v1312_v13  ;;  %v2447_v7 = vand.u32 2147483647, %v1312_v13 }
 0x2d3   : > { %v2526_v18 = vmul.f32 %v2421_v54, %v6663_v41  ;;  %2739 = vmatmul.f32.gmra.mxu0 %v2601_v11  ;;  %v2918_v31 = vadd.f32 %v2917_v8, %v2844_v47  ;;  %v2775_v60 = vpop.f32.mrf.mxu1  ;;  %vm2433_vm12 = vcmp.eq.f32.partialorder %v2432_v49, 8.507059e+37  ;;  %vm2443_vm13 = vweird.f32 %v1312_v13 }
 0x2d4   : > { %v2450_v29 = vor.u32 1.1754944e-38, %v2449_v57  ;;  %vm2448_vm15 = vcmp.eq.f32.partialorder %v2447_v7, 8.507059e+37  ;;  %v2776_v25 = vadd.f32 %v2775_v60, %v2701_v33 }
 0x2d5   : > { %v3580_v4 = vpop.eup %3579  ;;  %v2602_v24 = vmul.f32 %v2526_v18, %v7345_v58  ;;  %2968 = vst [vmem:[%s6895_s21 + $0x18] sm:$0xff] %v2918_v31 }
 0x2d6   : > { %v2424_v40 = vmul.f32 %v3580_v4, %v1311_v43  ;;  %vm2429_vm8 = vweird.f32 %v3580_v4 }
 0x2d7   : > { %2813 = vmatmul.f32.gmra.mxu1 %v2602_v24  ;;  %v3582_v37 = vpop.eup %3581  ;;  %v2920_v63 = vpop.f32.mrf.mxu3  ;;  %vm2430_vm10 = vmor %vm2428_vm9, %vm2429_vm8 }
 0x2d8   : > { %v2425_v51 = vsub.f32 1.0, %v2424_v40  ;;  %v2439_v9 = vmul.f32 %v3582_v37, %v1312_v13  ;;  %v2846_v41 = vpop.f32.mrf.mxu2  ;;  %vm2444_vm11 = vweird.f32 %v3582_v37  ;;  %v2704_v48 = vpop.f32.mrf.mxu0 }
 0x2d9   : > { %v2847_v44 = vadd.f32 %v2846_v41, %v2773_v12  ;;  %vm2445_vm14 = vmor %vm2443_vm13, %vm2444_vm11 }
 0x2da   : > { %v2426_v20 = vmul.f32 %v3580_v4, %v2425_v51  ;;  %v2440_v27 = vsub.f32 1.0, %v2439_v9 }
 0x2db   : > { %v2921_v38 = vadd.f32 %v2920_v63, %v2847_v44  ;;  %v2778_v42 = vpop.f32.mrf.mxu1 }
 0x2dc   : > { %v2427_v61 = vadd.f32 %v3580_v4, %v2426_v20  ;;  %v2441_v56 = vmul.f32 %v3582_v37, %v2440_v27  ;;  %v2779_v32 = vadd.f32 %v2778_v42, %v2704_v48 }
 0x2dd   : > { %2969 = vst [vmem:[%s6895_s21 + $0x20] sm:$0xff] %v2921_v38 }
 0x2de   : > { %v2431_v50 = vsel %vm2430_vm10, %v3580_v4, %v2427_v61  ;;  %v2442_v14 = vadd.f32 %v3582_v37, %v2441_v56 }
 0x2df   : > { %v2436_v16 = vsel %vm2433_vm12, %v2435_v19, %v2431_v50  ;;  %v2923_v39 = vpop.f32.mrf.mxu3 }
 0x2e0   : > { %v2527_v36 = vmul.f32 %v2436_v16, %v6692_v5  ;;  %v2446_v0 = vsel %vm2445_vm14, %v3582_v37, %v2442_v14  ;;  %v2849_v55 = vpop.f32.mrf.mxu2  ;;  %v2707_v5 = vpop.f32.mrf.mxu0 }
 0x2e1   : > { %v2451_v1 = vsel %vm2448_vm15, %v2450_v29, %v2446_v0  ;;  %v2850_v53 = vadd.f32 %v2849_v55, %v2776_v25 }
 0x2e2   : > { %v2603_v45 = vmul.f32 %v2527_v36, %v7346_v15  ;;  %v2528_v21 = vmul.f32 %v2451_v1, %v6737_v46 }
 0x2e3   : > { %v2924_v10 = vadd.f32 %v2923_v39, %v2850_v53  ;;  %v2781_v43 = vpop.f32.mrf.mxu1 }
 0x2e4   : > { %2887 = vmatmul.f32.gmra.mxu2 %v2603_v45  ;;  %v2604_v22 = vmul.f32 %v2528_v21, %v7347_v52  ;;  %v2782_v46 = vadd.f32 %v2781_v43, %v2707_v5 }
 0x2e5   : > { %2970 = vst [vmem:[%s6895_s21 + $0x28] sm:$0xff] %v2924_v10 }
 0x2e6   : > { %2961 = vmatmul.f32.gmra.mxu3 %v2604_v22 }
 0x2e7   : > { %v2926_v3 = vpop.f32.mrf.mxu3 }
 0x2e8   : > { %v2852_v62 = vpop.f32.mrf.mxu2  ;;  %v2710_v17 = vpop.f32.mrf.mxu0 }
 0x2e9   : > { %v2853_v28 = vadd.f32 %v2852_v62, %v2779_v32 }
 0x2eb   : > { %v2927_v34 = vadd.f32 %v2926_v3, %v2853_v28  ;;  %v2784_v6 = vpop.f32.mrf.mxu1 }
 0x2ec   : > { %v2785_v35 = vadd.f32 %v2784_v6, %v2710_v17 }
 0x2ed   : > { %2971 = vst [vmem:[%s6895_s21 + $0x30] sm:$0xff] %v2927_v34 }
 0x2ef   : > { %v2929_v13 = vpop.f32.mrf.mxu3 }
 0x2f0   : > { %v2855_v26 = vpop.f32.mrf.mxu2  ;;  %v2713_v54 = vpop.f32.mrf.mxu0 }
 0x2f1   : > { %v2856_v30 = vadd.f32 %v2855_v26, %v2782_v46 }
 0x2f3   : > { %v2930_v11 = vadd.f32 %v2929_v13, %v2856_v30  ;;  %v2787_v23 = vpop.f32.mrf.mxu1 }
 0x2f4   : > { %v2788_v4 = vadd.f32 %v2787_v23, %v2713_v54 }
 0x2f5   : > { %2972 = vst [vmem:[%s6895_s21 + $0x38] sm:$0xff] %v2930_v11 }
 0x2f7   : > { %v2932_v8 = vpop.f32.mrf.mxu3 }
 0x2f8   : > { %v2858_v2 = vpop.f32.mrf.mxu2  ;;  %v2716_v31 = vpop.f32.mrf.mxu0 }
 0x2f9   : > { %v2859_v18 = vadd.f32 %v2858_v2, %v2785_v35 }
 0x2fb   : > { %v2933_v47 = vadd.f32 %v2932_v8, %v2859_v18  ;;  %v2790_v33 = vpop.f32.mrf.mxu1 }
 0x2fc   : > { %v2791_v37 = vadd.f32 %v2790_v33, %v2716_v31 }
 0x2fd   : > { %2973 = vst [vmem:[%s6895_s21 + $0x40] sm:$0xff] %v2933_v47 }
 0x2ff   : > { %v2935_v24 = vpop.f32.mrf.mxu3 }
 0x300   : > { %v2861_v58 = vpop.f32.mrf.mxu2  ;;  %v2719_v20 = vpop.f32.mrf.mxu0 }
 0x301   : > { %v2862_v40 = vadd.f32 %v2861_v58, %v2788_v4 }
 0x303   : > { %v2936_v60 = vadd.f32 %v2935_v24, %v2862_v40  ;;  %v2793_v49 = vpop.f32.mrf.mxu1 }
 0x304   : > { %v2794_v41 = vadd.f32 %v2793_v49, %v2719_v20 }
 0x305   : > { %2974 = vst [vmem:[%s6895_s21 + $0x48] sm:$0xff] %v2936_v60 }
 0x307   : > { %v2938_v59 = vpop.f32.mrf.mxu3 }
 0x308   : > { %v2864_v51 = vpop.f32.mrf.mxu2  ;;  %v2722_v19 = vpop.f32.mrf.mxu0 }
 0x309   : > { %v2865_v9 = vadd.f32 %v2864_v51, %v2791_v37 }
 0x30b   : > { %v2939_v12 = vadd.f32 %v2938_v59, %v2865_v9 }
 0x30d   : > { %2975 = vst [vmem:[%s6895_s21 + $0x50] sm:$0xff] %v2939_v12 }
 0x30f   : > { %v2941_v44 = vpop.f32.mrf.mxu3 }
 0x310   : > { %v2867_v63 = vpop.f32.mrf.mxu2 }
 0x311   : > { %v2868_v27 = vadd.f32 %v2867_v63, %v2794_v41 }
 0x313   : > { %v2942_v61 = vadd.f32 %v2941_v44, %v2868_v27 }
 0x315   : > { %2976 = vst [vmem:[%s6895_s21 + $0x58] sm:$0xff] %v2942_v61 }
 0x316   : > { %v2796_v57 = vpop.f32.mrf.mxu1 }
 0x317   : > { %v2797_v7 = vadd.f32 %v2796_v57, %v2722_v19 }
 0x322   : > { %v2725_v56 = vpop.f32.mrf.mxu0 }
 0x323   : > { %v2799_v38 = vpop.f32.mrf.mxu1 }
 0x324   : > { %v2870_v50 = vpop.f32.mrf.mxu2  ;;  %v2800_v36 = vadd.f32 %v2799_v38, %v2725_v56 }
 0x325   : > { %v2871_v48 = vadd.f32 %v2870_v50, %v2797_v7 }
 0x327   : > { %v2944_v42 = vpop.f32.mrf.mxu3 }
 0x328   : > { %v2945_v16 = vadd.f32 %v2944_v42, %v2871_v48 }
 0x32a   : > { %v2728_v14 = vpop.f32.mrf.mxu0  ;;  %2977 = vst [vmem:[%s6895_s21 + $0x60] sm:$0xff] %v2945_v16 }
 0x32b   : > { %v2802_v29 = vpop.f32.mrf.mxu1 }
 0x32c   : > { %v2873_v0 = vpop.f32.mrf.mxu2  ;;  %v2803_v1 = vadd.f32 %v2802_v29, %v2728_v14 }
 0x32d   : > { %v2874_v25 = vadd.f32 %v2873_v0, %v2800_v36 }
 0x32f   : > { %v2947_v15 = vpop.f32.mrf.mxu3 }
 0x330   : > { %v2948_v45 = vadd.f32 %v2947_v15, %v2874_v25 }
 0x332   : > { %2978 = vst [vmem:[%s6895_s21 + $0x68] sm:$0xff] %v2948_v45  ;;  %v2731_v55 = vpop.f32.mrf.mxu0 }
 0x333   : > { %v2805_v39 = vpop.f32.mrf.mxu1 }
 0x334   : > { %v2876_v21 = vpop.f32.mrf.mxu2  ;;  %v2806_v10 = vadd.f32 %v2805_v39, %v2731_v55 }
 0x335   : > { %v2877_v53 = vadd.f32 %v2876_v21, %v2803_v1 }
 0x337   : > { %v2950_v52 = vpop.f32.mrf.mxu3 }
 0x338   : > { %v2951_v22 = vadd.f32 %v2950_v52, %v2877_v53 }
 0x33a   : > { %2979 = vst [vmem:[%s6895_s21 + $0x70] sm:$0xff] %v2951_v22  ;;  %v2734_v43 = vpop.f32.mrf.mxu0 }
 0x33b   : > { %v2808_v62 = vpop.f32.mrf.mxu1 }
 0x33c   : > { %v2879_v5 = vpop.f32.mrf.mxu2  ;;  %v2809_v34 = vadd.f32 %v2808_v62, %v2734_v43 }
 0x33d   : > { %v2880_v32 = vadd.f32 %v2879_v5, %v2806_v10 }
 0x33f   : > { %v2953_v3 = vpop.f32.mrf.mxu3 }
 0x340   : > { %v2954_v28 = vadd.f32 %v2953_v3, %v2880_v32 }
 0x342   : > { %2980 = vst [vmem:[%s6895_s21 + $0x78] sm:$0xff] %v2954_v28  ;;  %v2737_v46 = vpop.f32.mrf.mxu0 }
 0x343   : > { %v2811_v26 = vpop.f32.mrf.mxu1 }
 0x344   : > { %v2882_v17 = vpop.f32.mrf.mxu2  ;;  %v2812_v11 = vadd.f32 %v2811_v26, %v2737_v46 }
 0x345   : > { %v2883_v6 = vadd.f32 %v2882_v17, %v2809_v34 }
 0x347   : > { %v2956_v13 = vpop.f32.mrf.mxu3 }
 0x348   : > { %v2957_v30 = vadd.f32 %v2956_v13, %v2883_v6 }
 0x34a   : > { %2981 = vst [vmem:[%s6895_s21 + $0x80] sm:$0xff] %v2957_v30 }
 0x34c   : > { %v2885_v35 = vpop.f32.mrf.mxu2 }
 0x34d   : > { %v2886_v54 = vadd.f32 %v2885_v35, %v2812_v11 }
 0x350   : > { %v2740_v8 = vpop.f32.mrf.mxu0 }
 0x351   : > { %v2959_v23 = vpop.f32.mrf.mxu3 }
 0x352   : > { %v2960_v2 = vadd.f32 %v2959_v23, %v2886_v54 }
 0x354   : > { %2982 = vst [vmem:[%s6895_s21 + $0x88] sm:$0xff] %v2960_v2  ;;  %v2814_v18 = vpop.f32.mrf.mxu1 }
 0x355   : > { %v2815_v47 = vadd.f32 %v2814_v18, %v2740_v8 }
 0x367   : > { %v2888_v4 = vpop.f32.mrf.mxu2 }
 0x368   : > { %v2889_v58 = vadd.f32 %v2888_v4, %v2815_v47 }
 0x369   : > { %v2962_v24 = vpop.f32.mrf.mxu3 }
 0x36a   : > { %v2963_v40 = vadd.f32 %v2962_v24, %v2889_v58 }
 0x36c   : > { %2983 = vst [vmem:[%s6895_s21 + $0x90] sm:$0xff] %v2963_v40 }
 0x36d   : > { %3730 = shalt.err (!%p3727_p10)
}
 0x36e   : > { %s3786_s10 = smov 128   ;;  %s3787_s24 = smov 8  }
 0x36f   : > { %3210 = dma.vmem_to_hbm [thread:$0]  (%p3899_p7), %s2998_s20, 2432, %s3000_s27, %s2985_s28, %s3786_s10, %s3786_s10, %s3787_s24  }
 0x370 PF: > { %s3014_s13 = sand.u32 1, %s3765_s15   ;;  %p7348_p12 = scmp.ge.s32.totalorder %s3777_s18, 2 }
 0x371   : > { %s3015_s21 = scalar_lea.sflag [#allocation4], %s3014_s13 }
 0x372   : > { %p3227_p13 = pnand %p7348_p12, %p3848_p6 }
 0x374   : > { %p3228_p0 = pneg %p3227_p13 }
 0x376   : > { %3760 = dma.done.wait (%p3228_p0), %s3015_s21, 2432  }
 0x377   : > { %3762 = vsyncadd (%p3228_p0), %s3015_s21, 4294964864  ;;  %p19_p3 = scmp.ge.s32.totalorder %s3885_s25, 4   ;;  %s7349_s15 = smov %s3769_s16 }
 0x378   : > { %s7350_s16 = smov %s3773_s17  ;;  %s7351_s17 = smov %s3895_s30 }
 0x379   : > { %s7352_s18 = smov %s3885_s25  ;;  %21 = sbr.rel (!%p19_p3) target bundleno = 7 (0x7), region = 93 }
 0x37e   :  { %3021 = vsyncpa [#allocation3], 1 }
 0x37f   :  { %3023 = vsyncpa [#allocation3 + $0x1], 1 }
 0x380   :  { %3024 = vsyncpa [#allocation6], 1 }
 0x381   :  { %3025 = vsyncpa [#allocation9], 1 }
 0x382   :  { %3026 = vsyncpa [#allocation4], 1 }
 0x383   :  { %3028 = vsyncpa [#allocation4 + $0x1], 1 }

</bundles_post_ra>
